<compile_context>
chip_gen: v7x
topology: tpu7x:2x2x1
jax: 0.10.0
libtpu: 0.0.40
codegen_flags: <defaults>
</compile_context>

<pallas_src>
import jax
import jax.numpy as jnp
from jax import lax
from jax.experimental import pallas as pl
from jax.experimental.pallas import tpu as pltpu

_EPS = 1e-5


def gatenet_kernel(a_ref, b_ref,
                   g1a_ref, s1a_ref, g1b_ref, s1b_ref,
                   w1_ref, c1b_ref,
                   g2_ref, s2_ref, w2_ref, c2b_ref,
                   m1_ref, m1t_ref, m2_ref, m2t_ref,
                   o_ref,
                   st_ref):
    hw = a_ref.shape[1]
    ch = a_ref.shape[2]          # channels per concat half
    ch1 = w1_ref.shape[1]        # conv1 output channels (= C_total // 2)
    g1 = m1_ref.shape[1]         # GN1 groups living in each half
    g2 = m2_ref.shape[1]         # GN2 groups
    cpg1 = ch // g1
    cpg2 = ch1 // g2
    f32 = jnp.float32

    a = a_ref[0]                 # (HW, Ch) bf16 -- kept in bf16, upcasts are
    b = b_ref[0]                 # fused into the reductions / GN apply.

    # ---- GroupNorm(32, C_total) statistics, both halves batched -------------
    # Stage the row-sums in a small VMEM tile so ONE (4, Ch)@(Ch, G1) matmul
    # produces every group sum (instead of 4 separate M=1 matmuls).
    st_ref[0:1, :] = jnp.sum(a.astype(f32), axis=0, keepdims=True)
    st_ref[1:2, :] = jnp.sum(b.astype(f32), axis=0, keepdims=True)
    st_ref[2:3, :] = jnp.sum(jnp.square(a.astype(f32)), axis=0, keepdims=True)
    st_ref[3:4, :] = jnp.sum(jnp.square(b.astype(f32)), axis=0, keepdims=True)

    gsum = jnp.dot(st_ref[0:4, :], m1_ref[...],
                   preferred_element_type=f32)                 # (4, G1)
    inv_n1 = 1.0 / (hw * cpg1)
    mean_g = gsum[0:2] * inv_n1                                 # rows: [a, b]
    var_g = gsum[2:4] * inv_n1 - mean_g * mean_g
    # TODO(synk): at production width switch to a two-pass (x - mean)^2
    # variance to avoid E[x^2]-E[x]^2 cancellation in f32.
    inv_g = lax.rsqrt(var_g + _EPS)

    # Broadcast per-group stats back to channels with one (4, G1)@(G1, Ch) dot.
    st_ref[4:6, 0:g1] = mean_g
    st_ref[6:8, 0:g1] = inv_g
    back = jnp.dot(st_ref[4:8, 0:g1], m1t_ref[...],
                   preferred_element_type=f32)                  # (4, Ch)

    scale_a = g1a_ref[...] * back[2:3]
    shift_a = s1a_ref[...] - back[0:1] * scale_a
    scale_b = g1b_ref[...] * back[3:4]
    shift_b = s1b_ref[...] - back[1:2] * scale_b

    # GN apply emits bf16 directly (one fused elementwise pass, no extra cast).
    an = (a.astype(f32) * scale_a + shift_a).astype(jnp.bfloat16)
    bn = (b.astype(f32) * scale_b + shift_b).astype(jnp.bfloat16)

    # ---- Conv1x1 (C_total -> C_total//2): one fused K=C_total matmul --------
    # Lane-axis concat of two 128-aligned bf16 tiles; the MXU accumulates the
    # full K internally instead of two K=Ch dots plus a full-tile f32 VPU add.
    xn = jnp.concatenate([an, bn], axis=-1)                     # (HW, Ct) bf16
    h = jnp.dot(xn, w1_ref[...], preferred_element_type=f32) + c1b_ref[...]
    h = jnp.maximum(h, 0.0)                                     # (HW, Ch1) f32

    # ---- GroupNorm(32, C_total//2), batched statistics ----------------------
    st_ref[8:9, 0:ch1] = jnp.sum(h, axis=0, keepdims=True)
    st_ref[9:10, 0:ch1] = jnp.sum(h * h, axis=0, keepdims=True)
    gsum2 = jnp.dot(st_ref[8:10, 0:ch1], m2_ref[...],
                    preferred_element_type=f32)                 # (2, G2)
    inv_n2 = 1.0 / (hw * cpg2)
    mean2_g = gsum2[0:1] * inv_n2
    var2_g = gsum2[1:2] * inv_n2 - mean2_g * mean2_g
    inv2_g = lax.rsqrt(var2_g + _EPS)
    st_ref[10:11, 0:g2] = mean2_g
    st_ref[11:12, 0:g2] = inv2_g
    back2 = jnp.dot(st_ref[10:12, 0:g2], m2t_ref[...],
                    preferred_element_type=f32)                 # (2, Ch1)
    scale2 = g2_ref[...] * back2[1:2]
    shift2 = s2_ref[...] - back2[0:1] * scale2
    hn = (h * scale2 + shift2).astype(jnp.bfloat16)

    # ---- Conv1x1 (C_total//2 -> C_total) + bias, ReLU ------------------------
    y = jnp.dot(hn, w2_ref[...], preferred_element_type=f32) + c2b_ref[...]
    o_ref[0] = jnp.maximum(y, 0.0).astype(o_ref.dtype)


def group_matrix(channels, groups, dtype=jnp.float32):
    """(channels, groups) 0/1 matrix: m[c, g] = 1 iff channel c is in group g."""
    per = channels // groups
    c = jnp.arange(channels)
    return (c[:, None] // per == jnp.arange(groups)[None, :]).astype(dtype)


def gatenet_forward(a, b, params, num_groups=32):
    B, HW, Ch = a.shape
    assert b.shape == (B, HW, Ch)
    Ct = 2 * Ch
    Ch1 = Ct // 2

    # GN1 groups must not straddle the a/b concat boundary for the per-half
    # statistics decomposition to be exact (review correctness concern).
    assert Ct % num_groups == 0, "C_total must be divisible by num_groups"
    cpg1 = Ct // num_groups
    assert Ch % cpg1 == 0, "GN1 groups straddle the concat boundary"
    assert Ch1 % num_groups == 0, "C_total//2 must be divisible by num_groups"
    assert Ch % 128 == 0 and HW % 8 == 0, "demo requires lane/sublane alignment"
    g1_half = Ch // cpg1            # GN1 groups per half

    def row(v):
        return v.reshape(1, -1).astype(jnp.float32)

    g1a = row(params['gn1_gamma'][:Ch])
    g1b = row(params['gn1_gamma'][Ch:])
    s1a = row(params['gn1_beta'][:Ch])
    s1b = row(params['gn1_beta'][Ch:])
    w1 = params['w1'].astype(jnp.bfloat16)            # (Ct, Ch1), used whole
    c1b = row(params['b1'])
    g2 = row(params['gn2_gamma'])
    s2 = row(params['gn2_beta'])
    w2 = params['w2'].astype(jnp.bfloat16)            # (Ch1, Ct)
    c2b = row(params['b2'])
    m1 = group_matrix(Ch, g1_half)                     # (Ch, G1)
    m1t = m1.T                                         # (G1, Ch)
    m2 = group_matrix(Ch1, num_groups)                 # (Ch1, G2)
    m2t = m2.T                                         # (G2, Ch1)

    consts = [g1a, s1a, g1b, s1b, w1, c1b, g2, s2, w2, c2b, m1, m1t, m2, m2t]

    act_in = pl.BlockSpec((1, HW, Ch), lambda i: (i, 0, 0))
    act_out = pl.BlockSpec((1, HW, Ct), lambda i: (i, 0, 0))

    def const_spec(arr):
        nd = arr.ndim
        # Grid-invariant index map: DMA'd once, revisited across grid steps.
        # TODO(synk): at production width single-buffer these (pl.Buffered(1)
        # or a manual one-shot DMA) and tile w1/w2 over output channels.
        return pl.BlockSpec(arr.shape, lambda i, _nd=nd: (0,) * _nd)

    # VMEM limit derived from actual buffer sizes (double-buffered activation
    # blocks + one copy of the constants + generous headroom for the f32
    # intermediates), clamped to a range valid on v5e/v6e (128 MiB) and v7x
    # (64 MiB physical per TensorCore).
    io_bytes = 2 * (2 * HW * Ch * 2 + HW * Ct * 2)         # bf16 a, b, out, x2 bufs
    const_bytes = int(sum(c.size * c.dtype.itemsize for c in consts))
    scratch_bytes = 16 * Ch * 4
    inter_bytes = 8 * HW * Ct * 4                          # f32 temporaries headroom
    vmem_limit = int(min(64 * 1024 * 1024,
                         max(32 * 1024 * 1024,
                             io_bytes + const_bytes + scratch_bytes + inter_bytes)))

    # NOTE: with B=2 there are only 2 pipeline steps, so activation DMA is
    # barely hidden; the production-width fix is the HW-tile grid axis in the
    # TODO above, which also restores >=8 steps for double-buffering.
    return pl.pallas_call(
        gatenet_kernel,
        out_shape=jax.ShapeDtypeStruct((B, HW, Ct), jnp.bfloat16),
        grid_spec=pltpu.PrefetchScalarGridSpec(
            num_scalar_prefetch=0,
            grid=(B,),
            in_specs=[act_in, act_in] + [const_spec(c) for c in consts],
            out_specs=act_out,
            scratch_shapes=[pltpu.VMEM((16, Ch), jnp.float32)]),
        compiler_params=pltpu.CompilerParams(
            dimension_semantics=("parallel",),
            vmem_limit_bytes=vmem_limit),
    )(a, b, *consts)


# ----------------------------- parameter setup ------------------------------

def make_params(key, c_total):
    ch = c_total // 2
    ks = jax.random.split(key, 8)
    p = {}
    p['gn1_gamma'] = 1.0 + 0.1 * jax.random.normal(ks[0], (c_total,), jnp.float32)
    p['gn1_beta'] = 0.1 * jax.random.normal(ks[1], (c_total,), jnp.float32)
    # Conv2d 1x1 weights stored pre-transposed for x @ W: (C_in, C_out).
    p['w1'] = 0.05 * jax.random.normal(ks[2], (c_total, ch), jnp.float32)
    p['b1'] = 0.1 * jax.random.normal(ks[3], (ch,), jnp.float32)
    p['gn2_gamma'] = 1.0 + 0.1 * jax.random.normal(ks[4], (ch,), jnp.float32)
    p['gn2_beta'] = 0.1 * jax.random.normal(ks[5], (ch,), jnp.float32)
    p['w2'] = 0.05 * jax.random.normal(ks[6], (ch, c_total), jnp.float32)
    p['b2'] = 0.1 * jax.random.normal(ks[7], (c_total,), jnp.float32)
    return p


# ------------------------------ pure-JAX reference ---------------------------

def gatenet_reference(a, b, p, num_groups=32, eps=_EPS):
    # Mirrors the kernel's deliberate precision choices (bf16 matmul inputs and
    # weights, f32 statistics/accumulation); the PyTorch module is f32 end-to-end.
    x = jnp.concatenate([a.astype(jnp.float32), b.astype(jnp.float32)], axis=-1)

    def gn(x, gamma, beta, groups):
        B_, HW_, C_ = x.shape
        xg = x.reshape(B_, HW_, groups, C_ // groups)
        mean = xg.mean(axis=(1, 3), keepdims=True)
        var = jnp.mean((xg - mean) ** 2, axis=(1, 3), keepdims=True)
        xn = ((xg - mean) / jnp.sqrt(var + eps)).reshape(B_, HW_, C_)
        return xn * gamma.reshape(1, 1, C_) + beta.reshape(1, 1, C_)

    def bf16(v):
        return v.astype(jnp.bfloat16).astype(jnp.float32)

    xn = gn(x, p['gn1_gamma'], p['gn1_beta'], num_groups)
    w1 = bf16(p['w1'])
    w2 = bf16(p['w2'])
    h = jnp.maximum(bf16(xn) @ w1 + p['b1'], 0.0)
    hn = gn(h, p['gn2_gamma'], p['gn2_beta'], num_groups)
    return jnp.maximum(bf16(hn) @ w2 + p['b2'], 0.0)


if __name__ == "__main__":
    # GateNet(channel_factor) hard-codes channels = 4096 * channel_factor; the
    # demo keeps the exact structure (GroupNorm(32, C) -> 1x1 conv C->C/2 ->
    # ReLU -> GroupNorm(32, C/2) -> 1x1 conv C/2->C -> ReLU) at a reduced width
    # so the example stays small.  a and b each carry C/2 channels.
    B, C_TOTAL, H, W = 2, 256, 16, 16
    C_HALF = C_TOTAL // 2
    HW = H * W

    key = jax.random.PRNGKey(0)
    ka, kb, kp = jax.random.split(key, 3)
    # PyTorch would use NCHW (B, C/2, H, W); activations here are (B, H*W, C/2).
    a = jax.random.normal(ka, (B, HW, C_HALF), jnp.float32).astype(jnp.bfloat16)
    b = jax.random.normal(kb, (B, HW, C_HALF), jnp.float32).astype(jnp.bfloat16)

    params = make_params(kp, C_TOTAL)

    out = gatenet_forward(a, b, params)
    out = jax.block_until_ready(out)

    ref = gatenet_reference(a, b, params)
    assert out.shape == (B, HW, C_TOTAL)
    out_f32 = out.astype(jnp.float32)
    max_err = float(jnp.max(jnp.abs(out_f32 - ref)))
    assert jnp.allclose(out_f32, ref, atol=3e-2, rtol=3e-2), (
        f"mismatch vs JAX reference (max abs err {max_err})")

    print("KERNEL_OK")
</pallas_src>

<mosaic_0001>
module attributes {stable_mosaic.version = 11 : i64} {
  func.func @gatenet_kernel(%arg0: i32, %arg1: memref<1x256x128xbf16, #tpu.memory_space<vmem>>, %arg2: memref<1x256x128xbf16, #tpu.memory_space<vmem>>, %arg3: memref<1x128xf32, #tpu.memory_space<vmem>>, %arg4: memref<1x128xf32, #tpu.memory_space<vmem>>, %arg5: memref<1x128xf32, #tpu.memory_space<vmem>>, %arg6: memref<1x128xf32, #tpu.memory_space<vmem>>, %arg7: memref<256x128xbf16, #tpu.memory_space<vmem>>, %arg8: memref<1x128xf32, #tpu.memory_space<vmem>>, %arg9: memref<1x128xf32, #tpu.memory_space<vmem>>, %arg10: memref<1x128xf32, #tpu.memory_space<vmem>>, %arg11: memref<128x256xbf16, #tpu.memory_space<vmem>>, %arg12: memref<1x256xf32, #tpu.memory_space<vmem>>, %arg13: memref<128x16xf32, #tpu.memory_space<vmem>>, %arg14: memref<16x128xf32, #tpu.memory_space<vmem>>, %arg15: memref<128x32xf32, #tpu.memory_space<vmem>>, %arg16: memref<32x128xf32, #tpu.memory_space<vmem>>, %arg17: memref<1x256x256xbf16, #tpu.memory_space<vmem>>, %arg18: memref<16x128xf32, #tpu.memory_space<vmem>>) attributes {dimension_semantics = [#tpu.dimension_semantics<parallel>], iteration_bounds = array<i64: 2>, scalar_prefetch = 0 : i64, scratch_operands = 1 : i64, tpu.core_type = #tpu.core_type<tc>, window_params = [{transform_indices = @transform_0, window_bounds = array<i64: 1, 256, 128>}, {transform_indices = @transform_1, window_bounds = array<i64: 1, 256, 128>}, {pipeline_mode = #tpu.pipeline_mode<synchronous>, transform_indices = @transform_2, window_bounds = array<i64: 1, 128>}, {pipeline_mode = #tpu.pipeline_mode<synchronous>, transform_indices = @transform_3, window_bounds = array<i64: 1, 128>}, {pipeline_mode = #tpu.pipeline_mode<synchronous>, transform_indices = @transform_4, window_bounds = array<i64: 1, 128>}, {pipeline_mode = #tpu.pipeline_mode<synchronous>, transform_indices = @transform_5, window_bounds = array<i64: 1, 128>}, {pipeline_mode = #tpu.pipeline_mode<synchronous>, transform_indices = @transform_6, window_bounds = array<i64: 256, 128>}, {pipeline_mode = #tpu.pipeline_mode<synchronous>, transform_indices = @transform_7, window_bounds = array<i64: 1, 128>}, {pipeline_mode = #tpu.pipeline_mode<synchronous>, transform_indices = @transform_8, window_bounds = array<i64: 1, 128>}, {pipeline_mode = #tpu.pipeline_mode<synchronous>, transform_indices = @transform_9, window_bounds = array<i64: 1, 128>}, {pipeline_mode = #tpu.pipeline_mode<synchronous>, transform_indices = @transform_10, window_bounds = array<i64: 128, 256>}, {pipeline_mode = #tpu.pipeline_mode<synchronous>, transform_indices = @transform_11, window_bounds = array<i64: 1, 256>}, {pipeline_mode = #tpu.pipeline_mode<synchronous>, transform_indices = @transform_12, window_bounds = array<i64: 128, 16>}, {pipeline_mode = #tpu.pipeline_mode<synchronous>, transform_indices = @transform_13, window_bounds = array<i64: 16, 128>}, {pipeline_mode = #tpu.pipeline_mode<synchronous>, transform_indices = @transform_14, window_bounds = array<i64: 128, 32>}, {pipeline_mode = #tpu.pipeline_mode<synchronous>, transform_indices = @transform_15, window_bounds = array<i64: 32, 128>}, {transform_indices = @transform_16, window_bounds = array<i64: 1, 256, 256>}]} {
    %c0 = arith.constant 0 : index
    %c0_0 = arith.constant 0 : index
    %c0_1 = arith.constant 0 : index
    %0 = vector.load %arg1[%c0, %c0_0, %c0_1] : memref<1x256x128xbf16, #tpu.memory_space<vmem>>, vector<1x256x128xbf16>
    %1 = vector.shape_cast %0 : vector<1x256x128xbf16> to vector<256x128xbf16>
    %c0_2 = arith.constant 0 : index
    %c0_3 = arith.constant 0 : index
    %c0_4 = arith.constant 0 : index
    %2 = vector.load %arg2[%c0_2, %c0_3, %c0_4] : memref<1x256x128xbf16, #tpu.memory_space<vmem>>, vector<1x256x128xbf16>
    %3 = vector.shape_cast %2 : vector<1x256x128xbf16> to vector<256x128xbf16>
    %4 = arith.extf %1 : vector<256x128xbf16> to vector<256x128xf32>
    %cst = arith.constant dense<0.000000e+00> : vector<128xf32>
    %5 = vector.multi_reduction <add>, %4, %cst [0] : vector<256x128xf32> to vector<128xf32>
    %6 = vector.shape_cast %5 : vector<128xf32> to vector<1x128xf32>
    %c0_5 = arith.constant 0 : index
    %c0_6 = arith.constant 0 : index
    %7 = vector.load %arg18[%c0_5, %c0_6] : memref<16x128xf32, #tpu.memory_space<vmem>>, vector<1x128xf32>
    tpu.vector_store %arg18[%c0_5, %c0_6], %6 {strides = array<i32>} : memref<16x128xf32, #tpu.memory_space<vmem>>, vector<1x128xf32>,
    %8 = arith.extf %3 : vector<256x128xbf16> to vector<256x128xf32>
    %cst_7 = arith.constant dense<0.000000e+00> : vector<128xf32>
    %9 = vector.multi_reduction <add>, %8, %cst_7 [0] : vector<256x128xf32> to vector<128xf32>
    %10 = vector.shape_cast %9 : vector<128xf32> to vector<1x128xf32>
    %c1 = arith.constant 1 : index
    %c0_8 = arith.constant 0 : index
    %11 = vector.load %arg18[%c1, %c0_8] : memref<16x128xf32, #tpu.memory_space<vmem>>, vector<1x128xf32>
    tpu.vector_store %arg18[%c1, %c0_8], %10 {strides = array<i32>} : memref<16x128xf32, #tpu.memory_space<vmem>>, vector<1x128xf32>,
    %12 = arith.extf %1 : vector<256x128xbf16> to vector<256x128xf32>
    %13 = arith.mulf %12, %12 : vector<256x128xf32>
    %cst_9 = arith.constant dense<0.000000e+00> : vector<128xf32>
    %14 = vector.multi_reduction <add>, %13, %cst_9 [0] : vector<256x128xf32> to vector<128xf32>
    %15 = vector.shape_cast %14 : vector<128xf32> to vector<1x128xf32>
    %c2 = arith.constant 2 : index
    %c0_10 = arith.constant 0 : index
    %16 = vector.load %arg18[%c2, %c0_10] : memref<16x128xf32, #tpu.memory_space<vmem>>, vector<1x128xf32>
    tpu.vector_store %arg18[%c2, %c0_10], %15 {strides = array<i32>} : memref<16x128xf32, #tpu.memory_space<vmem>>, vector<1x128xf32>,
    %17 = arith.extf %3 : vector<256x128xbf16> to vector<256x128xf32>
    %18 = arith.mulf %17, %17 : vector<256x128xf32>
    %cst_11 = arith.constant dense<0.000000e+00> : vector<128xf32>
    %19 = vector.multi_reduction <add>, %18, %cst_11 [0] : vector<256x128xf32> to vector<128xf32>
    %20 = vector.shape_cast %19 : vector<128xf32> to vector<1x128xf32>
    %c3 = arith.constant 3 : index
    %c0_12 = arith.constant 0 : index
    %21 = vector.load %arg18[%c3, %c0_12] : memref<16x128xf32, #tpu.memory_space<vmem>>, vector<1x128xf32>
    tpu.vector_store %arg18[%c3, %c0_12], %20 {strides = array<i32>} : memref<16x128xf32, #tpu.memory_space<vmem>>, vector<1x128xf32>,
    %c0_13 = arith.constant 0 : index
    %c0_14 = arith.constant 0 : index
    %22 = vector.load %arg18[%c0_13, %c0_14] : memref<16x128xf32, #tpu.memory_space<vmem>>, vector<4x128xf32>
    %c0_15 = arith.constant 0 : index
    %c0_16 = arith.constant 0 : index
    %23 = vector.load %arg13[%c0_15, %c0_16] : memref<128x16xf32, #tpu.memory_space<vmem>>, vector<128x16xf32>
    %cst_17 = arith.constant dense<0.000000e+00> : vector<4x16xf32>
    %24 = tpu.matmul %22, %23, %cst_17 {dimension_numbers = #tpu.dot_dimension_numbers<[1], [0], [0], [1], [0, 0, 1, 1], [], []>} : vector<4x128xf32>, vector<128x16xf32>, vector<4x16xf32> -> vector<4x16xf32>
    %25 = vector.extract_strided_slice %24 {offsets = [0, 0], sizes = [2, 16], strides = [1, 1]} : vector<4x16xf32> to vector<2x16xf32>
    %cst_18 = arith.constant 4.8828125E-4 : f32
    %26 = vector.broadcast %cst_18 : f32 to vector<2x16xf32>
    %27 = arith.mulf %25, %26 : vector<2x16xf32>
    %28 = vector.extract_strided_slice %24 {offsets = [2, 0], sizes = [2, 16], strides = [1, 1]} : vector<4x16xf32> to vector<2x16xf32>
    %cst_19 = arith.constant 4.8828125E-4 : f32
    %29 = vector.broadcast %cst_19 : f32 to vector<2x16xf32>
    %30 = arith.mulf %28, %29 : vector<2x16xf32>
    %31 = arith.mulf %27, %27 : vector<2x16xf32>
    %32 = arith.subf %30, %31 : vector<2x16xf32>
    %cst_20 = arith.constant 9.99999974E-6 : f32
    %33 = vector.broadcast %cst_20 : f32 to vector<2x16xf32>
    %34 = arith.addf %32, %33 : vector<2x16xf32>
    %35 = math.rsqrt %34 : vector<2x16xf32>
    %c4 = arith.constant 4 : index
    %c0_21 = arith.constant 0 : index
    %36 = vector.load %arg18[%c4, %c0_21] : memref<16x128xf32, #tpu.memory_space<vmem>>, vector<2x16xf32>
    tpu.vector_store %arg18[%c4, %c0_21], %27 {strides = array<i32>} : memref<16x128xf32, #tpu.memory_space<vmem>>, vector<2x16xf32>,
    %c6 = arith.constant 6 : index
    %c0_22 = arith.constant 0 : index
    %37 = vector.load %arg18[%c6, %c0_22] : memref<16x128xf32, #tpu.memory_space<vmem>>, vector<2x16xf32>
    tpu.vector_store %arg18[%c6, %c0_22], %35 {strides = array<i32>} : memref<16x128xf32, #tpu.memory_space<vmem>>, vector<2x16xf32>,
    %c4_23 = arith.constant 4 : index
    %c0_24 = arith.constant 0 : index
    %38 = vector.load %arg18[%c4_23, %c0_24] : memref<16x128xf32, #tpu.memory_space<vmem>>, vector<4x16xf32>
    %c0_25 = arith.constant 0 : index
    %c0_26 = arith.constant 0 : index
    %39 = vector.load %arg14[%c0_25, %c0_26] : memref<16x128xf32, #tpu.memory_space<vmem>>, vector<16x128xf32>
    %cst_27 = arith.constant dense<0.000000e+00> : vector<4x128xf32>
    %40 = tpu.matmul %38, %39, %cst_27 {dimension_numbers = #tpu.dot_dimension_numbers<[1], [0], [0], [1], [0, 0, 1, 1], [], []>} : vector<4x16xf32>, vector<16x128xf32>, vector<4x128xf32> -> vector<4x128xf32>
    %c0_28 = arith.constant 0 : index
    %c0_29 = arith.constant 0 : index
    %41 = vector.load %arg3[%c0_28, %c0_29] : memref<1x128xf32, #tpu.memory_space<vmem>>, vector<1x128xf32>
    %42 = vector.extract_strided_slice %40 {offsets = [2, 0], sizes = [1, 128], strides = [1, 1]} : vector<4x128xf32> to vector<1x128xf32>
    %43 = arith.mulf %41, %42 : vector<1x128xf32>
    %c0_30 = arith.constant 0 : index
    %c0_31 = arith.constant 0 : index
    %44 = vector.load %arg4[%c0_30, %c0_31] : memref<1x128xf32, #tpu.memory_space<vmem>>, vector<1x128xf32>
    %45 = vector.extract_strided_slice %40 {offsets = [0, 0], sizes = [1, 128], strides = [1, 1]} : vector<4x128xf32> to vector<1x128xf32>
    %46 = arith.mulf %45, %43 : vector<1x128xf32>
    %47 = arith.subf %44, %46 : vector<1x128xf32>
    %c0_32 = arith.constant 0 : index
    %c0_33 = arith.constant 0 : index
    %48 = vector.load %arg5[%c0_32, %c0_33] : memref<1x128xf32, #tpu.memory_space<vmem>>, vector<1x128xf32>
    %49 = vector.extract_strided_slice %40 {offsets = [3, 0], sizes = [1, 128], strides = [1, 1]} : vector<4x128xf32> to vector<1x128xf32>
    %50 = arith.mulf %48, %49 : vector<1x128xf32>
    %c0_34 = arith.constant 0 : index
    %c0_35 = arith.constant 0 : index
    %51 = vector.load %arg6[%c0_34, %c0_35] : memref<1x128xf32, #tpu.memory_space<vmem>>, vector<1x128xf32>
    %52 = vector.extract_strided_slice %40 {offsets = [1, 0], sizes = [1, 128], strides = [1, 1]} : vector<4x128xf32> to vector<1x128xf32>
    %53 = arith.mulf %52, %50 : vector<1x128xf32>
    %54 = arith.subf %51, %53 : vector<1x128xf32>
    %55 = arith.extf %1 : vector<256x128xbf16> to vector<256x128xf32>
    %56 = vector.broadcast %43 : vector<1x128xf32> to vector<256x128xf32>
    %57 = arith.mulf %55, %56 : vector<256x128xf32>
    %58 = vector.broadcast %47 : vector<1x128xf32> to vector<256x128xf32>
    %59 = arith.addf %57, %58 : vector<256x128xf32>
    %60 = arith.truncf %59 : vector<256x128xf32> to vector<256x128xbf16>
    %61 = arith.extf %3 : vector<256x128xbf16> to vector<256x128xf32>
    %62 = vector.broadcast %50 : vector<1x128xf32> to vector<256x128xf32>
    %63 = arith.mulf %61, %62 : vector<256x128xf32>
    %64 = vector.broadcast %54 : vector<1x128xf32> to vector<256x128xf32>
    %65 = arith.addf %63, %64 : vector<256x128xf32>
    %66 = arith.truncf %65 : vector<256x128xf32> to vector<256x128xbf16>
    %67 = tpu.concatenate %60, %66 in 1 : vector<256x128xbf16>, vector<256x128xbf16> -> vector<256x256xbf16>
    %c0_36 = arith.constant 0 : index
    %c0_37 = arith.constant 0 : index
    %68 = vector.load %arg7[%c0_36, %c0_37] : memref<256x128xbf16, #tpu.memory_space<vmem>>, vector<256x128xbf16>
    %cst_38 = arith.constant dense<0.000000e+00> : vector<256x128xf32>
    %69 = tpu.matmul %67, %68, %cst_38 {dimension_numbers = #tpu.dot_dimension_numbers<[1], [0], [0], [1], [0, 0, 1, 1], [], []>} : vector<256x256xbf16>, vector<256x128xbf16>, vector<256x128xf32> -> vector<256x128xf32>
    %c0_39 = arith.constant 0 : index
    %c0_40 = arith.constant 0 : index
    %70 = vector.load %arg8[%c0_39, %c0_40] : memref<1x128xf32, #tpu.memory_space<vmem>>, vector<1x128xf32>
    %71 = vector.broadcast %70 : vector<1x128xf32> to vector<256x128xf32>
    %72 = arith.addf %69, %71 : vector<256x128xf32>
    %cst_41 = arith.constant 0.000000e+00 : f32
    %73 = vector.broadcast %cst_41 : f32 to vector<256x128xf32>
    %74 = arith.maximumf %72, %73 : vector<256x128xf32>
    %cst_42 = arith.constant dense<0.000000e+00> : vector<128xf32>
    %75 = vector.multi_reduction <add>, %74, %cst_42 [0] : vector<256x128xf32> to vector<128xf32>
    %76 = vector.shape_cast %75 : vector<128xf32> to vector<1x128xf32>
    %c8 = arith.constant 8 : index
    %c0_43 = arith.constant 0 : index
    %77 = vector.load %arg18[%c8, %c0_43] : memref<16x128xf32, #tpu.memory_space<vmem>>, vector<1x128xf32>
    tpu.vector_store %arg18[%c8, %c0_43], %76 {strides = array<i32>} : memref<16x128xf32, #tpu.memory_space<vmem>>, vector<1x128xf32>,
    %78 = arith.mulf %74, %74 : vector<256x128xf32>
    %cst_44 = arith.constant dense<0.000000e+00> : vector<128xf32>
    %79 = vector.multi_reduction <add>, %78, %cst_44 [0] : vector<256x128xf32> to vector<128xf32>
    %80 = vector.shape_cast %79 : vector<128xf32> to vector<1x128xf32>
    %c9 = arith.constant 9 : index
    %c0_45 = arith.constant 0 : index
    %81 = vector.load %arg18[%c9, %c0_45] : memref<16x128xf32, #tpu.memory_space<vmem>>, vector<1x128xf32>
    tpu.vector_store %arg18[%c9, %c0_45], %80 {strides = array<i32>} : memref<16x128xf32, #tpu.memory_space<vmem>>, vector<1x128xf32>,
    %c8_46 = arith.constant 8 : index
    %c0_47 = arith.constant 0 : index
    %82 = vector.load %arg18[%c8_46, %c0_47] : memref<16x128xf32, #tpu.memory_space<vmem>>, vector<2x128xf32>
    %c0_48 = arith.constant 0 : index
    %c0_49 = arith.constant 0 : index
    %83 = vector.load %arg15[%c0_48, %c0_49] : memref<128x32xf32, #tpu.memory_space<vmem>>, vector<128x32xf32>
    %cst_50 = arith.constant dense<0.000000e+00> : vector<2x32xf32>
    %84 = tpu.matmul %82, %83, %cst_50 {dimension_numbers = #tpu.dot_dimension_numbers<[1], [0], [0], [1], [0, 0, 1, 1], [], []>} : vector<2x128xf32>, vector<128x32xf32>, vector<2x32xf32> -> vector<2x32xf32>
    %85 = vector.extract_strided_slice %84 {offsets = [0, 0], sizes = [1, 32], strides = [1, 1]} : vector<2x32xf32> to vector<1x32xf32>
    %cst_51 = arith.constant 9.765625E-4 : f32
    %86 = vector.broadcast %cst_51 : f32 to vector<1x32xf32>
    %87 = arith.mulf %85, %86 : vector<1x32xf32>
    %88 = vector.extract_strided_slice %84 {offsets = [1, 0], sizes = [1, 32], strides = [1, 1]} : vector<2x32xf32> to vector<1x32xf32>
    %cst_52 = arith.constant 9.765625E-4 : f32
    %89 = vector.broadcast %cst_52 : f32 to vector<1x32xf32>
    %90 = arith.mulf %88, %89 : vector<1x32xf32>
    %91 = arith.mulf %87, %87 : vector<1x32xf32>
    %92 = arith.subf %90, %91 : vector<1x32xf32>
    %cst_53 = arith.constant 9.99999974E-6 : f32
    %93 = vector.broadcast %cst_53 : f32 to vector<1x32xf32>
    %94 = arith.addf %92, %93 : vector<1x32xf32>
    %95 = math.rsqrt %94 : vector<1x32xf32>
    %c10 = arith.constant 10 : index
    %c0_54 = arith.constant 0 : index
    %96 = vector.load %arg18[%c10, %c0_54] : memref<16x128xf32, #tpu.memory_space<vmem>>, vector<1x32xf32>
    tpu.vector_store %arg18[%c10, %c0_54], %87 {strides = array<i32>} : memref<16x128xf32, #tpu.memory_space<vmem>>, vector<1x32xf32>,
    %c11 = arith.constant 11 : index
    %c0_55 = arith.constant 0 : index
    %97 = vector.load %arg18[%c11, %c0_55] : memref<16x128xf32, #tpu.memory_space<vmem>>, vector<1x32xf32>
    tpu.vector_store %arg18[%c11, %c0_55], %95 {strides = array<i32>} : memref<16x128xf32, #tpu.memory_space<vmem>>, vector<1x32xf32>,
    %c10_56 = arith.constant 10 : index
    %c0_57 = arith.constant 0 : index
    %98 = vector.load %arg18[%c10_56, %c0_57] : memref<16x128xf32, #tpu.memory_space<vmem>>, vector<2x32xf32>
    %c0_58 = arith.constant 0 : index
    %c0_59 = arith.constant 0 : index
    %99 = vector.load %arg16[%c0_58, %c0_59] : memref<32x128xf32, #tpu.memory_space<vmem>>, vector<32x128xf32>
    %cst_60 = arith.constant dense<0.000000e+00> : vector<2x128xf32>
    %100 = tpu.matmul %98, %99, %cst_60 {dimension_numbers = #tpu.dot_dimension_numbers<[1], [0], [0], [1], [0, 0, 1, 1], [], []>} : vector<2x32xf32>, vector<32x128xf32>, vector<2x128xf32> -> vector<2x128xf32>
    %c0_61 = arith.constant 0 : index
    %c0_62 = arith.constant 0 : index
    %101 = vector.load %arg9[%c0_61, %c0_62] : memref<1x128xf32, #tpu.memory_space<vmem>>, vector<1x128xf32>
    %102 = vector.extract_strided_slice %100 {offsets = [1, 0], sizes = [1, 128], strides = [1, 1]} : vector<2x128xf32> to vector<1x128xf32>
    %103 = arith.mulf %101, %102 : vector<1x128xf32>
    %c0_63 = arith.constant 0 : index
    %c0_64 = arith.constant 0 : index
    %104 = vector.load %arg10[%c0_63, %c0_64] : memref<1x128xf32, #tpu.memory_space<vmem>>, vector<1x128xf32>
    %105 = vector.extract_strided_slice %100 {offsets = [0, 0], sizes = [1, 128], strides = [1, 1]} : vector<2x128xf32> to vector<1x128xf32>
    %106 = arith.mulf %105, %103 : vector<1x128xf32>
    %107 = arith.subf %104, %106 : vector<1x128xf32>
    %108 = vector.broadcast %103 : vector<1x128xf32> to vector<256x128xf32>
    %109 = arith.mulf %74, %108 : vector<256x128xf32>
    %110 = vector.broadcast %107 : vector<1x128xf32> to vector<256x128xf32>
    %111 = arith.addf %109, %110 : vector<256x128xf32>
    %112 = arith.truncf %111 : vector<256x128xf32> to vector<256x128xbf16>
    %c0_65 = arith.constant 0 : index
    %c0_66 = arith.constant 0 : index
    %113 = vector.load %arg11[%c0_65, %c0_66] : memref<128x256xbf16, #tpu.memory_space<vmem>>, vector<128x256xbf16>
    %cst_67 = arith.constant dense<0.000000e+00> : vector<256x256xf32>
    %114 = tpu.matmul %112, %113, %cst_67 {dimension_numbers = #tpu.dot_dimension_numbers<[1], [0], [0], [1], [0, 0, 1, 1], [], []>} : vector<256x128xbf16>, vector<128x256xbf16>, vector<256x256xf32> -> vector<256x256xf32>
    %c0_68 = arith.constant 0 : index
    %c0_69 = arith.constant 0 : index
    %115 = vector.load %arg12[%c0_68, %c0_69] : memref<1x256xf32, #tpu.memory_space<vmem>>, vector<1x256xf32>
    %116 = vector.broadcast %115 : vector<1x256xf32> to vector<256x256xf32>
    %117 = arith.addf %114, %116 : vector<256x256xf32>
    %cst_70 = arith.constant 0.000000e+00 : f32
    %118 = vector.broadcast %cst_70 : f32 to vector<256x256xf32>
    %119 = arith.maximumf %117, %118 : vector<256x256xf32>
    %120 = arith.truncf %119 : vector<256x256xf32> to vector<256x256xbf16>
    %c0_71 = arith.constant 0 : index
    %c0_72 = arith.constant 0 : index
    %c0_73 = arith.constant 0 : index
    %121 = vector.load %arg17[%c0_71, %c0_72, %c0_73] : memref<1x256x256xbf16, #tpu.memory_space<vmem>>, vector<1x256x256xbf16>
    %122 = vector.shape_cast %121 : vector<1x256x256xbf16> to vector<256x256xbf16>
    %123 = vector.shape_cast %120 : vector<256x256xbf16> to vector<1x256x256xbf16>
    tpu.vector_store %arg17[%c0_71, %c0_72, %c0_73], %123 {strides = array<i32>} : memref<1x256x256xbf16, #tpu.memory_space<vmem>>, vector<1x256x256xbf16>,
    return
  }
  func.func @transform_0(%arg0: i32) -> (i32, i32, i32) {
    %c0_i32 = arith.constant 0 : i32
    %c0_i32_0 = arith.constant 0 : i32
    %c0_i32_1 = arith.constant 0 : i32
    return %arg0, %c0_i32, %c0_i32_0 : i32, i32, i32
  }
  func.func @transform_1(%arg0: i32) -> (i32, i32, i32) {
    %c0_i32 = arith.constant 0 : i32
    %c0_i32_0 = arith.constant 0 : i32
    %c0_i32_1 = arith.constant 0 : i32
    return %arg0, %c0_i32, %c0_i32_0 : i32, i32, i32
  }
  func.func @transform_2(%arg0: i32) -> (i32, i32) {
    %c0_i32 = arith.constant 0 : i32
    %c0_i32_0 = arith.constant 0 : i32
    %c0_i32_1 = arith.constant 0 : i32
    return %c0_i32, %c0_i32_0 : i32, i32
  }
  func.func @transform_3(%arg0: i32) -> (i32, i32) {
    %c0_i32 = arith.constant 0 : i32
    %c0_i32_0 = arith.constant 0 : i32
    %c0_i32_1 = arith.constant 0 : i32
    return %c0_i32, %c0_i32_0 : i32, i32
  }
  func.func @transform_4(%arg0: i32) -> (i32, i32) {
    %c0_i32 = arith.constant 0 : i32
    %c0_i32_0 = arith.constant 0 : i32
    %c0_i32_1 = arith.constant 0 : i32
    return %c0_i32, %c0_i32_0 : i32, i32
  }
  func.func @transform_5(%arg0: i32) -> (i32, i32) {
    %c0_i32 = arith.constant 0 : i32
    %c0_i32_0 = arith.constant 0 : i32
    %c0_i32_1 = arith.constant 0 : i32
    return %c0_i32, %c0_i32_0 : i32, i32
  }
  func.func @transform_6(%arg0: i32) -> (i32, i32) {
    %c0_i32 = arith.constant 0 : i32
    %c0_i32_0 = arith.constant 0 : i32
    %c0_i32_1 = arith.constant 0 : i32
    return %c0_i32, %c0_i32_0 : i32, i32
  }
  func.func @transform_7(%arg0: i32) -> (i32, i32) {
    %c0_i32 = arith.constant 0 : i32
    %c0_i32_0 = arith.constant 0 : i32
    %c0_i32_1 = arith.constant 0 : i32
    return %c0_i32, %c0_i32_0 : i32, i32
  }
  func.func @transform_8(%arg0: i32) -> (i32, i32) {
    %c0_i32 = arith.constant 0 : i32
    %c0_i32_0 = arith.constant 0 : i32
    %c0_i32_1 = arith.constant 0 : i32
    return %c0_i32, %c0_i32_0 : i32, i32
  }
  func.func @transform_9(%arg0: i32) -> (i32, i32) {
    %c0_i32 = arith.constant 0 : i32
    %c0_i32_0 = arith.constant 0 : i32
    %c0_i32_1 = arith.constant 0 : i32
    return %c0_i32, %c0_i32_0 : i32, i32
  }
  func.func @transform_10(%arg0: i32) -> (i32, i32) {
    %c0_i32 = arith.constant 0 : i32
    %c0_i32_0 = arith.constant 0 : i32
    %c0_i32_1 = arith.constant 0 : i32
    return %c0_i32, %c0_i32_0 : i32, i32
  }
  func.func @transform_11(%arg0: i32) -> (i32, i32) {
    %c0_i32 = arith.constant 0 : i32
    %c0_i32_0 = arith.constant 0 : i32
    %c0_i32_1 = arith.constant 0 : i32
    return %c0_i32, %c0_i32_0 : i32, i32
  }
  func.func @transform_12(%arg0: i32) -> (i32, i32) {
    %c0_i32 = arith.constant 0 : i32
    %c0_i32_0 = arith.constant 0 : i32
    %c0_i32_1 = arith.constant 0 : i32
    return %c0_i32, %c0_i32_0 : i32, i32
  }
  func.func @transform_13(%arg0: i32) -> (i32, i32) {
    %c0_i32 = arith.constant 0 : i32
    %c0_i32_0 = arith.constant 0 : i32
    %c0_i32_1 = arith.constant 0 : i32
    return %c0_i32, %c0_i32_0 : i32, i32
  }
  func.func @transform_14(%arg0: i32) -> (i32, i32) {
    %c0_i32 = arith.constant 0 : i32
    %c0_i32_0 = arith.constant 0 : i32
    %c0_i32_1 = arith.constant 0 : i32
    return %c0_i32, %c0_i32_0 : i32, i32
  }
  func.func @transform_15(%arg0: i32) -> (i32, i32) {
    %c0_i32 = arith.constant 0 : i32
    %c0_i32_0 = arith.constant 0 : i32
    %c0_i32_1 = arith.constant 0 : i32
    return %c0_i32, %c0_i32_0 : i32, i32
  }
  func.func @transform_16(%arg0: i32) -> (i32, i32, i32) {
    %c0_i32 = arith.constant 0 : i32
    %c0_i32_0 = arith.constant 0 : i32
    %c0_i32_1 = arith.constant 0 : i32
    return %arg0, %c0_i32, %c0_i32_0 : i32, i32, i32
  }
}

</mosaic_0001>

<bundles_post_ra>
// kernel: tpu_custom_call.1
= control target key start
LH: loop header
LB: loop body
LE: loop exit
PB: predicated region body
PF: predicated region fallthrough
CT: control target
= control target key end

     0   :  { %s5942_s0 = inlined_call_operand.vmem [shape: bf16[2,256,128], index: 0, kind: input, shape index: {}]   ;;  %s5943_s1 = inlined_call_operand.hbm [shape: bf16[2,256,128], index: 1, kind: input, shape index: {}]   ;;  %s5944_s2 = inlined_call_operand.hbm [shape: f32[1,128], index: 2, kind: input, shape index: {}]   ;;  %s5945_s3 = inlined_call_operand.hbm [shape: f32[1,128], index: 3, kind: input, shape index: {}]   ;;  %s5946_s4 = inlined_call_operand.hbm [shape: f32[1,128], index: 4, kind: input, shape index: {}]   ;;  %s5947_s5 = inlined_call_operand.hbm [shape: f32[1,128], index: 5, kind: input, shape index: {}]   ;;  %s5948_s6 = inlined_call_operand.hbm [shape: bf16[256,128], index: 6, kind: input, shape index: {}]   ;;  %s5949_s7 = inlined_call_operand.hbm [shape: f32[1,128], index: 7, kind: input, shape index: {}]   ;;  %s5950_s8 = inlined_call_operand.hbm [shape: f32[1,128], index: 8, kind: input, shape index: {}]   ;;  %s5951_s9 = inlined_call_operand.hbm [shape: f32[1,128], index: 9, kind: input, shape index: {}]   ;;  %s5952_s10 = inlined_call_operand.hbm [shape: bf16[128,256], index: 10, kind: input, shape index: {}]   ;;  %s5953_s11 = inlined_call_operand.vmem [shape: f32[1,256], index: 11, kind: input, shape index: {}]   ;;  %s5954_s12 = inlined_call_operand.vmem [shape: f32[128,16], index: 12, kind: input, shape index: {}]   ;;  %s5955_s13 = inlined_call_operand.vmem [shape: f32[16,128], index: 13, kind: input, shape index: {}]   ;;  %s5956_s14 = inlined_call_operand.vmem [shape: f32[128,32], index: 14, kind: input, shape index: {}]   ;;  %s5957_s15 = inlined_call_operand.vmem [shape: f32[32,128], index: 15, kind: input, shape index: {}]   ;;  %s5958_s16 = inlined_call_operand.hbm [shape: bf16[2,256,256], index: 16, kind: output, shape index: {}]  }
   0x1   :  { %5997 = sst [smem:[#allocation54_spill]] %s5942_s0 }
   0x2   :  { %5998 = sst [smem:[#allocation55_spill]] %s5943_s1 }
   0x3   :  { %5999 = sst [smem:[#allocation56_spill]] %s5944_s2 }
   0x4   :  { %6000 = sst [smem:[#allocation57_spill]] %s5945_s3 }
   0x5   :  { %6001 = sst [smem:[#allocation58_spill]] %s5946_s4 }
   0x6   :  { %6002 = sst [smem:[#allocation59_spill]] %s5953_s11 }
   0x7   :  { %6003 = sst [smem:[#allocation60_spill]] %s5954_s12 }
   0x8   :  { %6004 = sst [smem:[#allocation61_spill]] %s5955_s13 }
   0x9   :  { %6005 = sst [smem:[#allocation62_spill]] %s5956_s14 }
   0xa   :  { %6006 = sst [smem:[#allocation63_spill]] %s5957_s15 }
   0xb   :  { %6007 = sst [smem:[#allocation64_spill]] %s5958_s16 }
   0xc   :  { %21 = vsyncpa [#allocation4], 0 }
   0xd   :  { %23 = vsyncpa [#allocation4 + $0x1], 0 }
   0xe   :  { %24 = vsyncpa [#allocation7], 0 }
   0xf   :  { %25 = vsyncpa [#allocation10], 0 }
  0x10   :  { %26 = vsyncpa [#allocation13], 0 }
  0x11   :  { %27 = vsyncpa [#allocation16], 0 }
  0x12   :  { %28 = vsyncpa [#allocation19], 0 }
  0x13   :  { %29 = vsyncpa [#allocation5], 0 }
  0x14   :  { %31 = vsyncpa [#allocation5 + $0x1], 0  ;;  %s4200_s21 = smov 0   ;;  %s4202_s22 = smov 0  }
  0x15   :  { %s4204_s23 = smov 0   ;;  %s4206_s24 = smov 0  }
  0x16 LB: > { %s4093_s25 = smov [#allocation6]   ;;  %s4221_s27 = sadd.s32 4294967295, %s4091_s24   ;;  %s4091_s24 = sphi %s4206_s24, %s6102_s24   ;;  %s4087_s23 = sphi %s4204_s23, %s6101_s23   ;;  %s4083_s22 = sphi %s4202_s22, %s6100_s22   ;;  %s4079_s21 = sphi %s4200_s21, %s6099_s21  }
  0x17   : > { %s427_s26 = sshll.u32 %s4093_s25, 4  ;;  %p2939_p0 = scmp.ge.s32.totalorder %s4091_s24, 1  ;;  %s4226_s26 = int_to_ptr.vmem [resolvable:$true] %s427_s26 }
  0x18   : > { %p5965_p1 = scmp.eq.s32.totalorder %s4221_s27, 0  ;;  %p414_p2 = scmp.lt.s32.totalorder %s4091_s24, 3 }
  0x19   : > { %s4094_s29 = smov [#allocation9]   ;;  %s4095_s0 = smov [#allocation12]  }
  0x1a   : > { %p4228_p3 = pnand %p2939_p0, %p414_p2  ;;  %s449_s30 = sshll.u32 %s4094_s29, 4  ;;  %s4235_s30 = int_to_ptr.vmem [resolvable:$true] %s449_s30 }
  0x1b   : > { %s470_s17 = sshll.u32 %s4095_s0, 4  ;;  %s6011_s2 = sld [smem:[#allocation56_spill]]  ;;  %s4243_s17 = int_to_ptr.vmem [resolvable:$true] %s470_s17 }
  0x1c   : > { %s6008_s28 = scalar_select %p4228_p3, 1, 0 }
  0x1d   : > { %p3571_p5 = pneg %p4228_p3 }
  0x1e   : > { %6009 = sst [smem:[#allocation28_spill]] %s6008_s28 }
  0x1f   : > { %p4239_p6 = pnand %p3571_p5, %p5965_p1 }
  0x21   : > { %s3723_s25 = scalar_lea.hbm %s6011_s2, 16  ;;  %p4253_p8 = pneg %p4239_p6 }
  0x22   : > { %p3724_p7 = scmp.ne.s32.totalorder %s6011_s2, %s3723_s25  ;;  %p3730_p11 = scmp.lt.u32.totalorder %s3723_s25, %s6011_s2 }
  0x24   : > { %p3726_p9 = pnand %p4253_p8, %p3724_p7 }
  0x26   : > { %p3727_p10 = pneg %p3726_p9 }
  0x28   : > { %p3732_p12 = pnand %p3730_p11, %p3727_p10 }
  0x2a   : > { %3735 = shalt.err (!%p3732_p12)
}
  0x2b   : > { %s3736_s11 = scalar_lea.vmem %s4226_s26, 16  ;;  %s3743_s16 = scalar_lea.vmem %s4226_s26, 32 }
  0x2c   : > { %p3737_p13 = scmp.ne.s32.totalorder %s4226_s26, %s3736_s11  ;;  %p3744_p5 = scmp.lt.s32.totalorder %s4226_s26, %s4226_s26 }
  0x2d   : > { %p3745_p7 = scmp.lt.s32.totalorder %s3743_s16, %s3736_s11 }
  0x2e   : > { %p3739_p0 = pnand %p3737_p13, %p4253_p8 }
  0x2f   : > { %p3746_p9 = por %p3745_p7, %p3744_p5 }
  0x30   : > { %p3740_p2 = pneg %p3739_p0 }
  0x32   : > { %p3747_p4 = pnand %p3746_p9, %p3740_p2 }
  0x34   : > { %3750 = shalt.err (!%p3747_p4)
}
  0x35   : > { %3574 = dma.hbm_to_vmem [thread:$0]  (!%p4239_p6), %s6011_s2, 16, %s4226_s26, [#allocation7]  }
  0x36   : > { %s6013_s4 = sld [smem:[#allocation58_spill]] }
  0x3c   : > { %s3751_s0 = scalar_lea.hbm %s6013_s4, 16 }
  0x3d   : > { %p3752_p10 = scmp.ne.s32.totalorder %s6013_s4, %s3751_s0  ;;  %p3758_p4 = scmp.lt.u32.totalorder %s3751_s0, %s6013_s4 }
  0x3f   : > { %p3754_p11 = pnand %p3752_p10, %p4253_p8 }
  0x41   : > { %p3755_p12 = pneg %p3754_p11 }
  0x43   : > { %p3760_p13 = pnand %p3758_p4, %p3755_p12 }
  0x45   : > { %3763 = shalt.err (!%p3760_p13)
}
  0x46   : > { %s3764_s26 = scalar_lea.vmem %s4235_s30, 16  ;;  %s3771_s13 = scalar_lea.vmem %s4235_s30, 32 }
  0x47   : > { %p3765_p0 = scmp.ne.s32.totalorder %s4235_s30, %s3764_s26  ;;  %p3772_p7 = scmp.lt.s32.totalorder %s4235_s30, %s4235_s30 }
  0x48   : > { %p3773_p9 = scmp.lt.s32.totalorder %s3771_s13, %s3764_s26 }
  0x49   : > { %p3767_p2 = pnand %p3765_p0, %p4253_p8 }
  0x4a   : > { %p3774_p10 = por %p3773_p9, %p3772_p7 }
  0x4b   : > { %p3768_p5 = pneg %p3767_p2 }
  0x4d   : > { %p3775_p11 = pnand %p3774_p10, %p3768_p5 }
  0x4f   : > { %3778 = shalt.err (!%p3775_p11)
}
  0x50   : > { %3580 = dma.hbm_to_vmem [thread:$0]  (!%p4239_p6), %s6013_s4, 16, %s4235_s30, [#allocation10]  }
  0x51   : > { %s3779_s25 = scalar_lea.hbm %s5948_s6, 2048 }
  0x52   : > { %p3780_p12 = scmp.ne.s32.totalorder %s5948_s6, %s3779_s25  ;;  %p3786_p0 = scmp.lt.u32.totalorder %s3779_s25, %s5948_s6 }
  0x54   : > { %p3782_p4 = pnand %p3780_p12, %p4253_p8 }
  0x56   : > { %p3783_p13 = pneg %p3782_p4 }
  0x58   : > { %p3788_p2 = pnand %p3786_p0, %p3783_p13 }
  0x5a   : > { %3791 = shalt.err (!%p3788_p2)
}
  0x5b   : > { %s3792_s30 = scalar_lea.vmem %s4243_s17, 2048  ;;  %p3800_p10 = scmp.lt.s32.totalorder %s4243_s17, %s4243_s17 }
  0x5c   : > { %p3793_p5 = scmp.ne.s32.totalorder %s4243_s17, %s3792_s30  ;;  %p3801_p11 = scmp.lt.s32.totalorder %s3792_s30, %s3792_s30 }
  0x5e   : > { %p3795_p7 = pnand %p3793_p5, %p4253_p8  ;;  %p3802_p12 = por %p3801_p11, %p3800_p10 }
  0x60   : > { %p3796_p9 = pneg %p3795_p7 }
  0x62   : > { %p3803_p4 = pnand %p3802_p12, %p3796_p9 }
  0x64   : > { %3806 = shalt.err (!%p3803_p4)
}
  0x65   : > { %s4096_s13 = smov 64   ;;  %s4097_s14 = smov 4  }
  0x66   : > { %3586 = dma.hbm_to_vmem [thread:$0]  (!%p4239_p6), %s5948_s6, 2048, %s4243_s17, [#allocation13], %s4096_s13, %s4096_s13, %s4097_s14  }
  0x67   : > { %s4098_s20 = smov [#allocation15]   ;;  %s4099_s0 = smov [#allocation8]  }
  0x68   : > { %s495_s25 = sshll.u32 %s4098_s20, 4  ;;  %s438_s11 = sshll.u32 %s4099_s0, 4  ;;  %s496_s25 = int_to_ptr.vmem [resolvable:$true] %s495_s25  ;;  %s439_s11 = int_to_ptr.vmem [resolvable:$true] %s438_s11 }
  0x69   : > { %s3807_s30 = scalar_lea.hbm %s5950_s8, 16 }
  0x6a   : > { %p3808_p13 = scmp.ne.s32.totalorder %s5950_s8, %s3807_s30  ;;  %p3814_p5 = scmp.lt.u32.totalorder %s3807_s30, %s5950_s8 }
  0x6c   : > { %p3810_p0 = pnand %p3808_p13, %p4253_p8 }
  0x6e   : > { %p3811_p2 = pneg %p3810_p0 }
  0x70   : > { %p3816_p7 = pnand %p3814_p5, %p3811_p2 }
  0x72   : > { %3819 = shalt.err (!%p3816_p7)
}
  0x73   : > { %s3820_s17 = scalar_lea.vmem %s496_s25, 16  ;;  %s3827_s15 = scalar_lea.vmem %s496_s25, 32 }
  0x74   : > { %p3821_p9 = scmp.ne.s32.totalorder %s496_s25, %s3820_s17  ;;  %p3828_p12 = scmp.lt.s32.totalorder %s496_s25, %s496_s25 }
  0x75   : > { %p3829_p4 = scmp.lt.s32.totalorder %s3827_s15, %s3820_s17 }
  0x76   : > { %p3823_p10 = pnand %p3821_p9, %p4253_p8 }
  0x77   : > { %p3830_p1 = por %p3829_p4, %p3828_p12 }
  0x78   : > { %p3824_p11 = pneg %p3823_p10 }
  0x7a   : > { %p3831_p3 = pnand %p3830_p1, %p3824_p11 }
  0x7c   : > { %3834 = shalt.err (!%p3831_p3)
}
  0x7d   : > { %3592 = dma.hbm_to_vmem [thread:$0]  (!%p4239_p6), %s5950_s8, 16, %s496_s25, [#allocation16]  }
  0x7e   : > { %s6014_s3 = sld [smem:[#allocation57_spill]] }
  0x84   : > { %s3835_s19 = scalar_lea.hbm %s6014_s3, 16 }
  0x85   : > { %p3836_p13 = scmp.ne.s32.totalorder %s6014_s3, %s3835_s19  ;;  %p3842_p3 = scmp.lt.u32.totalorder %s3835_s19, %s6014_s3 }
  0x87   : > { %p3838_p0 = pnand %p3836_p13, %p4253_p8 }
  0x89   : > { %p3839_p1 = pneg %p3838_p0 }
  0x8b   : > { %p3844_p2 = pnand %p3842_p3, %p3839_p1 }
  0x8d   : > { %3847 = shalt.err (!%p3844_p2)
}
  0x8e   : > { %s3848_s30 = scalar_lea.vmem %s439_s11, 16  ;;  %s3855_s25 = scalar_lea.vmem %s439_s11, 32 }
  0x8f   : > { %p3849_p5 = scmp.ne.s32.totalorder %s439_s11, %s3848_s30  ;;  %p3856_p10 = scmp.lt.s32.totalorder %s439_s11, %s439_s11 }
  0x90   : > { %p3857_p11 = scmp.lt.s32.totalorder %s3855_s25, %s3848_s30 }
  0x91   : > { %p3851_p7 = pnand %p3849_p5, %p4253_p8 }
  0x92   : > { %p3858_p12 = por %p3857_p11, %p3856_p10 }
  0x93   : > { %p3852_p9 = pneg %p3851_p7 }
  0x95   : > { %p3859_p4 = pnand %p3858_p12, %p3852_p9 }
  0x97   : > { %3862 = shalt.err (!%p3859_p4)
}
  0x98   : > { %3577 = dma.hbm_to_vmem [thread:$0]  (!%p4239_p6), %s6014_s3, 16, %s439_s11, [#allocation7]  }
  0x99   : > { %s4100_s2 = smov [#allocation11]   ;;  %s4101_s12 = smov [#allocation14]  }
  0x9a   : > { %s460_s4 = sshll.u32 %s4100_s2, 4  ;;  %s484_s28 = sshll.u32 %s4101_s12, 4  ;;  %s461_s4 = int_to_ptr.vmem [resolvable:$true] %s460_s4  ;;  %s485_s28 = int_to_ptr.vmem [resolvable:$true] %s484_s28 }
  0x9b   : > { %s3863_s0 = scalar_lea.hbm %s5947_s5, 16 }
  0x9c   : > { %p3864_p13 = scmp.ne.s32.totalorder %s5947_s5, %s3863_s0  ;;  %p3870_p3 = scmp.lt.u32.totalorder %s3863_s0, %s5947_s5 }
  0x9e   : > { %p3866_p0 = pnand %p3864_p13, %p4253_p8 }
  0xa0   : > { %p3867_p1 = pneg %p3866_p0 }
  0xa2   : > { %p3872_p2 = pnand %p3870_p3, %p3867_p1 }
  0xa4   : > { %3875 = shalt.err (!%p3872_p2)
}
  0xa5   : > { %s3876_s11 = scalar_lea.vmem %s461_s4, 16  ;;  %s3883_s17 = scalar_lea.vmem %s461_s4, 32 }
  0xa6   : > { %p3877_p5 = scmp.ne.s32.totalorder %s461_s4, %s3876_s11  ;;  %p3884_p10 = scmp.lt.s32.totalorder %s461_s4, %s461_s4 }
  0xa7   : > { %p3885_p11 = scmp.lt.s32.totalorder %s3883_s17, %s3876_s11 }
  0xa8   : > { %p3879_p7 = pnand %p3877_p5, %p4253_p8 }
  0xa9   : > { %p3886_p12 = por %p3885_p11, %p3884_p10 }
  0xaa   : > { %p3880_p9 = pneg %p3879_p7 }
  0xac   : > { %p3887_p4 = pnand %p3886_p12, %p3880_p9 }
  0xae   : > { %3890 = shalt.err (!%p3887_p4)
}
  0xaf   : > { %3583 = dma.hbm_to_vmem [thread:$0]  (!%p4239_p6), %s5947_s5, 16, %s461_s4, [#allocation10]  }
  0xb0   : > { %s3891_s20 = scalar_lea.hbm %s5949_s7, 16 }
  0xb1   : > { %p3892_p13 = scmp.ne.s32.totalorder %s5949_s7, %s3891_s20  ;;  %p3898_p3 = scmp.lt.u32.totalorder %s3891_s20, %s5949_s7 }
  0xb3   : > { %p3894_p0 = pnand %p3892_p13, %p4253_p8 }
  0xb5   : > { %p3895_p1 = pneg %p3894_p0 }
  0xb7   : > { %p3900_p2 = pnand %p3898_p3, %p3895_p1 }
  0xb9   : > { %3903 = shalt.err (!%p3900_p2)
}
  0xba   : > { %s3904_s25 = scalar_lea.vmem %s485_s28, 16  ;;  %s3911_s4 = scalar_lea.vmem %s485_s28, 32 }
  0xbb   : > { %p3905_p5 = scmp.ne.s32.totalorder %s485_s28, %s3904_s25  ;;  %p3912_p10 = scmp.lt.s32.totalorder %s485_s28, %s485_s28 }
  0xbc   : > { %p3913_p11 = scmp.lt.s32.totalorder %s3911_s4, %s3904_s25 }
  0xbd   : > { %p3907_p7 = pnand %p3905_p5, %p4253_p8 }
  0xbe   : > { %p3914_p12 = por %p3913_p11, %p3912_p10 }
  0xbf   : > { %p3908_p9 = pneg %p3907_p7 }
  0xc1   : > { %p3915_p4 = pnand %p3914_p12, %p3908_p9 }
  0xc3   : > { %3918 = shalt.err (!%p3915_p4)
}
  0xc4   : > { %3589 = dma.hbm_to_vmem [thread:$0]  (!%p4239_p6), %s5949_s7, 16, %s485_s28, [#allocation13]  }
  0xc5   : > { %s4102_s15 = smov [#allocation17]   ;;  %s4103_s12 = smov [#allocation18]  }
  0xc6   : > { %s506_s2 = sshll.u32 %s4102_s15, 4  ;;  %s516_s19 = sshll.u32 %s4103_s12, 4  ;;  %s507_s2 = int_to_ptr.vmem [resolvable:$true] %s506_s2  ;;  %s517_s19 = int_to_ptr.vmem [resolvable:$true] %s516_s19 }
  0xc7   : > { %s3919_s16 = scalar_lea.hbm %s5951_s9, 16 }
  0xc8   : > { %p3920_p13 = scmp.ne.s32.totalorder %s5951_s9, %s3919_s16  ;;  %p3926_p3 = scmp.lt.u32.totalorder %s3919_s16, %s5951_s9 }
  0xca   : > { %p3922_p0 = pnand %p3920_p13, %p4253_p8 }
  0xcc   : > { %p3923_p1 = pneg %p3922_p0 }
  0xce   : > { %p3928_p2 = pnand %p3926_p3, %p3923_p1 }
  0xd0   : > { %3931 = shalt.err (!%p3928_p2)
}
  0xd1   : > { %s3932_s28 = scalar_lea.vmem %s507_s2, 16  ;;  %s3939_s11 = scalar_lea.vmem %s507_s2, 32 }
  0xd2   : > { %p3933_p5 = scmp.ne.s32.totalorder %s507_s2, %s3932_s28  ;;  %p3940_p10 = scmp.lt.s32.totalorder %s507_s2, %s507_s2 }
  0xd3   : > { %p3941_p11 = scmp.lt.s32.totalorder %s3939_s11, %s3932_s28 }
  0xd4   : > { %p3935_p7 = pnand %p3933_p5, %p4253_p8 }
  0xd5   : > { %p3942_p12 = por %p3941_p11, %p3940_p10 }
  0xd6   : > { %p3936_p9 = pneg %p3935_p7 }
  0xd8   : > { %p3943_p4 = pnand %p3942_p12, %p3936_p9 }
  0xda   : > { %3946 = shalt.err (!%p3943_p4)
}
  0xdb   : > { %3595 = dma.hbm_to_vmem [thread:$0]  (!%p4239_p6), %s5951_s9, 16, %s507_s2, [#allocation16]  }
  0xdc   : > { %s3947_s0 = scalar_lea.hbm %s5952_s10, 2048 }
  0xdd   : > { %p3948_p13 = scmp.ne.s32.totalorder %s5952_s10, %s3947_s0  ;;  %p3954_p3 = scmp.lt.u32.totalorder %s3947_s0, %s5952_s10 }
  0xdf   : > { %p3950_p0 = pnand %p3948_p13, %p4253_p8 }
  0xe1   : > { %p3951_p1 = pneg %p3950_p0 }
  0xe3   : > { %p3956_p2 = pnand %p3954_p3, %p3951_p1 }
  0xe5   : > { %3959 = shalt.err (!%p3956_p2)
}
  0xe6   : > { %s3960_s4 = scalar_lea.vmem %s517_s19, 2048  ;;  %p3968_p10 = scmp.lt.s32.totalorder %s517_s19, %s517_s19 }
  0xe7   : > { %p3961_p5 = scmp.ne.s32.totalorder %s517_s19, %s3960_s4  ;;  %p3969_p11 = scmp.lt.s32.totalorder %s3960_s4, %s3960_s4 }
  0xe9   : > { %p3963_p7 = pnand %p3961_p5, %p4253_p8  ;;  %p3970_p12 = por %p3969_p11, %p3968_p10 }
  0xeb   : > { %p3964_p9 = pneg %p3963_p7 }
  0xed   : > { %p3971_p4 = pnand %p3970_p12, %p3964_p9 }
  0xef   : > { %3974 = shalt.err (!%p3971_p4)
}
  0xf0   : > { %s4104_s2 = smov 128   ;;  %s4105_s29 = smov 8  }
  0xf1   : > { %3598 = dma.hbm_to_vmem [thread:$0]  (!%p4239_p6), %s5952_s10, 2048, %s517_s19, [#allocation19], %s4104_s2, %s4104_s2, %s4105_s29  }
  0xf2   : > { %s2938_s17 = sadd.s32 4294967294, %s4091_s24   ;;  %s4435_s15 = sadd.s32 1, %s4091_s24  }
  0xf3   : > { %s70_s12 = sadd.s32 1, %s4087_s23  ;;  %s67_s20 = ssub.s32 %s4091_s24, %s4435_s15 }
  0xf4   : > { %p77_p8 = scmp.ne.s32.totalorder %s4087_s23, %s4083_s22  ;;  %p68_p13 = scmp.eq.s32.totalorder %s67_s20, 0 }
  0xf5   : > { %p78_p0 = scmp.eq.s32.totalorder %s4091_s24, 0  ;;  %p83_p1 = scmp.ne.s32.totalorder %s4083_s22, %s4079_s21 }
  0xf6   : > { %p401_p3 = scmp.eq.s32.totalorder %s4221_s27, 1  ;;  %p6015_p5 = scmp.eq.s32.totalorder %s4221_s27, 0 }
  0xf7   : > { %s4447_s0 = scalar_select %p68_p13, %s4087_s23, %s70_s12  }
  0xf8   : > { %p79_p2 = por %p78_p0, %p77_p8  ;;  %p4451_p7 = por %p6015_p5, %p83_p1 }
  0xf9   : > { %p4455_p6 = por %p401_p3, %p77_p8  ;;  %p407_p9 = scmp.eq.s32.totalorder %s2938_s17, 1 }
  0xfa   : > { %p3616_p10 = scmp.lt.s32.totalorder %s4091_s24, 2  ;;  %s553_s16 = sand.u32 1, %s4087_s23  }
  0xfb   : > { %s6017_s19 = scalar_select %p4455_p6, 1, 0 }
  0xfc   : > { %p4461_p11 = por %p407_p9, %p83_p1  ;;  %s2950_s30 = sshll.u32 %s553_s16, 7 }
  0xfd   : > { %s3039_s25 = sshll.u32 %s4091_s24, 11  ;;  %s6019_s1 = sld [smem:[#allocation55_spill]] }
  0xfe   : > { %s6018_s26 = scalar_select %p4461_p11, 1, 0 }
  0xff   : > { %s557_s28 = scalar_lea.vmem [#allocation3], %s2950_s30  ;;  %p4471_p12 = pnand %p3616_p10, %p79_p2 }
 0x100   : > { %s564_s11 = sshll.u32 %s557_s28, 4  ;;  %s4477_s12 = scalar_lea.sflag [#allocation4], %s553_s16  ;;  %s4475_s11 = int_to_ptr.vmem [resolvable:$true] %s564_s11 }
 0x101   : > { %p3977_p8 = pneg %p4471_p12 }
 0x103   : > { %s4469_s29 = scalar_lea.hbm %s6019_s1, %s3039_s25  ;;  %s3980_s4 = scalar_lea.hbm %s6019_s1, 4096 }
 0x104   : > { %s3975_s20 = scalar_lea.hbm %s4469_s29, 2048  ;;  %p3981_p1 = scmp.lt.u32.totalorder %s4469_s29, %s6019_s1 }
 0x105   : > { %p3976_p4 = scmp.ne.s32.totalorder %s4469_s29, %s3975_s20  ;;  %p3982_p3 = scmp.lt.u32.totalorder %s3980_s4, %s3975_s20 }
 0x106   : > { %p3984_p5 = scmp.lt.u32.totalorder %s3975_s20, %s4469_s29 }
 0x107   : > { %p3978_p13 = pnand %p3977_p8, %p3976_p4  ;;  %p3983_p2 = por %p3982_p3, %p3981_p1 }
 0x109   : > { %p3979_p0 = pneg %p3978_p13  ;;  %p3985_p9 = por %p3984_p5, %p3983_p2 }
 0x10b   : > { %p3986_p10 = pnand %p3985_p9, %p3979_p0 }
 0x10d   : > { %3989 = shalt.err (!%p3986_p10)
}
 0x10e   : > { %s3990_s16 = scalar_lea.vmem %s4475_s11, 2048  ;;  %s4106_s30 = smov [#allocation3]  }
 0x10f   : > { %p3991_p4 = scmp.ne.s32.totalorder %s4475_s11, %s3990_s16  ;;  %s3995_s25 = sshll.u32 %s4106_s30, 4  ;;  %s3996_s25 = int_to_ptr.vmem [resolvable:$false] %s3995_s25 }
 0x110   : > { %s3997_s2 = scalar_lea.vmem %s3996_s25, 4096  ;;  %p3998_p6 = scmp.lt.s32.totalorder %s4475_s11, %s3996_s25 }
 0x111   : > { %p3993_p13 = pnand %p3991_p4, %p3977_p8  ;;  %p3999_p1 = scmp.lt.s32.totalorder %s3997_s2, %s3990_s16 }
 0x113   : > { %p3994_p11 = pneg %p3993_p13  ;;  %p4000_p3 = por %p3999_p1, %p3998_p6 }
 0x115   : > { %p4001_p2 = pnand %p4000_p3, %p3994_p11 }
 0x117   : > { %4004 = shalt.err (!%p4001_p2)
}
 0x118   : > { %3602 = dma.hbm_to_vmem [thread:$0]  (!%p4471_p12), %s4469_s29, 2048, %s4475_s11, %s4477_s12, %s4096_s13, %s4096_s13, %s4097_s14  }
 0x119   : > { %s6021_s20 = sld [smem:[#allocation28_spill]] }
 0x11f   : > { %p6022_p8 = scmp.ne.s32.totalorder %s6021_s20, 0 }
 0x121   : > { %576 = sbr.rel (%p6022_p8) target bundleno = 2112 (0x840), region = 84 }
 0x128   : > { %s4511_s4 = sand.u32 1, %s4083_s22  }
 0x129   : > { %s2954_s28 = sshll.u32 %s4511_s4, 7  ;;  %s579_s16 = scalar_lea.sflag [#allocation4], %s4511_s4 }
 0x12a   : > { %s4515_s30 = scalar_lea.vmem [#allocation3], %s2954_s28 }
 0x12b   : > { %4050 = dma.done.wait (%p4451_p7), %s579_s16, 2048  }
 0x12c   : > { %4052 = vsyncadd (%p4451_p7), %s579_s16, 4294965248  ;;  %p6023_p6 = scmp.eq.s32.totalorder %s4221_s27, 0 }
 0x12e   : > { %4054 = dma.done.wait (%p6023_p6), [#allocation7], 32   ;;  %p6024_p11 = pmov %p6023_p6 }
 0x12f   : > { %p6025_p12 = pmov %p6023_p6 }
 0x130   : > { %4056 = vsyncadd (%p6024_p11), [#allocation7], 4294967264 }
 0x131   : > { %4058 = dma.done.wait (%p6025_p12), [#allocation10], 32   ;;  %p6026_p0 = pmov %p6023_p6 }
 0x133   : > { %4060 = vsyncadd (%p6026_p0), [#allocation10], 4294967264  ;;  %p6027_p5 = pmov %p6026_p0 }
 0x134   : > { %p6028_p9 = pmov %p6026_p0 }
 0x135   : > { %4062 = dma.done.wait (%p6027_p5), [#allocation13], 2064  }
 0x136   : > { %4064 = vsyncadd (%p6028_p9), [#allocation13], 4294965232  ;;  %p6029_p7 = pmov %p6026_p0 }
 0x137   : > { %p6030_p10 = pmov %p6026_p0 }
 0x138   : > { %4066 = dma.done.wait (%p6029_p7), [#allocation16], 32  }
 0x139   : > { %4068 = vsyncadd (%p6030_p10), [#allocation16], 4294967264  ;;  %p6031_p4 = pmov %p6026_p0 }
 0x13a   : > { %p6032_p13 = pmov %p6026_p0 }
 0x13b   : > { %4070 = dma.done.wait (%p6031_p4), [#allocation19], 2048  }
 0x13c   : > { %4072 = vsyncadd (%p6032_p13), [#allocation19], 4294965248  ;;  %v5968_v0 = vmov 0.0|0.0   ;;  %vm4108_vm0 = vmmov 0   ;;  %v5970_v1 = vmov 0.0   ;;  %s6033_s18 = sld [smem:[#allocation60_spill]] }
 0x13d   : > { %3474 = vmatprep.subr.bf16.mxu1 %v5968_v0  ;;  %3418 = vmatprep.mubr.msk.f32.mxu1 %vm4108_vm0, %v5970_v1  ;;  %p672_p1 = scmp.lt.s32.totalorder %s4221_s27, 1  ;;  %s6034_s11 = sld [smem:[#allocation54_spill]]  ;;  %v3139_v20 = vld [vmem:[%s4515_s30] sm:$0xff]   ;;  %v3217_v22 = vld [vmem:[%s4515_s30 + $0x8] sm:$0xff]   ;;  %v3218_v31 = vld [vmem:[%s4515_s30 + $0x10] sm:$0xff]   ;;  %vm1117_vm1 = vcmask 123904  }
 0x13e   : > { %3501 = vmatprep.subr.bf16.mxu0 %v5968_v0  ;;  %3460 = vmatprep.mubr.msk.f32.mxu0 %vm4108_vm0, %v5970_v1  ;;  %v4609_v28 = vunpack.c.l.bf16 %v3139_v20  ;;  %v4611_v29 = vunpack.c.h.bf16 %v3139_v20  ;;  %v4623_v35 = vunpack.c.l.bf16 %v3217_v22  ;;  %v4632_v40 = vunpack.c.h.bf16 %v3217_v22  ;;  %v3219_v44 = vld [vmem:[%s4515_s30 + $0x18] sm:$0xff]   ;;  %v3220_v55 = vld [vmem:[%s4515_s30 + $0x20] sm:$0xff]   ;;  %s6061_s12 = sld [smem:[#allocation61_spill]]  ;;  %s6090_s28 = sld [smem:[#allocation62_spill]] }
 0x13f   : > { %s673_s14 = scalar_select %p672_p1, %s4221_s27, 1  ;;  %v4640_v46 = vunpack.c.l.bf16 %v3218_v31  ;;  %v4647_v51 = vunpack.c.h.bf16 %v3218_v31  ;;  %v4659_v59 = vunpack.c.l.bf16 %v3219_v44  ;;  %vm1119_vm2 = vcmask 125954  }
 0x140   : > { %v844_v37 = vadd.f32 %v4611_v29, %v4609_v28  ;;  %vm1124_vm3 = vcmask 130048   ;;  %s6092_s20 = sld [smem:[#allocation63_spill]]  ;;  %vm1967_vm4 = vcmask 253952   ;;  %vm1969_vm5 = vcmask 254977   ;;  %s6093_s2 = sld [smem:[#allocation59_spill]] }
 0x141   : > { %s3040_s25 = sshll.u32 %s673_s14, 7  ;;  %vm1976_vm6 = vcmask 261120   ;;  %s3073_s13 = sshll.u32 %s4221_s27, 12 }
 0x142   : > { %v1023_v2 = vld [vmem:[%s6033_s18] sm:$0xff]  ;;  %v1024_v3 = vld [vmem:[%s6033_s18 + $0x8] sm:$0xff]  ;;  %v1025_v4 = vld [vmem:[%s6033_s18 + $0x10] sm:$0xff]  ;;  %v845_v42 = vadd.f32 %v4623_v35, %v844_v37  ;;  %p6095_p2 = scmp.ne.s32.totalorder %s6017_s19, 0  ;;  %s4112_s27 = smov [#allocation20]  }
 0x143   : > { %v3475_v5 = vpack.c.bf16 %v1024_v3, %v1023_v2  ;;  %v1026_v6 = vld [vmem:[%s6033_s18 + $0x18] sm:$0xff]  ;;  %v1027_v8 = vld [vmem:[%s6033_s18 + $0x20] sm:$0xff]  ;;  %v1028_v9 = vld [vmem:[%s6033_s18 + $0x28] sm:$0xff]  ;;  %s4585_s1 = scalar_lea.vmem %s6034_s11, %s3040_s25  ;;  %v4667_v2 = vunpack.c.h.bf16 %v3219_v44  ;;  %s2964_s25 = sshll.u32 %s4511_s4, 8 }
 0x144   : > { %v3478_v7 = vpack.c.bf16 %v1026_v6, %v1025_v4  ;;  %v3481_v10 = vpack.c.bf16 %v1028_v9, %v1027_v8  ;;  %v1029_v11 = vld [vmem:[%s6033_s18 + $0x30] sm:$0xff]  ;;  %v1030_v12 = vld [vmem:[%s6033_s18 + $0x38] sm:$0xff]  ;;  %v1031_v14 = vld [vmem:[%s6033_s18 + $0x40] sm:$0xff]  ;;  %v846_v48 = vadd.f32 %v4632_v40, %v845_v42  ;;  %v4676_v8 = vunpack.c.l.bf16 %v3220_v55  ;;  %s5797_s16 = scalar_lea.vmem [#allocation20], %s2964_s25  ;;  %s4009_s25 = sshll.u32 %s4112_s27, 4  ;;  %s4010_s25 = int_to_ptr.vmem [resolvable:$false] %s4009_s25 }
 0x145   : > { %3476 = vmatpush3.bf16.msra.mxu1 %v3475_v5  ;;  %v3484_v13 = vpack.c.bf16 %v1030_v12, %v1029_v11  ;;  %v1032_v15 = vld [vmem:[%s6033_s18 + $0x48] sm:$0xff]  ;;  %v1033_v16 = vld [vmem:[%s6033_s18 + $0x50] sm:$0xff]  ;;  %v1034_v18 = vld [vmem:[%s6033_s18 + $0x58] sm:$0xff]  ;;  %s2767_s29 = sshll.u32 %s5797_s16, 4  ;;  %s4011_s11 = scalar_lea.vmem %s4010_s25, 8192  ;;  %s5896_s29 = int_to_ptr.vmem [resolvable:$true] %s2767_s29 }
 0x146   : > { %3477 = vmatprep.subr.bf16.mxu1 %v5968_v0  ;;  %v3487_v17 = vpack.c.bf16 %v1032_v15, %v1031_v14  ;;  %v3075_v19 = vld [vmem:[%s4585_s1] sm:$0xff]   ;;  %v3202_v21 = vld [vmem:[%s4585_s1 + $0x8] sm:$0xff]   ;;  %v3490_v25 = vpack.c.bf16 %v1034_v18, %v1033_v16  ;;  %v3203_v30 = vld [vmem:[%s4585_s1 + $0x10] sm:$0xff]   ;;  %v847_v53 = vadd.f32 %v4640_v46, %v846_v48  ;;  %v4686_v16 = vunpack.c.h.bf16 %v3220_v55  ;;  %p4012_p11 = scmp.lt.s32.totalorder %s5896_s29, %s4010_s25 }
 0x147   : > { %v1035_v23 = vld [vmem:[%s6033_s18 + $0x60] sm:$0xff]  ;;  %v1036_v24 = vld [vmem:[%s6033_s18 + $0x68] sm:$0xff]  ;;  %v4605_v26 = vunpack.c.l.bf16 %v3075_v19  ;;  %v4607_v27 = vunpack.c.h.bf16 %v3075_v19  ;;  %v1037_v32 = vld [vmem:[%s6033_s18 + $0x70] sm:$0xff]  ;;  %v4621_v34 = vunpack.c.l.bf16 %v3202_v21  ;;  %v4630_v39 = vunpack.c.h.bf16 %v3202_v21 }
 0x148   : > { %v1038_v33 = vld [vmem:[%s6033_s18 + $0x78] sm:$0xff]  ;;  %v3493_v38 = vpack.c.bf16 %v1036_v24, %v1035_v23  ;;  %v4638_v45 = vunpack.c.l.bf16 %v3203_v30  ;;  %v4645_v50 = vunpack.c.h.bf16 %v3203_v30  ;;  %v3205_v54 = vld [vmem:[%s4585_s1 + $0x20] sm:$0xff]   ;;  %v848_v61 = vadd.f32 %v4647_v51, %v847_v53  ;;  %v3206_v11 = vld [vmem:[%s4585_s1 + $0x28] sm:$0xff]  }
 0x149   : > { %3479 = vmatpush3.bf16.msra.mxu1 %v3478_v7  ;;  %v774_v36 = vadd.f32 %v4607_v27, %v4605_v26  ;;  %v3204_v43 = vld [vmem:[%s4585_s1 + $0x18] sm:$0xff]   ;;  %v3496_v49 = vpack.c.bf16 %v1038_v33, %v1037_v32  ;;  %v882_v56 = vmul.f32 %v4605_v26, %v4605_v26  ;;  %v883_v57 = vmul.f32 %v4607_v27, %v4607_v27  ;;  %v3207_v22 = vld [vmem:[%s4585_s1 + $0x30] sm:$0xff]   ;;  %v3222_v24 = vld [vmem:[%s4515_s30 + $0x30] sm:$0xff]  }
 0x14a   : > { %3480 = vmatprep.subr.bf16.mxu1 %v5968_v0  ;;  %v4657_v58 = vunpack.c.l.bf16 %v3204_v43  ;;  %v884_v62 = vmul.f32 %v4621_v34, %v4621_v34  ;;  %v4665_v63 = vunpack.c.h.bf16 %v3204_v43  ;;  %v849_v4 = vadd.f32 %v4659_v59, %v848_v61  ;;  %v3221_v12 = vld [vmem:[%s4515_s30 + $0x28] sm:$0xff]   ;;  %v3223_v48 = vld [vmem:[%s4515_s30 + $0x38] sm:$0xff]  }
 0x14b   : > { %v775_v41 = vadd.f32 %v4621_v34, %v774_v36  ;;  %v885_v5 = vmul.f32 %v4630_v39, %v4630_v39  ;;  %v914_v6 = vadd.f32 %v883_v57, %v882_v56  ;;  %v4674_v7 = vunpack.c.l.bf16 %v3205_v54 }
 0x14c   : > { %v4684_v15 = vunpack.c.h.bf16 %v3205_v54  ;;  %v887_v19 = vmul.f32 %v4645_v50, %v4645_v50  ;;  %v4692_v21 = vunpack.c.l.bf16 %v3206_v11  ;;  %v4695_v23 = vunpack.c.l.bf16 %v3221_v12 }
 0x14d   : > { %3482 = vmatpush3.bf16.msra.mxu1 %v3481_v10  ;;  %v776_v47 = vadd.f32 %v4630_v39, %v775_v41  ;;  %6035 = vst [vmem:[#allocation29_spill] sm:$0xff] %v4674_v7  ;;  %v850_v10 = vadd.f32 %v4667_v2, %v849_v4  ;;  %v915_v14 = vadd.f32 %v914_v6, %v884_v62  ;;  %v4702_v33 = vunpack.c.h.bf16 %v3206_v11  ;;  %v3224_v11 = vld [vmem:[%s4515_s30 + $0x40] sm:$0xff]  }
 0x14e   : > { %3483 = vmatprep.subr.bf16.mxu1 %v5968_v0  ;;  %6036 = vst [vmem:[#allocation30_spill] sm:$0xff] %v4684_v15  ;;  %6037 = vst [vmem:[#allocation31_spill] sm:$0xff] %v4692_v21  ;;  %v888_v31 = vmul.f32 %v4657_v58, %v4657_v58  ;;  %v4704_v36 = vunpack.c.h.bf16 %v3221_v12  ;;  %v4708_v41 = vunpack.c.l.bf16 %v3207_v22  ;;  %v4710_v42 = vunpack.c.l.bf16 %v3222_v24 }
 0x14f   : > { %v777_v52 = vadd.f32 %v4638_v45, %v776_v47  ;;  %v851_v18 = vadd.f32 %v4676_v8, %v850_v10  ;;  %v916_v20 = vadd.f32 %v915_v14, %v885_v5  ;;  %6038 = vst [vmem:[#allocation32_spill] sm:$0xff] %v4695_v23  ;;  %6039 = vst [vmem:[#allocation33_spill] sm:$0xff] %v4702_v33  ;;  %v3208_v47 = vld [vmem:[%s4585_s1 + $0x38] sm:$0xff]   ;;  %v4722_v55 = vunpack.c.h.bf16 %v3207_v22  ;;  %v3209_v10 = vld [vmem:[%s4585_s1 + $0x40] sm:$0xff]  }
 0x150   : > { %6040 = vst [vmem:[#allocation34_spill] sm:$0xff] %v4704_v36  ;;  %6041 = vst [vmem:[#allocation35_spill] sm:$0xff] %v4708_v41  ;;  %v889_v43 = vmul.f32 %v4665_v63, %v4665_v63  ;;  %v952_v53 = vmul.f32 %v4609_v28, %v4609_v28  ;;  %v953_v54 = vmul.f32 %v4611_v29, %v4611_v29  ;;  %v4732_v4 = vunpack.c.l.bf16 %v3208_v47 }
 0x151   : > { %3485 = vmatpush3.bf16.msra.mxu1 %v3484_v13  ;;  %v778_v60 = vadd.f32 %v4645_v50, %v777_v52  ;;  %v886_v13 = vmul.f32 %v4638_v45, %v4638_v45  ;;  %v852_v30 = vadd.f32 %v4686_v16, %v851_v18  ;;  %6042 = vst [vmem:[#allocation36_spill] sm:$0xff] %v4710_v42  ;;  %6043 = vst [vmem:[#allocation37_spill] sm:$0xff] %v4722_v55 }
 0x152   : > { %3486 = vmatprep.subr.bf16.mxu1 %v5968_v0  ;;  %v890_v56 = vmul.f32 %v4674_v7, %v4674_v7  ;;  %6045 = vst [vmem:[#allocation39_spill] sm:$0xff] %v4732_v4  ;;  %v4734_v5 = vunpack.c.l.bf16 %v3223_v48  ;;  %v891_v6 = vmul.f32 %v4684_v15, %v4684_v15  ;;  %v955_v14 = vmul.f32 %v4632_v40, %v4632_v40 }
 0x153   : > { %v779_v3 = vadd.f32 %v4657_v58, %v778_v60  ;;  %v917_v32 = vadd.f32 %v916_v20, %v886_v13  ;;  %v4726_v60 = vunpack.c.h.bf16 %v3222_v24  ;;  %v4744_v18 = vunpack.c.h.bf16 %v3208_v47  ;;  %v3225_v47 = vld [vmem:[%s4515_s30 + $0x48] sm:$0xff]  }
 0x154   : > { %6046 = vst [vmem:[#allocation40_spill] sm:$0xff] %v4734_v5  ;;  %v892_v20 = vmul.f32 %v4692_v21, %v4692_v21 }
 0x155   : > { %3488 = vmatpush3.bf16.msra.mxu1 %v3487_v17  ;;  %v780_v9 = vadd.f32 %v4665_v63, %v779_v3  ;;  %v918_v44 = vadd.f32 %v917_v32, %v887_v19  ;;  %6044 = vst [vmem:[#allocation38_spill] sm:$0xff] %v4726_v60  ;;  %v954_v3 = vmul.f32 %v4623_v35, %v4623_v35  ;;  %6047 = vst [vmem:[#allocation41_spill] sm:$0xff] %v4744_v18 }
 0x156   : > { %3489 = vmatprep.subr.bf16.mxu1 %v5968_v0  ;;  %v4746_v19 = vunpack.c.h.bf16 %v3223_v48  ;;  %v4754_v32 = vunpack.c.l.bf16 %v3209_v10 }
 0x157   : > { %v781_v17 = vadd.f32 %v4674_v7, %v780_v9  ;;  %v919_v57 = vadd.f32 %v918_v44, %v888_v31  ;;  %v3210_v44 = vld [vmem:[%s4585_s1 + $0x48] sm:$0xff]  }
 0x158   : > { %6048 = vst [vmem:[#allocation42_spill] sm:$0xff] %v4746_v19 }
 0x159   : > { %3491 = vmatpush3.bf16.msra.mxu1 %v3490_v25  ;;  %v782_v25 = vadd.f32 %v4684_v15, %v781_v17  ;;  %v920_v9 = vadd.f32 %v919_v57, %v889_v43  ;;  %v984_v17 = vadd.f32 %v953_v54, %v952_v53  ;;  %v4766_v54 = vunpack.c.h.bf16 %v3209_v10 }
 0x15a   : > { %3492 = vmatprep.subr.bf16.mxu1 %v5968_v0  ;;  %v894_v57 = vmul.f32 %v4708_v41, %v4708_v41  ;;  %v895_v10 = vmul.f32 %v4722_v55, %v4722_v55 }
 0x15b   : > { %v783_v37 = vadd.f32 %v4692_v21, %v782_v25  ;;  %v921_v22 = vadd.f32 %v920_v9, %v890_v56  ;;  %v985_v31 = vadd.f32 %v984_v17, %v954_v3  ;;  %v4768_v56 = vunpack.c.h.bf16 %v3224_v11  ;;  %v3226_v17 = vld [vmem:[%s4515_s30 + $0x50] sm:$0xff]  }
 0x15d   : > { %3494 = vmatpush3.bf16.msra.mxu1 %v3493_v38  ;;  %v853_v38 = vadd.f32 %v4695_v23, %v852_v30  ;;  %v956_v30 = vmul.f32 %v4640_v46, %v4640_v46  ;;  %v922_v43 = vadd.f32 %v921_v22, %v891_v6  ;;  %v986_v53 = vadd.f32 %v985_v31, %v955_v14  ;;  %v3211_v14 = vld [vmem:[%s4585_s1 + $0x50] sm:$0xff]  }
 0x15e   : > { %3495 = vmatprep.subr.bf16.mxu1 %v5968_v0  ;;  %v958_v6 = vmul.f32 %v4659_v59, %v4659_v59  ;;  %v4790_v31 = vunpack.c.h.bf16 %v3225_v47 }
 0x15f   : > { %v854_v52 = vadd.f32 %v4704_v36, %v853_v38  ;;  %v893_v38 = vmul.f32 %v4702_v33, %v4702_v33  ;;  %v987_v9 = vadd.f32 %v986_v53, %v956_v30  ;;  %v4788_v30 = vunpack.c.h.bf16 %v3210_v44 }
 0x160   : > { %v960_v53 = vmul.f32 %v4676_v8, %v4676_v8 }
 0x161   : > { %3497 = vmatpush3.bf16.msra.mxu1 %v3496_v49  ;;  %v784_v49 = vadd.f32 %v4702_v33, %v783_v37  ;;  %v855_v62 = vadd.f32 %v4710_v42, %v854_v52  ;;  %v4756_v37 = vunpack.c.l.bf16 %v3224_v11  ;;  %v957_v52 = vmul.f32 %v4647_v51, %v4647_v51 }
 0x162   : > { %3498 = vmatprep.subr.bf16.mxu1 %v5968_v0  ;;  %v898_v0 = vmul.f32 %v4754_v32, %v4754_v32 }
 0x163   : > { %v785_v61 = vadd.f32 %v4708_v41, %v784_v49  ;;  %v856_v13 = vadd.f32 %v4726_v60, %v855_v62 }
 0x165   : > { %v786_v12 = vadd.f32 %v4722_v55, %v785_v61  ;;  %v857_v25 = vadd.f32 %v4734_v5, %v856_v13  ;;  %v923_v61 = vadd.f32 %v922_v43, %v892_v20  ;;  %v4778_v13 = vunpack.c.l.bf16 %v3225_v47 }
 0x166   : > { %v896_v43 = vmul.f32 %v4732_v4, %v4732_v4 }
 0x167   : > { %v787_v24 = vadd.f32 %v4732_v4, %v786_v12  ;;  %v858_v49 = vadd.f32 %v4746_v19, %v857_v25  ;;  %v4776_v12 = vunpack.c.l.bf16 %v3210_v44  ;;  %v924_v11 = vadd.f32 %v923_v61, %v893_v38 }
 0x168   : > { %v988_v25 = vadd.f32 %v987_v9, %v957_v52  ;;  %v897_v44 = vmul.f32 %v4744_v18, %v4744_v18  ;;  %v3212_v52 = vld [vmem:[%s4585_s1 + $0x58] sm:$0xff]   ;;  %v3227_v9 = vld [vmem:[%s4515_s30 + $0x58] sm:$0xff]  }
 0x169   : > { %v788_v48 = vadd.f32 %v4744_v18, %v787_v24  ;;  %v859_v3 = vadd.f32 %v4756_v37, %v858_v49  ;;  %v959_v24 = vmul.f32 %v4667_v2, %v4667_v2  ;;  %v925_v38 = vadd.f32 %v924_v11, %v894_v57 }
 0x16a   : > { %v989_v61 = vadd.f32 %v988_v25, %v958_v6  ;;  %v4812_v25 = vunpack.c.h.bf16 %v3226_v17  ;;  %v4820_v18 = vunpack.c.l.bf16 %v3212_v52  ;;  %v4822_v4 = vunpack.c.l.bf16 %v3227_v9 }
 0x16b   : > { %v789_v62 = vadd.f32 %v4754_v32, %v788_v48  ;;  %v860_v22 = vadd.f32 %v4768_v56, %v859_v3  ;;  %v4800_v3 = vunpack.c.l.bf16 %v3226_v17  ;;  %v926_v47 = vadd.f32 %v925_v38, %v895_v10 }
 0x16c   : > { %v990_v6 = vadd.f32 %v989_v61, %v959_v24  ;;  %6051 = vst [vmem:[#allocation45_spill] sm:$0xff] %v4820_v18  ;;  %v3213_v24 = vld [vmem:[%s4585_s1 + $0x60] sm:$0xff]   ;;  %v3228_v61 = vld [vmem:[%s4515_s30 + $0x60] sm:$0xff]   ;;  %v900_v55 = vmul.f32 %v4776_v12, %v4776_v12 }
 0x16d   : > { %v790_v20 = vadd.f32 %v4766_v54, %v789_v62  ;;  %v861_v49 = vadd.f32 %v4778_v13, %v860_v22  ;;  %v4798_v62 = vunpack.c.l.bf16 %v3211_v14  ;;  %v4810_v22 = vunpack.c.h.bf16 %v3211_v14 }
 0x16e   : > { %v927_v10 = vadd.f32 %v926_v47, %v896_v43  ;;  %v991_v1 = vadd.f32 %v990_v6, %v960_v53  ;;  %v899_v14 = vmul.f32 %v4766_v54, %v4766_v54  ;;  %v4834_v6 = vunpack.c.h.bf16 %v3227_v9  ;;  %v3214_v9 = vld [vmem:[%s4585_s1 + $0x68] sm:$0xff]  }
 0x16f   : > { %v791_v48 = vadd.f32 %v4776_v12, %v790_v20  ;;  %6049 = vst [vmem:[#allocation43_spill] sm:$0xff] %v4798_v62  ;;  %v862_v11 = vadd.f32 %v4790_v31, %v861_v49  ;;  %v961_v20 = vmul.f32 %v4686_v16, %v4686_v16  ;;  %6050 = vst [vmem:[#allocation44_spill] sm:$0xff] %v4810_v22  ;;  %v4842_v33 = vunpack.c.l.bf16 %v3213_v24 }
 0x170   : > { %v962_v49 = vmul.f32 %v4695_v23, %v4695_v23  ;;  %v928_v17 = vadd.f32 %v927_v10, %v897_v44  ;;  %v4844_v21 = vunpack.c.l.bf16 %v3228_v61  ;;  %v4864_v23 = vunpack.c.l.bf16 %v3214_v9 }
 0x171   : > { %v792_v57 = vadd.f32 %v4788_v30, %v791_v48  ;;  %v863_v48 = vadd.f32 %v4800_v3, %v862_v11  ;;  %v992_v53 = vadd.f32 %v991_v1, %v961_v20  ;;  %v4832_v11 = vunpack.c.h.bf16 %v3212_v52  ;;  %6053 = vst [vmem:[#allocation47_spill] sm:$0xff] %v4842_v33  ;;  %v3229_v20 = vld [vmem:[%s4515_s30 + $0x68] sm:$0xff]  }
 0x172   : > { %v929_v44 = vadd.f32 %v928_v17, %v898_v0  ;;  %v901_v1 = vmul.f32 %v4788_v30, %v4788_v30  ;;  %6055 = vst [vmem:[#allocation49_spill] sm:$0xff] %v4864_v23 }
 0x173   : > { %v793_v38 = vadd.f32 %v4798_v62, %v792_v57  ;;  %v864_v47 = vadd.f32 %v4812_v25, %v863_v48  ;;  %v963_v57 = vmul.f32 %v4704_v36, %v4704_v36  ;;  %6052 = vst [vmem:[#allocation46_spill] sm:$0xff] %v4832_v11  ;;  %v964_v48 = vmul.f32 %v4710_v42, %v4710_v42 }
 0x174   : > { %v993_v41 = vadd.f32 %v992_v53, %v962_v49  ;;  %v930_v52 = vadd.f32 %v929_v44, %v899_v14  ;;  %v4856_v53 = vunpack.c.h.bf16 %v3228_v61  ;;  %v902_v42 = vmul.f32 %v4798_v62, %v4798_v62  ;;  %v3215_v61 = vld [vmem:[%s4585_s1 + $0x70] sm:$0xff]  }
 0x175   : > { %v794_v43 = vadd.f32 %v4810_v22, %v793_v38  ;;  %v865_v38 = vadd.f32 %v4822_v4, %v864_v47  ;;  %v4854_v47 = vunpack.c.h.bf16 %v3213_v24  ;;  %v4886_v7 = vunpack.c.l.bf16 %v3215_v61 }
 0x176   : > { %v994_v49 = vadd.f32 %v993_v41, %v963_v57  ;;  %v931_v14 = vadd.f32 %v930_v52, %v900_v55  ;;  %v903_v41 = vmul.f32 %v4810_v22, %v4810_v22  ;;  %v3230_v57 = vld [vmem:[%s4515_s30 + $0x70] sm:$0xff]  }
 0x177   : > { %v795_v10 = vadd.f32 %v4820_v18, %v794_v43  ;;  %v866_v17 = vadd.f32 %v4834_v6, %v865_v38  ;;  %v965_v43 = vmul.f32 %v4726_v60, %v4726_v60  ;;  %6054 = vst [vmem:[#allocation48_spill] sm:$0xff] %v4854_v47  ;;  %v966_v38 = vmul.f32 %v4734_v5, %v4734_v5 }
 0x178   : > { %v995_v36 = vadd.f32 %v994_v49, %v964_v48  ;;  %v4866_v60 = vunpack.c.l.bf16 %v3229_v20  ;;  %v932_v24 = vadd.f32 %v931_v14, %v901_v1  ;;  %v4878_v49 = vunpack.c.h.bf16 %v3229_v20  ;;  %6057 = vst [vmem:[#allocation51_spill] sm:$0xff] %v4886_v7  ;;  %v3216_v20 = vld [vmem:[%s4585_s1 + $0x78] sm:$0xff]   ;;  %s6094_s1 = sld [smem:[#allocation64_spill]] }
 0x179   : > { %v796_v0 = vadd.f32 %v4832_v11, %v795_v10  ;;  %v867_v10 = vadd.f32 %v4844_v21, %v866_v17  ;;  %v4876_v17 = vunpack.c.h.bf16 %v3214_v9  ;;  %v904_v5 = vmul.f32 %v4820_v18, %v4820_v18 }
 0x17a   : > { %v996_v48 = vadd.f32 %v995_v36, %v965_v43  ;;  %v933_v1 = vadd.f32 %v932_v24, %v902_v42  ;;  %v905_v36 = vmul.f32 %v4832_v11, %v4832_v11  ;;  %v3231_v43 = vld [vmem:[%s4515_s30 + $0x78] sm:$0xff]   ;;  %v4898_v18 = vunpack.c.h.bf16 %v3215_v61 }
 0x17b   : > { %v797_v44 = vadd.f32 %v4842_v33, %v796_v0  ;;  %v868_v52 = vadd.f32 %v4856_v53, %v867_v10  ;;  %v967_v0 = vmul.f32 %v4746_v19, %v4746_v19  ;;  %6056 = vst [vmem:[#allocation50_spill] sm:$0xff] %v4876_v17  ;;  %v968_v10 = vmul.f32 %v4756_v37, %v4756_v37 }
 0x17c   : > { %v997_v15 = vadd.f32 %v996_v48, %v966_v38  ;;  %v4888_v19 = vunpack.c.l.bf16 %v3230_v57  ;;  %v934_v9 = vadd.f32 %v933_v1, %v903_v41  ;;  %6058 = vst [vmem:[#allocation52_spill] sm:$0xff] %v4898_v18  ;;  %v4900_v38 = vunpack.c.h.bf16 %v3230_v57 }
 0x17d   : > { %v798_v55 = vadd.f32 %v4854_v47, %v797_v44  ;;  %v869_v44 = vadd.f32 %v4866_v60, %v868_v52  ;;  %v906_v48 = vmul.f32 %v4842_v33, %v4842_v33  ;;  %v4908_v11 = vunpack.c.l.bf16 %v3216_v20 }
 0x17e   : > { %v998_v52 = vadd.f32 %v997_v15, %v967_v0  ;;  %v935_v22 = vadd.f32 %v934_v9, %v904_v5  ;;  %v4910_v62 = vunpack.c.l.bf16 %v3231_v43  ;;  %v907_v15 = vmul.f32 %v4854_v47, %v4854_v47  ;;  %s5894_s30 = scalar_lea.hbm %s6094_s1, %s3073_s13 }
 0x17f   : > { %v799_v14 = vadd.f32 %v4864_v23, %v798_v55  ;;  %v870_v24 = vadd.f32 %v4878_v49, %v869_v44  ;;  %v969_v55 = vmul.f32 %v4768_v56, %v4768_v56  ;;  %6059 = vst [vmem:[#allocation53_spill] sm:$0xff] %v4908_v11  ;;  %v971_v0 = vmul.f32 %v4790_v31, %v4790_v31 }
 0x180   : > { %v999_v44 = vadd.f32 %v998_v52, %v968_v10  ;;  %v936_v61 = vadd.f32 %v935_v22, %v905_v36  ;;  %v908_v10 = vmul.f32 %v4864_v23, %v4864_v23  ;;  %v972_v36 = vmul.f32 %v4800_v3, %v4800_v3 }
 0x181   : > { %v800_v42 = vadd.f32 %v4876_v17, %v799_v14  ;;  %v871_v1 = vadd.f32 %v4888_v19, %v870_v24  ;;  %v970_v14 = vmul.f32 %v4778_v13, %v4778_v13  ;;  %v4920_v24 = vunpack.c.h.bf16 %v3231_v43 }
 0x182   : > { %v1000_v9 = vadd.f32 %v999_v44, %v969_v55  ;;  %v937_v52 = vadd.f32 %v936_v61, %v906_v48  ;;  %v973_v44 = vmul.f32 %v4812_v25, %v4812_v25  ;;  %v910_v61 = vmul.f32 %v4886_v7, %v4886_v7 }
 0x183   : > { %v801_v41 = vadd.f32 %v4886_v7, %v800_v42  ;;  %v872_v5 = vadd.f32 %v4900_v38, %v871_v1  ;;  %v4918_v42 = vunpack.c.h.bf16 %v3216_v20  ;;  %v909_v1 = vmul.f32 %v4876_v17, %v4876_v17 }
 0x184   : > { %v938_v55 = vadd.f32 %v937_v52, %v907_v15  ;;  %v911_v15 = vmul.f32 %v4898_v18, %v4898_v18  ;;  %v975_v17 = vmul.f32 %v4834_v6, %v4834_v6  ;;  %v976_v47 = vmul.f32 %v4844_v21, %v4844_v21 }
 0x185   : > { %v802_v57 = vadd.f32 %v4898_v18, %v801_v41  ;;  %v873_v22 = vadd.f32 %v4910_v62, %v872_v5  ;;  %v1001_v41 = vadd.f32 %v1000_v9, %v970_v14  ;;  %v974_v14 = vmul.f32 %v4822_v4, %v4822_v4 }
 0x187   : > { %v803_v33 = vadd.f32 %v4908_v11, %v802_v57  ;;  %v874_v43 = vadd.f32 %v4920_v24, %v873_v22  ;;  %v1002_v48 = vadd.f32 %v1001_v41, %v971_v0  ;;  %v939_v57 = vadd.f32 %v938_v55, %v908_v10 }
 0x188   : > { %v912_v41 = vmul.f32 %v4908_v11, %v4908_v11 }
 0x189   : > { %v804_v20 = vadd.f32 %v4918_v42, %v803_v33  ;;  %v875_v23 = vrot.slane %v874_v43, 4  ;;  %v1003_v9 = vadd.f32 %v1002_v48, %v972_v36  ;;  %v940_v33 = vadd.f32 %v939_v57, %v909_v1 }
 0x18a   : > { %v913_v48 = vmul.f32 %v4918_v42, %v4918_v42 }
 0x18b   : > { %v805_v5 = vrot.slane %v804_v20, 4  ;;  %v876_v22 = vadd.f32 %v875_v23, %v874_v43  ;;  %v1004_v0 = vadd.f32 %v1003_v9, %v973_v44  ;;  %v941_v10 = vadd.f32 %v940_v33, %v910_v61 }
 0x18c   : > { %v977_v43 = vmul.f32 %v4856_v53, %v4856_v53  ;;  %v978_v61 = vmul.f32 %v4866_v60, %v4866_v60 }
 0x18d   : > { %v806_v52 = vadd.f32 %v805_v5, %v804_v20  ;;  %v877_v7 = vrot.slane %v876_v22, 2  ;;  %v1005_v36 = vadd.f32 %v1004_v0, %v974_v14  ;;  %v942_v1 = vadd.f32 %v941_v10, %v911_v15 }
 0x18e   : > { %v979_v0 = vmul.f32 %v4878_v49, %v4878_v49 }
 0x18f   : > { %v807_v55 = vrot.slane %v806_v52, 2  ;;  %v878_v23 = vadd.f32 %v877_v7, %v876_v22  ;;  %v1006_v44 = vadd.f32 %v1005_v36, %v975_v17  ;;  %v943_v57 = vadd.f32 %v942_v1, %v912_v41 }
 0x190   : > { %v980_v7 = vmul.f32 %v4888_v19, %v4888_v19  ;;  %v981_v41 = vmul.f32 %v4900_v38, %v4900_v38  ;;  %v983_v1 = vmul.f32 %v4920_v24, %v4920_v24 }
 0x191   : > { %v808_v20 = vadd.f32 %v807_v55, %v806_v52  ;;  %v879_v9 = vrot.slane %v878_v23, 1  ;;  %v1007_v33 = vadd.f32 %v1006_v44, %v976_v47  ;;  %v944_v11 = vadd.f32 %v943_v57, %v913_v48 }
 0x192   : > { %v982_v55 = vmul.f32 %v4910_v62, %v4910_v62 }
 0x193   : > { %v809_v5 = vrot.slane %v808_v20, 1  ;;  %v880_v14 = vadd.f32 %v879_v9, %v878_v23  ;;  %v1008_v15 = vadd.f32 %v1007_v33, %v977_v43  ;;  %v945_v52 = vrot.slane %v944_v11, 4 }
 0x195   : > { %v810_v18 = vadd.f32 %v809_v5, %v808_v20  ;;  %881 = vst [vmem:[#allocation2 + $0x1] sm:$0x1] %v880_v14  ;;  %v1009_v17 = vadd.f32 %v1008_v15, %v978_v61  ;;  %v946_v22 = vadd.f32 %v945_v52, %v944_v11  ;;  %v1122_v15 = vld [vmem:[%s6061_s12] sm:$0xff]  ;;  %v1123_v52 = vld [vmem:[%s6061_s12 + $0x8] sm:$0xff] }
 0x197   : > { %811 = vst [vmem:[#allocation2] sm:$0x1] %v810_v18  ;;  %v1010_v10 = vadd.f32 %v1009_v17, %v979_v0  ;;  %v947_v47 = vrot.slane %v946_v22, 2  ;;  %v6060_v0 = vmov 0.0   ;;  %v3679_v17 = vld [vmem:[#allocation12 + $0x40] sm:$0xff]  }
 0x199   : > { %v1011_v36 = vadd.f32 %v1010_v10, %v980_v7  ;;  %v948_v48 = vadd.f32 %v947_v47, %v946_v22  ;;  %v3499_v7 = vpack.c.bf16 %v1123_v52, %v1122_v15  ;;  %v3691_v15 = vld [vmem:[#allocation12 + $0x70] sm:$0xff]  }
 0x19a   : > { %v3692_v52 = vld [vmem:[#allocation12 + $0x30] sm:$0xff]  }
 0x19b   : > { %v1012_v18 = vadd.f32 %v1011_v36, %v981_v41  ;;  %v949_v20 = vrot.slane %v948_v48, 1 }
 0x19d   : > { %v1013_v23 = vadd.f32 %v1012_v18, %v982_v55  ;;  %v950_v43 = vadd.f32 %v949_v20, %v948_v48  ;;  %v3680_v18 = vld [vmem:[#allocation12] sm:$0xff]  }
 0x19f   : > { %v1014_v44 = vadd.f32 %v1013_v23, %v983_v1  ;;  %951 = vst [vmem:[#allocation2 + $0x2] sm:$0x1] %v950_v43  ;;  %v3681_v23 = vld [vmem:[#allocation12 + $0x48] sm:$0xff]  }
 0x1a0   : > { %v3682_v43 = vld [vmem:[#allocation12 + $0x8] sm:$0xff]  }
 0x1a1   : > { %v1015_v11 = vrot.slane %v1014_v44, 4 }
 0x1a3   : > { %v1016_v57 = vadd.f32 %v1015_v11, %v1014_v44  ;;  %v3683_v44 = vld [vmem:[#allocation12 + $0x50] sm:$0xff]  }
 0x1a4   : > { %v3684_v11 = vld [vmem:[#allocation12 + $0x10] sm:$0xff]  }
 0x1a5   : > { %v1017_v5 = vrot.slane %v1016_v57, 2 }
 0x1a7   : > { %v1018_v9 = vadd.f32 %v1017_v5, %v1016_v57  ;;  %v3685_v57 = vld [vmem:[#allocation12 + $0x58] sm:$0xff]  }
 0x1a8   : > { %v3686_v5 = vld [vmem:[#allocation12 + $0x18] sm:$0xff]  }
 0x1a9   : > { %v1019_v61 = vrot.slane %v1018_v9, 1 }
 0x1ab   : > { %v1020_v33 = vadd.f32 %v1019_v61, %v1018_v9  ;;  %v3687_v9 = vld [vmem:[#allocation12 + $0x60] sm:$0xff]  }
 0x1ac   : > { %v3688_v61 = vld [vmem:[#allocation12 + $0x20] sm:$0xff]  }
 0x1ad   : > { %1021 = vst [vmem:[#allocation2 + $0x3] sm:$0x1] %v1020_v33  ;;  %v3689_v33 = vld [vmem:[#allocation12 + $0x68] sm:$0xff]  }
 0x1b4   : > { %v1022_v14 = vld [vmem:[#allocation2] sm:$0xf] }
 0x1b5   : > { %3419 = vmatmul.mubr.f32.vlgmr.msra.gmra.mrb[0].mxu1 %v1022_v14  ;;  %v3690_v14 = vld [vmem:[#allocation12 + $0x28] sm:$0xff]  }
 0x1b6   : > { %3425 = vmatprep.mubr.msk.f32.mxu1 %vm4108_vm0, %v6060_v0  ;;  %3500 = vmatpush3.bf16.msra.mxu1 %v3499_v7  ;;  %v3693_v7 = vld [vmem:[#allocation12 + $0x78] sm:$0xff]  }
 0x1b7   : > { %3252 = vmatprep.subr.bf16.mxu1 %v3679_v17  ;;  %v3694_v17 = vld [vmem:[#allocation12 + $0x38] sm:$0xff]  }
 0x288   : > { %v1105_v22 = vpop.f32.mrb[0].mxu1 }
 0x289   : > { %v1109_v41 = vmul.f32 0.00048828125, %v1105_v22  ;;  %v3420_v10 = vpop.f32.mrb[1].mxu1  ;;  %v4110_v22 = vmov 1966171168  }
 0x28a   : > { %v1203_v10 = vlaneseq }
 0x28b   : > { %v1110_v47 = vmul.f32 %v1109_v41, %v1109_v41  ;;  %1118 = vst.msk [vmem:[#allocation2 + $0x4] sm:$0x3] %vm1117_vm1, %v1109_v41 }
 0x28d   : > { %v1112_v55 = vrot.slane %v1110_v47, 6 }
 0x28f   : > { %v1114_v36 = vsub.f32 %v1109_v41, %v1112_v55  ;;  %v1201_v41 = vunpack.c.l.s4 %v4110_v22  ;;  %v4970_v55 = vshrl.u32 %v1203_v10, 7 }
 0x291   : > { %v1115_v48 = vadd.f32 1e-05, %v1114_v36  ;;  %v1202_v47 = vunpack.c.0.s8 %v1201_v41 }
 0x293   : > { %3719 = vrsqrt.f32 %v1115_v48  ;;  %v4973_v36 = vsub.s32 %v1202_v47, %v4970_v55  ;;  %v1232_v47 = vld [vmem:[#allocation11] sm:$0x1] }
 0x29d   : > { %v3720_v1 = vpop.eup %3719 }
 0x29e   : > { %1120 = vst.msk [vmem:[#allocation2 + $0x4] sm:$0xc] %vm1119_vm2, %v3720_v1 }
 0x2a5   : > { %v1121_v20 = vld [vmem:[#allocation2 + $0x4] sm:$0xf] }
 0x2a6   : > { %3426 = vmatmul.mubr.msk.f32.vlgmr.msra.gmra.mrb[2].mxu1 %vm1124_vm3, %v1121_v20 }
 0x2a7   : > { %3253 = vmatpush3.bf16.msra.mxu1 %v3680_v18 }
 0x2a8   : > { %3254 = vmatprep.subr.bf16.mxu1 %v3681_v23 }
 0x2ab   : > { %3255 = vmatpush3.bf16.msra.mxu1 %v3682_v43  ;;  %v1198_v43 = vld [vmem:[#allocation6] sm:$0x1] }
 0x2ac   : > { %3256 = vmatprep.subr.bf16.mxu1 %v3683_v44 }
 0x2af   : > { %3257 = vmatpush3.bf16.msra.mxu1 %v3684_v11 }
 0x2b0   : > { %3258 = vmatprep.subr.bf16.mxu1 %v3685_v57  ;;  %v1220_v57 = vld [vmem:[#allocation9] sm:$0x1] }
 0x2b3   : > { %3259 = vmatpush3.bf16.msra.mxu1 %v3686_v5 }
 0x2b4   : > { %3260 = vmatprep.subr.bf16.mxu1 %v3687_v9 }
 0x2b7   : > { %3261 = vmatpush3.bf16.msra.mxu1 %v3688_v61 }
 0x2b8   : > { %3262 = vmatprep.subr.bf16.mxu1 %v3689_v33  ;;  %v4979_v33 = vsub.s32 0, %v4970_v55 }
 0x2bb   : > { %3263 = vmatpush3.bf16.msra.mxu1 %v3690_v14 }
 0x2bc   : > { %3264 = vmatprep.subr.bf16.mxu1 %v3691_v15 }
 0x2bf   : > { %3265 = vmatpush3.bf16.msra.mxu1 %v3692_v52  ;;  %v1217_v52 = vld [vmem:[#allocation8] sm:$0x1] }
 0x2c0   : > { %3266 = vmatprep.subr.bf16.mxu1 %v3693_v7 }
 0x2c3   : > { %3267 = vmatpush3.bf16.msra.mxu1 %v3694_v17 }
 0x379   : > { %v1194_v48 = vpop.f32.mrb[2].mxu1 }
 0x37a   : > { %v1206_v1 = vrot.slane %v1194_v48, %v4973_v36  ;;  %v3427_v18 = vpop.f32.mrb[3].mxu1 }
 0x37c   : > { %v1213_v20 = vrot.slane %v1206_v1, %v4973_v36  ;;  %v1221_v23 = vcombine.high %v1206_v1, %v1206_v1 }
 0x37e   : > { %v1214_v44 = vcombine.high %v1213_v20, %v1213_v20  ;;  %v1228_v11 = vrot.slane %v1221_v23, %v4973_v36 }
 0x380   : > { %v1229_v5 = vcombine.high %v1228_v11, %v1228_v11  ;;  %v1216_v9 = vmul.f32 %v1214_v44, %v1198_v43 }
 0x382   : > { %v1231_v61 = vmul.f32 %v1229_v5, %v1220_v57  ;;  %v1218_v15 = vmul.f32 %v1216_v9, %v1194_v48  ;;  %v4987_v10 = vrot.slane %v1216_v9, %v4979_v33 }
 0x384   : > { %v4982_v14 = vrot.slane %v1231_v61, %v4979_v33  ;;  %v1219_v22 = vsub.f32 %v1217_v52, %v1218_v15  ;;  %v1264_v23 = vmul.f32 %v4605_v26, %v4987_v10  ;;  %v1265_v43 = vmul.f32 %v4607_v27, %v4987_v10 }
 0x385   : > { %v1266_v44 = vmul.f32 %v4621_v34, %v4987_v10  ;;  %v1267_v11 = vmul.f32 %v4630_v39, %v4987_v10  ;;  %v1268_v34 = vmul.f32 %v4638_v45, %v4987_v10  ;;  %v1269_v39 = vmul.f32 %v4645_v50, %v4987_v10 }
 0x386   : > { %v1239_v7 = vmul.f32 %v4982_v14, %v1194_v48  ;;  %v4991_v18 = vrot.slane %v1219_v22, %v4979_v33  ;;  %v1350_v48 = vmul.f32 %v4609_v28, %v4982_v14  ;;  %v1351_v5 = vmul.f32 %v4611_v29, %v4982_v14 }
 0x387   : > { %v1352_v26 = vmul.f32 %v4623_v35, %v4982_v14  ;;  %v1353_v28 = vmul.f32 %v4632_v40, %v4982_v14  ;;  %v1354_v50 = vmul.f32 %v4640_v46, %v4982_v14  ;;  %v1355_v22 = vmul.f32 %v4647_v51, %v4982_v14 }
 0x388   : > { %v1247_v17 = vrot.slane %v1239_v7, %v4973_v36  ;;  %v1302_v27 = vadd.f32 %v4991_v18, %v1264_v23  ;;  %v1303_v9 = vadd.f32 %v4991_v18, %v1265_v43  ;;  %v1304_v40 = vadd.f32 %v4991_v18, %v1266_v44 }
 0x389   : > { %v1305_v52 = vadd.f32 %v4991_v18, %v1267_v11  ;;  %v5025_v7 = vadd.f32 %v4991_v18, %v1268_v34  ;;  %v5028_v45 = vadd.f32 %v4991_v18, %v1269_v39  ;;  %v1270_v43 = vmul.f32 %v4657_v58, %v4987_v10 }
 0x38a   : > { %v1248_v41 = vcombine.high %v1247_v17, %v1247_v17 }
 0x38b   : > { %v1335_v46 = vpack.c.bf16 %v1305_v52, %v1304_v40  ;;  %v1336_v51 = vpack.c.bf16 %v5028_v45, %v5025_v7  ;;  %v5055_v58 = vadd.f32 %v4991_v18, %v1270_v43  ;;  %v1370_v52 = vmul.f32 %v4800_v3, %v4982_v14  ;;  %v6062_v3 = vld [vmem:[#allocation43_spill] sm:$0xff] }
 0x38c   : > { %v1255_v1 = vrot.slane %v1248_v41, %v4973_v36  ;;  %v1334_v41 = vpack.c.bf16 %v1303_v9, %v1302_v27  ;;  %v1378_v7 = vmul.f32 %v4888_v19, %v4982_v14  ;;  %v1379_v45 = vmul.f32 %v4900_v38, %v4982_v14 }
 0x38d   : > { %v1380_v38 = vmul.f32 %v4910_v62, %v4982_v14 }
 0x38e   : > { %v1257_v20 = vsub.f32 %v1232_v47, %v1255_v1  ;;  %v1356_v47 = vmul.f32 %v4659_v59, %v4982_v14  ;;  %v1357_v1 = vmul.f32 %v4667_v2, %v4982_v14  ;;  %v1271_v59 = vmul.f32 %v4665_v63, %v4987_v10 }
 0x38f   : > { %v1358_v2 = vmul.f32 %v4676_v8, %v4982_v14  ;;  %v1366_v63 = vmul.f32 %v4756_v37, %v4982_v14  ;;  %v1367_v8 = vmul.f32 %v4768_v56, %v4982_v14 }
 0x390   : > { %v5004_v57 = vrot.slane %v1257_v20, %v4979_v33 }
 0x392   : > { %v1388_v61 = vadd.f32 %v5004_v57, %v1350_v48  ;;  %v1389_v29 = vadd.f32 %v5004_v57, %v1351_v5  ;;  %v1390_v15 = vadd.f32 %v5004_v57, %v1352_v26  ;;  %v1391_v35 = vadd.f32 %v5004_v57, %v1353_v28 }
 0x393   : > { %v1392_v23 = vadd.f32 %v5004_v57, %v1354_v50  ;;  %v1393_v48 = vadd.f32 %v5004_v57, %v1355_v22  ;;  %v5049_v44 = vadd.f32 %v5004_v57, %v1356_v47  ;;  %v5052_v11 = vadd.f32 %v5004_v57, %v1357_v1  ;;  %v6063_v47 = vld [vmem:[#allocation44_spill] sm:$0xff] }
 0x394   : > { %v1420_v17 = vpack.c.bf16 %v1389_v29, %v1388_v61  ;;  %v1421_v20 = vpack.c.bf16 %v1391_v35, %v1390_v15  ;;  %v1359_v5 = vmul.f32 %v4686_v16, %v4982_v14  ;;  %v5060_v26 = vadd.f32 %v4991_v18, %v1271_v59 }
 0x395   : > { %v1280_v28 = vmul.f32 %v4754_v32, %v4987_v10  ;;  %v1422_v27 = vpack.c.bf16 %v1393_v48, %v1392_v23  ;;  %v5069_v9 = vadd.f32 %v5004_v57, %v1358_v2  ;;  %v1281_v16 = vmul.f32 %v4766_v54, %v4987_v10  ;;  %v6064_v2 = vld [vmem:[#allocation45_spill] sm:$0xff] }
 0x396   : > { %1603 = vmatprep.mubr.bf16.mxu1 %v1420_v17  ;;  %v5072_v34 = vadd.f32 %v5004_v57, %v1359_v5  ;;  %v5077_v39 = vadd.f32 %v5004_v57, %v1366_v63  ;;  %v5080_v37 = vadd.f32 %v5004_v57, %v1367_v8  ;;  %v1368_v32 = vmul.f32 %v4778_v13, %v4982_v14  ;;  %v6065_v5 = vld [vmem:[#allocation46_spill] sm:$0xff] }
 0x397   : > { %1604 = vmatmul.mubr.bf16.vlgmr.msra.gmra.mrb[4].mxu1 %v1334_v41  ;;  %v5083_v56 = vadd.f32 %v4991_v18, %v1280_v28  ;;  %v1423_v61 = vpack.c.bf16 %v5052_v11, %v5049_v44  ;;  %v5090_v29 = vadd.f32 %v4991_v18, %v1281_v16  ;;  %v1369_v54 = vmul.f32 %v4790_v31, %v4982_v14 }
 0x398   : > { %1611 = vmatprep.mubr.bf16.mxu1 %v1421_v20  ;;  %v1282_v15 = vmul.f32 %v4776_v12, %v4987_v10  ;;  %v1428_v35 = vpack.c.bf16 %v5080_v37, %v5077_v39  ;;  %v5099_v40 = vadd.f32 %v5004_v57, %v1368_v32  ;;  %v1283_v13 = vmul.f32 %v4788_v30, %v4987_v10 }
 0x399   : > { %v1342_v17 = vpack.c.bf16 %v5090_v29, %v5083_v56  ;;  %v5108_v31 = vadd.f32 %v5004_v57, %v1369_v54  ;;  %v1371_v50 = vmul.f32 %v4812_v25, %v4982_v14  ;;  %v5119_v30 = vadd.f32 %v5004_v57, %v1370_v52  ;;  %v6067_v52 = vld [vmem:[#allocation48_spill] sm:$0xff] }
 0x39a   : > { %v5111_v12 = vadd.f32 %v4991_v18, %v1282_v15  ;;  %v5116_v22 = vadd.f32 %v4991_v18, %v1283_v13  ;;  %v1284_v41 = vmul.f32 %v6062_v3, %v4987_v10  ;;  %v1285_v1 = vmul.f32 %v6063_v47, %v4987_v10  ;;  %v6066_v15 = vld [vmem:[#allocation47_spill] sm:$0xff] }
 0x39b   : > { %v1429_v20 = vpack.c.bf16 %v5108_v31, %v5099_v40  ;;  %v5128_v23 = vadd.f32 %v5004_v57, %v1371_v50  ;;  %v1372_v25 = vmul.f32 %v4822_v4, %v4982_v14  ;;  %v1373_v48 = vmul.f32 %v4834_v6, %v4982_v14 }
 0x39c   : > { %v1343_v43 = vpack.c.bf16 %v5116_v22, %v5111_v12  ;;  %v5140_v59 = vadd.f32 %v4991_v18, %v1285_v1  ;;  %v1286_v44 = vmul.f32 %v6064_v2, %v4987_v10  ;;  %v1287_v63 = vmul.f32 %v6065_v5, %v4987_v10  ;;  %v6069_v5 = vld [vmem:[#allocation50_spill] sm:$0xff] }
 0x39d   : > { %v1430_v11 = vpack.c.bf16 %v5128_v23, %v5119_v30  ;;  %v5147_v4 = vadd.f32 %v5004_v57, %v1372_v25  ;;  %v5150_v6 = vadd.f32 %v5004_v57, %v1373_v48  ;;  %v1375_v16 = vmul.f32 %v4856_v53, %v4982_v14  ;;  %v6068_v48 = vld [vmem:[#allocation49_spill] sm:$0xff] }
 0x39e   : > { %v5157_v28 = vadd.f32 %v4991_v18, %v1286_v44  ;;  %v5166_v54 = vadd.f32 %v4991_v18, %v1287_v63  ;;  %v1288_v13 = vmul.f32 %v6066_v15, %v4987_v10  ;;  %v1289_v50 = vmul.f32 %v6067_v52, %v4987_v10  ;;  %v6071_v52 = vld [vmem:[#allocation52_spill] sm:$0xff] }
 0x39f   : > { %1612 = vmatmul.mubr.bf16.gmra.mrb[8].mxu1 %v1335_v46  ;;  %v5137_v46 = vadd.f32 %v4991_v18, %v1284_v41  ;;  %v1431_v32 = vpack.c.bf16 %v5150_v6, %v5147_v4  ;;  %v1376_v53 = vmul.f32 %v4866_v60, %v4982_v14  ;;  %v1377_v41 = vmul.f32 %v4878_v49, %v4982_v14  ;;  %v1874_v4 = vld [vmem:[%s6090_s28 + $0x8] sm:$0xff]  ;;  %v1875_v6 = vld [vmem:[%s6090_s28 + $0x10] sm:$0xff] }
 0x3a0   : > { %1619 = vmatprep.mubr.bf16.mxu1 %v1422_v27  ;;  %v1374_v27 = vmul.f32 %v4844_v21, %v4982_v14  ;;  %v5176_v21 = vadd.f32 %v5004_v57, %v1375_v16  ;;  %v1345_v47 = vpack.c.bf16 %v5166_v54, %v5157_v28  ;;  %v5185_v1 = vadd.f32 %v4991_v18, %v1288_v13 }
 0x3a1   : > { %v1344_v8 = vpack.c.bf16 %v5140_v59, %v5137_v46  ;;  %v5188_v25 = vadd.f32 %v4991_v18, %v1289_v50  ;;  %v1290_v2 = vmul.f32 %v6068_v48, %v4987_v10  ;;  %v5198_v49 = vadd.f32 %v5004_v57, %v1376_v53 }
 0x3a2   : > { %v5173_v3 = vadd.f32 %v5004_v57, %v1374_v27  ;;  %v5201_v44 = vadd.f32 %v5004_v57, %v1377_v41  ;;  %v1291_v63 = vmul.f32 %v6069_v5, %v4987_v10  ;;  %v1293_v50 = vmul.f32 %v6071_v52, %v4987_v10 }
 0x3a3   : > { %v1346_v27 = vpack.c.bf16 %v5188_v25, %v5185_v1  ;;  %v5208_v16 = vadd.f32 %v4991_v18, %v1290_v2  ;;  %v5224_v53 = vadd.f32 %v5004_v57, %v1378_v7  ;;  %v5227_v19 = vadd.f32 %v5004_v57, %v1379_v45  ;;  %v1878_v1 = vld [vmem:[%s6090_s28 + $0x28] sm:$0xff] }
 0x3a4   : > { %v1432_v60 = vpack.c.bf16 %v5176_v21, %v5173_v3  ;;  %v5217_v15 = vadd.f32 %v4991_v18, %v1291_v63  ;;  %v1381_v41 = vmul.f32 %v4920_v24, %v4982_v14  ;;  %v5239_v5 = vadd.f32 %v4991_v18, %v1293_v50  ;;  %v6072_v63 = vld [vmem:[#allocation53_spill] sm:$0xff] }
 0x3a5   : > { %v1294_v7 = vmul.f32 %v6072_v63, %v4987_v10  ;;  %v5246_v62 = vadd.f32 %v5004_v57, %v1380_v38  ;;  %v1424_v63 = vpack.c.bf16 %v5072_v34, %v5069_v9  ;;  %v6091_v21 = vmov 0.0|0.0  }
 0x3a6   : > { %v5249_v24 = vadd.f32 %v5004_v57, %v1381_v41 }
 0x3a7   : > { %1620 = vmatmul.mubr.bf16.gmra.mrb[12].mxu1 %v1336_v51  ;;  %v5258_v50 = vadd.f32 %v4991_v18, %v1294_v7  ;;  %v6076_v7 = vld [vmem:[#allocation34_spill] sm:$0xff] }
 0x3a8   : > { %1627 = vmatprep.mubr.bf16.mxu1 %v1423_v61  ;;  %v6070_v61 = vld [vmem:[#allocation51_spill] sm:$0xff]  ;;  %v1435_v38 = vpack.c.bf16 %v5249_v24, %v5246_v62  ;;  %v1361_v48 = vmul.f32 %v6076_v7, %v4982_v14 }
 0x3a9   : > { %v1292_v13 = vmul.f32 %v6070_v61, %v4987_v10  ;;  %v1295_v61 = vmul.f32 %v4918_v42, %v4987_v10  ;;  %v6073_v42 = vld [vmem:[#allocation29_spill] sm:$0xff] }
 0x3aa   : > { %v1272_v45 = vmul.f32 %v6073_v42, %v4987_v10 }
 0x3ab   : > { %v5236_v2 = vadd.f32 %v4991_v18, %v1292_v13  ;;  %v1337_v13 = vpack.c.bf16 %v5060_v26, %v5055_v58  ;;  %v1333_v41 = vadd.f32 %v4991_v18, %v1295_v61  ;;  %v6074_v58 = vld [vmem:[#allocation30_spill] sm:$0xff]  ;;  %v1399_v61 = vadd.f32 %v5004_v57, %v1361_v48 }
 0x3ac   : > { %v1273_v26 = vmul.f32 %v6074_v58, %v4987_v10  ;;  %v1310_v34 = vadd.f32 %v4991_v18, %v1272_v45  ;;  %v6080_v45 = vld [vmem:[#allocation38_spill] sm:$0xff] }
 0x3ad   : > { %v1348_v52 = vpack.c.bf16 %v5239_v5, %v5236_v2  ;;  %v6075_v2 = vld [vmem:[#allocation32_spill] sm:$0xff]  ;;  %v1349_v9 = vpack.c.bf16 %v1333_v41, %v5258_v50 }
 0x3ae   : > { %v1360_v5 = vmul.f32 %v6075_v2, %v4982_v14  ;;  %v1311_v62 = vadd.f32 %v4991_v18, %v1273_v26  ;;  %v6078_v2 = vld [vmem:[#allocation33_spill] sm:$0xff]  ;;  %v6079_v50 = vld [vmem:[#allocation36_spill] sm:$0xff]  ;;  %v1363_v26 = vmul.f32 %v6080_v45, %v4982_v14 }
 0x3af   : > { %1628 = vmatmul.mubr.bf16.gmra.mrb[16].mxu1 %v1337_v13  ;;  %v1275_v51 = vmul.f32 %v6078_v2, %v4987_v10  ;;  %v1362_v41 = vmul.f32 %v6079_v50, %v4982_v14  ;;  %v6083_v2 = vld [vmem:[#allocation40_spill] sm:$0xff] }
 0x3b0   : > { %1635 = vmatprep.mubr.bf16.mxu1 %v1424_v63  ;;  %v1398_v24 = vadd.f32 %v5004_v57, %v1360_v5  ;;  %v1338_v13 = vpack.c.bf16 %v1311_v62, %v1310_v34  ;;  %v6077_v63 = vld [vmem:[#allocation31_spill] sm:$0xff]  ;;  %v1401_v34 = vadd.f32 %v5004_v57, %v1363_v26  ;;  %v1364_v50 = vmul.f32 %v6083_v2, %v4982_v14 }
 0x3b1   : > { %v1274_v58 = vmul.f32 %v6077_v63, %v4987_v10  ;;  %v1313_v48 = vadd.f32 %v4991_v18, %v1275_v51  ;;  %v1400_v7 = vadd.f32 %v5004_v57, %v1362_v41 }
 0x3b2   : > { %v1425_v42 = vpack.c.bf16 %v1399_v61, %v1398_v24  ;;  %v6081_v61 = vld [vmem:[#allocation35_spill] sm:$0xff]  ;;  %v1402_v26 = vadd.f32 %v5004_v57, %v1364_v50 }
 0x3b3   : > { %v1312_v5 = vadd.f32 %v4991_v18, %v1274_v58  ;;  %v1426_v24 = vpack.c.bf16 %v1401_v34, %v1400_v7  ;;  %v6084_v58 = vld [vmem:[#allocation42_spill] sm:$0xff]  ;;  %v6085_v34 = vld [vmem:[#allocation39_spill] sm:$0xff] }
 0x3b4   : > { %v1365_v51 = vmul.f32 %v6084_v58, %v4982_v14 }
 0x3b5   : > { %v1339_v62 = vpack.c.bf16 %v1313_v48, %v1312_v5 }
 0x3b6   : > { %v1403_v5 = vadd.f32 %v5004_v57, %v1365_v51  ;;  %v6089_v57 = vpack.c.bf16 %v5227_v19, %v5224_v53 }
 0x3b7   : > { %1636 = vmatmul.mubr.bf16.gmra.mrb[20].mxu1 %v1338_v13  ;;  %v1276_v13 = vmul.f32 %v6081_v61, %v4987_v10 }
 0x3b8   : > { %1643 = vmatprep.mubr.bf16.mxu1 %v1425_v42  ;;  %v6082_v42 = vld [vmem:[#allocation37_spill] sm:$0xff]  ;;  %v1427_v7 = vpack.c.bf16 %v1403_v5, %v1402_v26 }
 0x3b9   : > { %v1277_v63 = vmul.f32 %v6082_v42, %v4987_v10  ;;  %v1314_v41 = vadd.f32 %v4991_v18, %v1276_v13 }
 0x3bb   : > { %v1315_v45 = vadd.f32 %v4991_v18, %v1277_v63  ;;  %v5384_v63 = vld [vmem:[#allocation14] ss:$0 sm:$0xff] }
 0x3bd   : > { %v1340_v48 = vpack.c.bf16 %v1315_v45, %v1314_v41 }
 0x3bf   : > { %1644 = vmatmul.mubr.bf16.gmra.mrb[24].mxu1 %v1339_v62  ;;  %v1278_v62 = vmul.f32 %v6085_v34, %v4987_v10 }
 0x3c0   : > { %1651 = vmatprep.mubr.bf16.mxu1 %v1426_v24  ;;  %v6086_v24 = vld [vmem:[#allocation41_spill] sm:$0xff] }
 0x3c1   : > { %v1279_v61 = vmul.f32 %v6086_v24, %v4987_v10  ;;  %v1316_v14 = vadd.f32 %v4991_v18, %v1278_v62  ;;  %v6087_v10 = vpack.c.bf16 %v5201_v44, %v5198_v49 }
 0x3c3   : > { %v1317_v13 = vadd.f32 %v4991_v18, %v1279_v61  ;;  %v6088_v18 = vpack.c.bf16 %v5217_v15, %v5208_v16  ;;  %v1879_v16 = vld [vmem:[%s6090_s28 + $0x30] sm:$0xff]  ;;  %v1880_v15 = vld [vmem:[%s6090_s28 + $0x38] sm:$0xff] }
 0x3c5   : > { %v1341_v42 = vpack.c.bf16 %v1317_v13, %v1316_v14 }
 0x3c7   : > { %1652 = vmatmul.mubr.bf16.gmra.mrb[28].mxu1 %v1340_v48  ;;  %v1883_v48 = vld [vmem:[%s6090_s28 + $0x50] sm:$0xff] }
 0x3c8   : > { %1659 = vmatprep.mubr.bf16.mxu1 %v1427_v7  ;;  %v1884_v7 = vld [vmem:[%s6090_s28 + $0x58] sm:$0xff] }
 0x3c9   : > { %v3517_v61 = vpack.c.bf16 %v1884_v7, %v1883_v48 }
 0x3cf   : > { %1660 = vmatmul.mubr.bf16.gmra.mrb[32].mxu1 %v1341_v42 }
 0x3d0   : > { %1667 = vmatprep.mubr.bf16.mxu1 %v1428_v35 }
 0x3d7   : > { %1668 = vmatmul.mubr.bf16.gmra.mrb[36].mxu1 %v1342_v17 }
 0x3d8   : > { %1675 = vmatprep.mubr.bf16.mxu1 %v1429_v20 }
 0x3df   : > { %1676 = vmatmul.mubr.bf16.gmra.mrb[40].mxu1 %v1343_v43 }
 0x3e0   : > { %1683 = vmatprep.mubr.bf16.mxu1 %v1430_v11  ;;  %v1873_v11 = vld [vmem:[%s6090_s28] sm:$0xff] }
 0x3e1   : > { %v3502_v28 = vpack.c.bf16 %v1874_v4, %v1873_v11 }
 0x3e3   : > { %3503 = vmatpush3.bf16.msra.mxu0 %v3502_v28 }
 0x3e4   : > { %3504 = vmatprep.subr.bf16.mxu0 %v6091_v21 }
 0x3e7   : > { %1684 = vmatmul.mubr.bf16.gmra.mrb[44].mxu1 %v1344_v8 }
 0x3e8   : > { %1691 = vmatprep.mubr.bf16.mxu1 %v1431_v32  ;;  %v1876_v32 = vld [vmem:[%s6090_s28 + $0x18] sm:$0xff] }
 0x3e9   : > { %v3505_v3 = vpack.c.bf16 %v1876_v32, %v1875_v6 }
 0x3eb   : > { %3506 = vmatpush3.bf16.msra.mxu0 %v3505_v3 }
 0x3ec   : > { %3507 = vmatprep.subr.bf16.mxu0 %v6091_v21 }
 0x3ef   : > { %1692 = vmatmul.mubr.bf16.gmra.mrb[48].mxu1 %v1345_v47  ;;  %v1877_v47 = vld [vmem:[%s6090_s28 + $0x20] sm:$0xff] }
 0x3f0   : > { %1699 = vmatprep.mubr.bf16.mxu1 %v1432_v60  ;;  %v3508_v49 = vpack.c.bf16 %v1878_v1, %v1877_v47 }
 0x3f2   : > { %3509 = vmatpush3.bf16.msra.mxu0 %v3508_v49 }
 0x3f3   : > { %3510 = vmatprep.subr.bf16.mxu0 %v6091_v21 }
 0x3f7   : > { %1700 = vmatmul.mubr.bf16.gmra.mrb[52].mxu1 %v1346_v27 }
 0x3f8   : > { %1707 = vmatprep.mubr.bf16.mxu1 %v6087_v10  ;;  %v1885_v10 = vld [vmem:[%s6090_s28 + $0x60] sm:$0xff] }
 0x3ff   : > { %1708 = vmatmul.mubr.bf16.gmra.mrb[56].mxu1 %v6088_v18  ;;  %v1886_v18 = vld [vmem:[%s6090_s28 + $0x68] sm:$0xff] }
 0x400   : > { %1715 = vmatprep.mubr.bf16.mxu1 %v6089_v57 }
 0x407   : > { %1716 = vmatmul.mubr.bf16.gmra.mrb[60].mxu1 %v1348_v52  ;;  %v3511_v52 = vpack.c.bf16 %v1880_v15, %v1879_v16 }
 0x408   : > { %1723 = vmatprep.mubr.bf16.mxu1 %v1435_v38  ;;  %v1881_v38 = vld [vmem:[%s6090_s28 + $0x40] sm:$0xff] }
 0x409   : > { %3512 = vmatpush3.bf16.msra.mxu0 %v3511_v52 }
 0x40a   : > { %3513 = vmatprep.subr.bf16.mxu0 %v6091_v21 }
 0x40f   : > { %1724 = vmatmul.mubr.bf16.gmra.mrb[64].mxu1 %v1349_v9  ;;  %v1882_v9 = vld [vmem:[%s6090_s28 + $0x48] sm:$0xff] }
 0x410   : > { %v3514_v51 = vpack.c.bf16 %v1882_v9, %v1881_v38 }
 0x412   : > { %3515 = vmatpush3.bf16.msra.mxu0 %v3514_v51 }
 0x413   : > { %3516 = vmatprep.subr.bf16.mxu0 %v6091_v21 }
 0x416   : > { %3518 = vmatpush3.bf16.msra.mxu0 %v3517_v61 }
 0x417   : > { %3519 = vmatprep.subr.bf16.mxu0 %v6091_v21 }
 0x46a   : > { %v3268_v39 = vpop.f32.mrb[4].mxu1 }
 0x46b   : > { %v3269_v37 = vpop.f32.mrb[5].mxu1 }
 0x46c   : > { %v3270_v56 = vadd.f32 %v3269_v37, %v3268_v39  ;;  %v3271_v29 = vpop.f32.mrb[6].mxu1 }
 0x46d   : > { %v3272_v35 = vpop.f32.mrb[7].mxu1 }
 0x46e   : > { %v3273_v40 = vadd.f32 %v3272_v35, %v3271_v29  ;;  %v1606_v41 = vadd.f32 %v3270_v56, %v5384_v63  ;;  %v3520_v35 = vpack.c.bf16 %v1886_v18, %v1885_v10 }
 0x470   : > { %v1609_v2 = vadd.f32 %v3273_v40, %v5384_v63  ;;  %v5398_v14 = vmax.f32 %v1606_v41, 0.0  ;;  %3521 = vmatpush3.bf16.msra.mxu0 %v3520_v35 }
 0x471   : > { %3522 = vmatprep.subr.bf16.mxu0 %v6091_v21 }
 0x472   : > { %v3274_v17 = vpop.f32.mrb[8].mxu1  ;;  %v5396_v62 = vmax.f32 %v1609_v2, 0.0  ;;  %v1802_v40 = vmul.f32 %v5398_v14, %v5398_v14 }
 0x473   : > { %v3275_v31 = vpop.f32.mrb[9].mxu1 }
 0x474   : > { %v3276_v12 = vadd.f32 %v3275_v31, %v3274_v17  ;;  %v3277_v22 = vpop.f32.mrb[10].mxu1  ;;  %v1803_v57 = vmul.f32 %v5396_v62, %v5396_v62  ;;  %v1764_v56 = vadd.f32 %v5396_v62, %v5398_v14 }
 0x475   : > { %v3278_v30 = vpop.f32.mrb[11].mxu1 }
 0x476   : > { %v3279_v20 = vadd.f32 %v3278_v30, %v3277_v22  ;;  %v1614_v45 = vadd.f32 %v3276_v12, %v5384_v63  ;;  %v1887_v30 = vld [vmem:[%s6090_s28 + $0x70] sm:$0xff] }
 0x478   : > { %v5400_v13 = vmax.f32 %v1614_v45, 0.0  ;;  %v1617_v42 = vadd.f32 %v3279_v20, %v5384_v63  ;;  %v1888_v20 = vld [vmem:[%s6090_s28 + $0x78] sm:$0xff] }
 0x479   : > { %v3523_v6 = vpack.c.bf16 %v1888_v20, %v1887_v30 }
 0x47a   : > { %v3280_v23 = vpop.f32.mrb[12].mxu1  ;;  %v1804_v17 = vmul.f32 %v5400_v13, %v5400_v13  ;;  %v5419_v31 = vmax.f32 %v1617_v42, 0.0 }
 0x47b   : > { %v3281_v43 = vpop.f32.mrb[13].mxu1  ;;  %3524 = vmatpush3.bf16.msra.mxu0 %v3523_v6 }
 0x47c   : > { %v3282_v46 = vadd.f32 %v3281_v43, %v3280_v23  ;;  %v3283_v59 = vpop.f32.mrb[14].mxu1  ;;  %v1765_v23 = vadd.f32 %v1764_v56, %v5400_v13  ;;  %v1805_v28 = vmul.f32 %v5419_v31, %v5419_v31  ;;  %3525 = vmatprep.subr.bf16.mxu0 %v6091_v21 }
 0x47d   : > { %v3284_v8 = vpop.f32.mrb[15].mxu1 }
 0x47e   : > { %v5359_v54 = vadd.f32 %v3284_v8, %v3283_v59  ;;  %v1622_v39 = vadd.f32 %v3282_v46, %v5384_v63  ;;  %v1834_v46 = vadd.f32 %v1803_v57, %v1802_v40  ;;  %v1766_v3 = vadd.f32 %v1765_v23, %v5419_v31 }
 0x480   : > { %v5429_v59 = vmax.f32 %v1622_v39, 0.0  ;;  %v1625_v11 = vadd.f32 %v5359_v54, %v5384_v63  ;;  %v1835_v8 = vadd.f32 %v1834_v46, %v1804_v17 }
 0x482   : > { %v3286_v25 = vpop.f32.mrb[16].mxu1  ;;  %v1806_v47 = vmul.f32 %v5429_v59, %v5429_v59  ;;  %v5440_v1 = vmax.f32 %v1625_v11, 0.0  ;;  %v1767_v54 = vadd.f32 %v1766_v3, %v5429_v59  ;;  %v1836_v49 = vadd.f32 %v1835_v8, %v1805_v28 }
 0x483   : > { %v3287_v60 = vpop.f32.mrb[17].mxu1 }
 0x484   : > { %v3288_v44 = vadd.f32 %v3287_v60, %v3286_v25  ;;  %v3289_v27 = vpop.f32.mrb[18].mxu1  ;;  %v1837_v52 = vadd.f32 %v1836_v49, %v1806_v47  ;;  %v1807_v38 = vmul.f32 %v5440_v1, %v5440_v1 }
 0x485   : > { %v3290_v53 = vpop.f32.mrb[19].mxu1 }
 0x486   : > { %v5375_v19 = vadd.f32 %v3290_v53, %v3289_v27  ;;  %v1630_v32 = vadd.f32 %v3288_v44, %v5384_v63  ;;  %v1838_v41 = vadd.f32 %v1837_v52, %v1807_v38 }
 0x488   : > { %v5443_v27 = vmax.f32 %v1630_v32, 0.0  ;;  %v1633_v44 = vadd.f32 %v5375_v19, %v5384_v63 }
 0x48a   : > { %v3292_v50 = vpop.f32.mrb[20].mxu1  ;;  %v5454_v51 = vmax.f32 %v1633_v44, 0.0 }
 0x48b   : > { %v3293_v58 = vpop.f32.mrb[21].mxu1 }
 0x48c   : > { %v3294_v26 = vadd.f32 %v3293_v58, %v3292_v50  ;;  %v3295_v5 = vpop.f32.mrb[22].mxu1  ;;  %v1768_v50 = vadd.f32 %v1767_v54, %v5440_v1  ;;  %v1808_v58 = vmul.f32 %v5443_v27, %v5443_v27 }
 0x48d   : > { %v3296_v34 = vpop.f32.mrb[23].mxu1 }
 0x48e   : > { %v3297_v24 = vadd.f32 %v3296_v34, %v3295_v5  ;;  %v1638_v9 = vadd.f32 %v3294_v26, %v5384_v63  ;;  %v1769_v19 = vadd.f32 %v1768_v50, %v5443_v27  ;;  %v1839_v34 = vadd.f32 %v1838_v41, %v1808_v58 }
 0x48f   : > { %v1809_v26 = vmul.f32 %v5454_v51, %v5454_v51 }
 0x490   : > { %v5457_v45 = vmax.f32 %v1638_v9, 0.0  ;;  %v1641_v5 = vadd.f32 %v3297_v24, %v5384_v63  ;;  %v1770_v18 = vadd.f32 %v1769_v19, %v5454_v51 }
 0x492   : > { %v3298_v37 = vpop.f32.mrb[24].mxu1  ;;  %v1810_v39 = vmul.f32 %v5457_v45, %v5457_v45  ;;  %v1771_v24 = vadd.f32 %v1770_v18, %v5457_v45 }
 0x493   : > { %v3299_v29 = vpop.f32.mrb[25].mxu1 }
 0x494   : > { %v3300_v12 = vadd.f32 %v3299_v29, %v3298_v37  ;;  %v3301_v22 = vpop.f32.mrb[26].mxu1  ;;  %v5466_v37 = vmax.f32 %v1641_v5, 0.0  ;;  %v1840_v29 = vadd.f32 %v1839_v34, %v1809_v26 }
 0x495   : > { %v3302_v43 = vpop.f32.mrb[27].mxu1 }
 0x496   : > { %v3303_v4 = vadd.f32 %v3302_v43, %v3301_v22  ;;  %v1646_v61 = vadd.f32 %v3300_v12, %v5384_v63  ;;  %v1841_v17 = vadd.f32 %v1840_v29, %v1810_v39  ;;  %v1811_v12 = vmul.f32 %v5466_v37, %v5466_v37 }
 0x497   : > { %v1772_v20 = vadd.f32 %v1771_v24, %v5466_v37 }
 0x498   : > { %v5469_v35 = vmax.f32 %v1646_v61, 0.0  ;;  %v1649_v40 = vadd.f32 %v3303_v4, %v5384_v63  ;;  %v1842_v28 = vadd.f32 %v1841_v17, %v1811_v12 }
 0x49a   : > { %v3304_v25 = vpop.f32.mrb[28].mxu1  ;;  %v1812_v43 = vmul.f32 %v5469_v35, %v5469_v35  ;;  %v5478_v46 = vmax.f32 %v1649_v40, 0.0  ;;  %v1773_v8 = vadd.f32 %v1772_v20, %v5469_v35 }
 0x49b   : > { %v3305_v60 = vpop.f32.mrb[29].mxu1 }
 0x49c   : > { %v3306_v16 = vadd.f32 %v3305_v60, %v3304_v25  ;;  %v3307_v15 = vpop.f32.mrb[30].mxu1  ;;  %v1843_v25 = vadd.f32 %v1842_v28, %v1812_v43  ;;  %v1813_v54 = vmul.f32 %v5478_v46, %v5478_v46  ;;  %v1774_v49 = vadd.f32 %v1773_v8, %v5478_v46 }
 0x49d   : > { %v3308_v53 = vpop.f32.mrb[31].mxu1 }
 0x49e   : > { %v3309_v2 = vadd.f32 %v3308_v53, %v3307_v15  ;;  %v1654_v22 = vadd.f32 %v3306_v16, %v5384_v63  ;;  %v1844_v38 = vadd.f32 %v1843_v25, %v1813_v54 }
 0x4a0   : > { %v5481_v32 = vmax.f32 %v1654_v22, 0.0  ;;  %v1657_v3 = vadd.f32 %v3309_v2, %v5384_v63 }
 0x4a2   : > { %v3310_v48 = vpop.f32.mrb[32].mxu1  ;;  %v1814_v44 = vmul.f32 %v5481_v32, %v5481_v32  ;;  %v5490_v16 = vmax.f32 %v1657_v3, 0.0  ;;  %v1775_v53 = vadd.f32 %v1774_v49, %v5481_v32 }
 0x4a3   : > { %v3311_v7 = vpop.f32.mrb[33].mxu1 }
 0x4a4   : > { %v3312_v42 = vadd.f32 %v3311_v7, %v3310_v48  ;;  %v3313_v10 = vpop.f32.mrb[34].mxu1  ;;  %v1845_v41 = vadd.f32 %v1844_v38, %v1814_v44  ;;  %v1815_v5 = vmul.f32 %v5490_v16, %v5490_v16  ;;  %v1776_v34 = vadd.f32 %v1775_v53, %v5490_v16 }
 0x4a5   : > { %v3314_v57 = vpop.f32.mrb[35].mxu1 }
 0x4a6   : > { %v3315_v56 = vadd.f32 %v3314_v57, %v3313_v10  ;;  %v1662_v60 = vadd.f32 %v3312_v42, %v5384_v63  ;;  %v1846_v10 = vadd.f32 %v1845_v41, %v1815_v5 }
 0x4a8   : > { %v5493_v9 = vmax.f32 %v1662_v60, 0.0  ;;  %v1665_v2 = vadd.f32 %v3315_v56, %v5384_v63 }
 0x4aa   : > { %v3316_v30 = vpop.f32.mrb[36].mxu1  ;;  %v1816_v26 = vmul.f32 %v5493_v9, %v5493_v9  ;;  %v5502_v61 = vmax.f32 %v1665_v2, 0.0  ;;  %v1777_v42 = vadd.f32 %v1776_v34, %v5493_v9 }
 0x4ab   : > { %v3317_v23 = vpop.f32.mrb[37].mxu1 }
 0x4ac   : > { %v3318_v11 = vadd.f32 %v3317_v23, %v3316_v30  ;;  %v3319_v6 = vpop.f32.mrb[38].mxu1  ;;  %v1847_v24 = vadd.f32 %v1846_v10, %v1816_v26  ;;  %v1817_v29 = vmul.f32 %v5502_v61, %v5502_v61  ;;  %v1778_v22 = vadd.f32 %v1777_v42, %v5502_v61 }
 0x4ad   : > { %v3320_v4 = vpop.f32.mrb[39].mxu1 }
 0x4ae   : > { %v3321_v47 = vadd.f32 %v3320_v4, %v3319_v6  ;;  %v1670_v48 = vadd.f32 %v3318_v11, %v5384_v63  ;;  %v1848_v6 = vadd.f32 %v1847_v24, %v1817_v29 }
 0x4b0   : > { %v5505_v18 = vmax.f32 %v1670_v48, 0.0  ;;  %v1673_v57 = vadd.f32 %v3321_v47, %v5384_v63 }
 0x4b2   : > { %v3322_v15 = vpop.f32.mrb[40].mxu1  ;;  %v1818_v20 = vmul.f32 %v5505_v18, %v5505_v18  ;;  %v5514_v23 = vmax.f32 %v1673_v57, 0.0  ;;  %v1779_v11 = vadd.f32 %v1778_v22, %v5505_v18 }
 0x4b3   : > { %v3323_v52 = vpop.f32.mrb[41].mxu1 }
 0x4b4   : > { %v3324_v50 = vadd.f32 %v3323_v52, %v3322_v15  ;;  %v3325_v58 = vpop.f32.mrb[42].mxu1  ;;  %v1849_v28 = vadd.f32 %v1848_v6, %v1818_v20  ;;  %v1819_v3 = vmul.f32 %v5514_v23, %v5514_v23  ;;  %v1780_v54 = vadd.f32 %v1779_v11, %v5514_v23 }
 0x4b5   : > { %v3326_v19 = vpop.f32.mrb[43].mxu1 }
 0x4b6   : > { %v3327_v7 = vadd.f32 %v3326_v19, %v3325_v58  ;;  %v1678_v40 = vadd.f32 %v3324_v50, %v5384_v63  ;;  %v1850_v2 = vadd.f32 %v1849_v28, %v1819_v3 }
 0x4b8   : > { %v5517_v8 = vmax.f32 %v1678_v40, 0.0  ;;  %v1681_v4 = vadd.f32 %v3327_v7, %v5384_v63 }
 0x4ba   : > { %v3328_v39 = vpop.f32.mrb[44].mxu1  ;;  %v1820_v49 = vmul.f32 %v5517_v8, %v5517_v8  ;;  %v5526_v44 = vmax.f32 %v1681_v4, 0.0  ;;  %v1781_v52 = vadd.f32 %v1780_v54, %v5517_v8 }
 0x4bb   : > { %v3329_v56 = vpop.f32.mrb[45].mxu1 }
 0x4bc   : > { %v3330_v17 = vadd.f32 %v3329_v56, %v3328_v39  ;;  %v3331_v12 = vpop.f32.mrb[46].mxu1  ;;  %v1851_v41 = vadd.f32 %v1850_v2, %v1820_v49  ;;  %v1821_v5 = vmul.f32 %v5526_v44, %v5526_v44  ;;  %v1782_v7 = vadd.f32 %v1781_v52, %v5526_v44 }
 0x4bd   : > { %v3332_v30 = vpop.f32.mrb[47].mxu1 }
 0x4be   : > { %v3333_v43 = vadd.f32 %v3332_v30, %v3331_v12  ;;  %v1686_v47 = vadd.f32 %v3330_v17, %v5384_v63  ;;  %v1852_v39 = vadd.f32 %v1851_v41, %v1821_v5 }
 0x4c0   : > { %v5529_v50 = vmax.f32 %v1686_v47, 0.0  ;;  %v1689_v58 = vadd.f32 %v3333_v43, %v5384_v63 }
 0x4c2   : > { %v3334_v25 = vpop.f32.mrb[48].mxu1  ;;  %v1822_v34 = vmul.f32 %v5529_v50, %v5529_v50  ;;  %v5538_v26 = vmax.f32 %v1689_v58, 0.0  ;;  %v1783_v10 = vadd.f32 %v1782_v7, %v5529_v50 }
 0x4c3   : > { %v3335_v60 = vpop.f32.mrb[49].mxu1 }
 0x4c4   : > { %v3336_v15 = vadd.f32 %v3335_v60, %v3334_v25  ;;  %v3337_v53 = vpop.f32.mrb[50].mxu1  ;;  %v1853_v12 = vadd.f32 %v1852_v39, %v1822_v34  ;;  %v1823_v22 = vmul.f32 %v5538_v26, %v5538_v26  ;;  %v1784_v43 = vadd.f32 %v1783_v10, %v5538_v26 }
 0x4c5   : > { %v3338_v38 = vpop.f32.mrb[51].mxu1 }
 0x4c6   : > { %v3339_v19 = vadd.f32 %v3338_v38, %v3337_v53  ;;  %v1694_v48 = vadd.f32 %v3336_v15, %v5384_v63  ;;  %v1854_v28 = vadd.f32 %v1853_v12, %v1823_v22 }
 0x4c8   : > { %v5541_v56 = vmax.f32 %v1694_v48, 0.0  ;;  %v1697_v24 = vadd.f32 %v3339_v19, %v5384_v63 }
 0x4ca   : > { %v3340_v42 = vpop.f32.mrb[52].mxu1  ;;  %v1824_v11 = vmul.f32 %v5541_v56, %v5541_v56  ;;  %v5550_v6 = vmax.f32 %v1697_v24, 0.0  ;;  %v1785_v4 = vadd.f32 %v1784_v43, %v5541_v56 }
 0x4cb   : > { %v3341_v57 = vpop.f32.mrb[53].mxu1 }
 0x4cc   : > { %v3342_v29 = vadd.f32 %v3341_v57, %v3340_v42  ;;  %v3343_v40 = vpop.f32.mrb[54].mxu1  ;;  %v1855_v60 = vadd.f32 %v1854_v28, %v1824_v11  ;;  %v1825_v49 = vmul.f32 %v5550_v6, %v5550_v6  ;;  %v1786_v52 = vadd.f32 %v1785_v4, %v5550_v6 }
 0x4cd   : > { %v3344_v17 = vpop.f32.mrb[55].mxu1 }
 0x4ce   : > { %v1702_v30 = vadd.f32 %v3342_v29, %v5384_v63  ;;  %v3345_v20 = vadd.f32 %v3344_v17, %v3343_v40  ;;  %v1856_v5 = vadd.f32 %v1855_v60, %v1825_v49 }
 0x4d0   : > { %v5553_v3 = vmax.f32 %v1702_v30, 0.0  ;;  %v1705_v47 = vadd.f32 %v3345_v20, %v5384_v63 }
 0x4d2   : > { %v3346_v25 = vpop.f32.mrb[56].mxu1  ;;  %v1826_v2 = vmul.f32 %v5553_v3, %v5553_v3  ;;  %v5561_v58 = vmax.f32 %v1705_v47, 0.0  ;;  %v1787_v48 = vadd.f32 %v1786_v52, %v5553_v3 }
 0x4d3   : > { %v3347_v54 = vpop.f32.mrb[57].mxu1 }
 0x4d4   : > { %v3348_v15 = vadd.f32 %v3347_v54, %v3346_v25  ;;  %v3349_v53 = vpop.f32.mrb[58].mxu1  ;;  %v1857_v42 = vadd.f32 %v1856_v5, %v1826_v2  ;;  %v1827_v10 = vmul.f32 %v5561_v58, %v5561_v58  ;;  %v1788_v24 = vadd.f32 %v1787_v48, %v5561_v58 }
 0x4d5   : > { %v3350_v38 = vpop.f32.mrb[59].mxu1 }
 0x4d6   : > { %v1710_v19 = vadd.f32 %v3348_v15, %v5384_v63  ;;  %v3351_v41 = vadd.f32 %v3350_v38, %v3349_v53  ;;  %v1858_v30 = vadd.f32 %v1857_v42, %v1827_v10 }
 0x4d8   : > { %v5565_v7 = vmax.f32 %v1710_v19, 0.0  ;;  %v1713_v34 = vadd.f32 %v3351_v41, %v5384_v63 }
 0x4da   : > { %v3352_v57 = vpop.f32.mrb[60].mxu1  ;;  %v1828_v29 = vmul.f32 %v5565_v7, %v5565_v7  ;;  %v5573_v40 = vmax.f32 %v1713_v34, 0.0  ;;  %v1789_v20 = vadd.f32 %v1788_v24, %v5565_v7 }
 0x4db   : > { %v3353_v39 = vpop.f32.mrb[61].mxu1 }
 0x4dc   : > { %v3354_v17 = vadd.f32 %v3353_v39, %v3352_v57  ;;  %v3355_v12 = vpop.f32.mrb[62].mxu1  ;;  %v1859_v4 = vadd.f32 %v1858_v30, %v1828_v29  ;;  %v1829_v28 = vmul.f32 %v5573_v40, %v5573_v40  ;;  %v1790_v54 = vadd.f32 %v1789_v20, %v5573_v40 }
 0x4dd   : > { %v3356_v22 = vpop.f32.mrb[63].mxu1 }
 0x4de   : > { %v1718_v43 = vadd.f32 %v3354_v17, %v5384_v63  ;;  %v3357_v11 = vadd.f32 %v3356_v22, %v3355_v12  ;;  %v1860_v52 = vadd.f32 %v1859_v4, %v1829_v28 }
 0x4e0   : > { %v5579_v47 = vmax.f32 %v1718_v43, 0.0  ;;  %v1721_v25 = vadd.f32 %v3357_v11, %v5384_v63 }
 0x4e2   : > { %v1830_v60 = vmul.f32 %v5579_v47, %v5579_v47  ;;  %v5585_v49 = vmax.f32 %v1721_v25, 0.0  ;;  %v3358_v15 = vpop.f32.mrb[64].mxu1  ;;  %v1791_v38 = vadd.f32 %v1790_v54, %v5579_v47 }
 0x4e3   : > { %v3359_v53 = vpop.f32.mrb[65].mxu1 }
 0x4e4   : > { %v3360_v2 = vadd.f32 %v3359_v53, %v3358_v15  ;;  %v3361_v19 = vpop.f32.mrb[66].mxu1  ;;  %v1861_v5 = vadd.f32 %v1860_v52, %v1830_v60  ;;  %v1831_v48 = vmul.f32 %v5585_v49, %v5585_v49  ;;  %v1792_v10 = vadd.f32 %v1791_v38, %v5585_v49 }
 0x4e5   : > { %v3362_v41 = vpop.f32.mrb[67].mxu1 }
 0x4e6   : > { %v1726_v34 = vadd.f32 %v3360_v2, %v5384_v63  ;;  %v3363_v42 = vadd.f32 %v3362_v41, %v3361_v19  ;;  %v1862_v24 = vadd.f32 %v1861_v5, %v1831_v48  ;;  %v1972_v41 = vld [vmem:[%s6092_s20] sm:$0xff]  ;;  %v1973_v5 = vld [vmem:[%s6092_s20 + $0x8] sm:$0xff]  ;;  %v1974_v48 = vld [vmem:[%s6092_s20 + $0x10] sm:$0xff] }
 0x4e8   : > { %v5592_v57 = vmax.f32 %v1726_v34, 0.0  ;;  %v1729_v39 = vadd.f32 %v3363_v42, %v5384_v63  ;;  %v3526_v34 = vpack.c.bf16 %v1973_v5, %v1972_v41  ;;  %v1975_v42 = vld [vmem:[%s6092_s20 + $0x18] sm:$0xff] }
 0x4e9   : > { %v3713_v41 = vld [vmem:[#allocation18 + $0x60] ss:$8 sps:$4 sm:$0xff]   ;;  %v3718_v5 = vld [vmem:[#allocation18 + $0x74] ss:$8 sps:$4 sm:$0xff]  }
 0x4ea   : > { %v1793_v29 = vadd.f32 %v1792_v10, %v5592_v57  ;;  %v1832_v17 = vmul.f32 %v5592_v57, %v5592_v57  ;;  %v5598_v12 = vmax.f32 %v1729_v39, 0.0  ;;  %v3529_v10 = vpack.c.bf16 %v1975_v42, %v1974_v48  ;;  %v3716_v48 = vld [vmem:[#allocation18 + $0x70] ss:$8 sps:$4 sm:$0xff]  }
 0x4ec   : > { %v1863_v22 = vadd.f32 %v1862_v24, %v1832_v17  ;;  %v1794_v30 = vadd.f32 %v1793_v29, %v5598_v12  ;;  %v1833_v20 = vmul.f32 %v5598_v12, %v5598_v12 }
 0x4ee   : > { %v1795_v43 = vrot.slane %v1794_v30, 4  ;;  %v1864_v11 = vadd.f32 %v1863_v22, %v1833_v20 }
 0x4f0   : > { %v1796_v4 = vadd.f32 %v1795_v43, %v1794_v30  ;;  %v1865_v28 = vrot.slane %v1864_v11, 4 }
 0x4f2   : > { %v1797_v25 = vrot.slane %v1796_v4, 2  ;;  %v1866_v63 = vadd.f32 %v1865_v28, %v1864_v11  ;;  %v3695_v11 = vld [vmem:[#allocation18] ss:$8 sps:$4 sm:$0xff]   ;;  %v3698_v28 = vld [vmem:[#allocation18 + $0x10] ss:$8 sps:$4 sm:$0xff]  }
 0x4f4   : > { %v1798_v54 = vadd.f32 %v1797_v25, %v1796_v4  ;;  %v1867_v60 = vrot.slane %v1866_v63, 2  ;;  %v3700_v4 = vld [vmem:[#allocation18 + $0x14] ss:$8 sps:$4 sm:$0xff]   ;;  %v3703_v25 = vld [vmem:[#allocation18 + $0x24] ss:$8 sps:$4 sm:$0xff]  }
 0x4f6   : > { %v1799_v15 = vrot.slane %v1798_v54, 1  ;;  %v1868_v53 = vadd.f32 %v1867_v60, %v1866_v63  ;;  %v3701_v63 = vld [vmem:[#allocation18 + $0x20] ss:$8 sps:$4 sm:$0xff]   ;;  %v3704_v60 = vld [vmem:[#allocation18 + $0x30] ss:$8 sps:$4 sm:$0xff]  }
 0x4f8   : > { %v1800_v52 = vadd.f32 %v1799_v15, %v1798_v54  ;;  %v1869_v38 = vrot.slane %v1868_v53, 1  ;;  %v3706_v54 = vld [vmem:[#allocation18 + $0x34] ss:$8 sps:$4 sm:$0xff]   ;;  %v3707_v15 = vld [vmem:[#allocation18 + $0x40] ss:$8 sps:$4 sm:$0xff]  }
 0x4fa   : > { %1801 = vst [vmem:[#allocation2 + $0x8] sm:$0x1] %v1800_v52  ;;  %v1870_v2 = vadd.f32 %v1869_v38, %v1868_v53  ;;  %v3709_v53 = vld [vmem:[#allocation18 + $0x44] ss:$8 sps:$4 sm:$0xff]   ;;  %v3712_v52 = vld [vmem:[#allocation18 + $0x54] ss:$8 sps:$4 sm:$0xff]  }
 0x4fb   : > { %v3710_v38 = vld [vmem:[#allocation18 + $0x50] ss:$8 sps:$4 sm:$0xff]  }
 0x4fc   : > { %1871 = vst [vmem:[#allocation2 + $0x9] sm:$0x1] %v1870_v2  ;;  %v4111_v2 = vmov 0  }
 0x503   : > { %v1872_v19 = vld [vmem:[#allocation2 + $0x8] sm:$0x3] }
 0x504   : > { %3461 = vmatmul.mubr.f32.vlgmr.msra.gmra.mrb[0].mxu0 %v1872_v19  ;;  %v3715_v19 = vld [vmem:[#allocation18 + $0x64] ss:$8 sps:$4 sm:$0xff]  }
 0x505   : > { %3471 = vmatprep.mubr.msk.f32.mxu0 %vm4108_vm0, %v6060_v0  ;;  %3527 = vmatpush3.bf16.msra.mxu0 %v3526_v34  ;;  %v3697_v0 = vld [vmem:[#allocation18 + $0x4] ss:$8 sps:$4 sm:$0xff]  }
 0x506   : > { %3528 = vmatprep.subr.bf16.mxu0 %v6091_v21 }
 0x509   : > { %3530 = vmatpush3.bf16.msra.mxu0 %v3529_v10 }
 0x50a   : > { %2272 = vmatprep.subr.bf16.mxu0 %v3697_v0 }
 0x5d7   : > { %v1955_v39 = vpop.f32.mrb[0].mxu0 }
 0x5d8   : > { %v1959_v24 = vmul.f32 0.0009765625, %v1955_v39  ;;  %v3462_v29 = vpop.f32.mrb[1].mxu0  ;;  %v2050_v39 = vld [vmem:[#allocation15] sm:$0x1] }
 0x5da   : > { %v1960_v17 = vmul.f32 %v1959_v24, %v1959_v24  ;;  %1968 = vst.msk [vmem:[#allocation2 + $0xa] sm:$0x1] %vm1967_vm4, %v1959_v24 }
 0x5dc   : > { %v1962_v22 = vrot.slane %v1960_v17, 7  ;;  %v2069_v17 = vld [vmem:[#allocation17] sm:$0x1] }
 0x5de   : > { %v1964_v30 = vsub.f32 %v1959_v24, %v1962_v22 }
 0x5e0   : > { %v1965_v20 = vadd.f32 1e-05, %v1964_v30 }
 0x5e2   : > { %3721 = vrsqrt.f32 %v1965_v20 }
 0x5ec   : > { %v3722_v43 = vpop.eup %3721 }
 0x5ed   : > { %1970 = vst.msk [vmem:[#allocation2 + $0xa] sm:$0x2] %vm1969_vm5, %v3722_v43 }
 0x5f4   : > { %v1971_v21 = vld [vmem:[#allocation2 + $0xa] sm:$0x3] }
 0x5f5   : > { %3472 = vmatmul.mubr.msk.f32.vlgmr.msra.gmra.mrb[2].mxu0 %vm1976_vm6, %v1971_v21 }
 0x5f6   : > { %2273 = vmatpush1.bf16.msra.mxu0 %v3695_v11  ;;  %2304 = vmatprep.mubr.bf16.mxu0 %v4111_v2 }
 0x5f7   : > { %2274 = vmatprep.subr.bf16.mxu0 %v3700_v4 }
 0x5fa   : > { %2275 = vmatpush1.bf16.msra.mxu0 %v3698_v28 }
 0x5fb   : > { %2276 = vmatprep.subr.bf16.mxu0 %v3703_v25 }
 0x5fe   : > { %2277 = vmatpush1.bf16.msra.mxu0 %v3701_v63 }
 0x5ff   : > { %2278 = vmatprep.subr.bf16.mxu0 %v3706_v54 }
 0x602   : > { %2279 = vmatpush1.bf16.msra.mxu0 %v3704_v60 }
 0x603   : > { %2280 = vmatprep.subr.bf16.mxu0 %v3709_v53 }
 0x606   : > { %2281 = vmatpush1.bf16.msra.mxu0 %v3707_v15 }
 0x607   : > { %2282 = vmatprep.subr.bf16.mxu0 %v3712_v52 }
 0x60a   : > { %2283 = vmatpush1.bf16.msra.mxu0 %v3710_v38 }
 0x60b   : > { %2284 = vmatprep.subr.bf16.mxu0 %v3715_v19 }
 0x60e   : > { %2285 = vmatpush1.bf16.msra.mxu0 %v3713_v41 }
 0x60f   : > { %2286 = vmatprep.subr.bf16.mxu0 %v3718_v5 }
 0x612   : > { %2287 = vmatpush1.bf16.msra.mxu0 %v3716_v48 }
 0x6c8   : > { %v2046_v34 = vpop.f32.mrb[2].mxu0 }
 0x6c9   : > { %v2058_v42 = vrot.slane %v2046_v34, %v4973_v36  ;;  %v3473_v10 = vpop.f32.mrb[3].mxu0 }
 0x6cb   : > { %v2059_v0 = vcombine.high %v2058_v42, %v2058_v42 }
 0x6cd   : > { %v2066_v24 = vrot.slane %v2059_v0, %v4973_v36 }
 0x6cf   : > { %v2068_v29 = vmul.f32 %v2066_v24, %v2050_v39 }
 0x6d1   : > { %v2070_v22 = vmul.f32 %v2068_v29, %v2046_v34  ;;  %v5622_v20 = vrot.slane %v2068_v29, %v4979_v33 }
 0x6d3   : > { %v2071_v30 = vsub.f32 %v2069_v17, %v2070_v22  ;;  %v2078_v11 = vmul.f32 %v5622_v20, %v5398_v14  ;;  %v2079_v4 = vmul.f32 %v5622_v20, %v5396_v62  ;;  %v2080_v28 = vmul.f32 %v5622_v20, %v5400_v13 }
 0x6d4   : > { %v2081_v25 = vmul.f32 %v5622_v20, %v5419_v31  ;;  %v2094_v63 = vmul.f32 %v5622_v20, %v5505_v18  ;;  %v2095_v54 = vmul.f32 %v5622_v20, %v5514_v23  ;;  %v2096_v14 = vmul.f32 %v5622_v20, %v5517_v8 }
 0x6d5   : > { %v5625_v43 = vrot.slane %v2071_v30, %v4979_v33  ;;  %v2097_v62 = vmul.f32 %v5622_v20, %v5526_v44  ;;  %v2098_v60 = vmul.f32 %v5622_v20, %v5529_v50  ;;  %v2099_v13 = vmul.f32 %v5622_v20, %v5538_v26 }
 0x6d6   : > { %v2100_v31 = vmul.f32 %v5622_v20, %v5541_v56  ;;  %v2101_v8 = vmul.f32 %v5622_v20, %v5550_v6  ;;  %v2102_v44 = vmul.f32 %v5622_v20, %v5553_v3  ;;  %v2103_v50 = vmul.f32 %v5622_v20, %v5561_v58 }
 0x6d7   : > { %v2116_v21 = vadd.f32 %v5625_v43, %v2078_v11  ;;  %v2117_v36 = vadd.f32 %v5625_v43, %v2079_v4  ;;  %v2118_v18 = vadd.f32 %v5625_v43, %v2080_v28  ;;  %v2119_v23 = vadd.f32 %v5625_v43, %v2081_v25 }
 0x6d8   : > { %v2104_v53 = vmul.f32 %v5622_v20, %v5565_v7  ;;  %v2105_v26 = vmul.f32 %v5622_v20, %v5573_v40  ;;  %v2106_v56 = vmul.f32 %v5622_v20, %v5579_v47  ;;  %v2107_v52 = vmul.f32 %v5622_v20, %v5585_v49 }
 0x6d9   : > { %v2148_v15 = vpack.c.bf16 %v2117_v36, %v2116_v21  ;;  %v5669_v6 = vadd.f32 %v5625_v43, %v2094_v63  ;;  %v2108_v3 = vmul.f32 %v5622_v20, %v5592_v57  ;;  %v2109_v58 = vmul.f32 %v5622_v20, %v5598_v12 }
 0x6da   : > { %v5676_v7 = vadd.f32 %v5625_v43, %v2095_v54  ;;  %v5679_v40 = vadd.f32 %v5625_v43, %v2096_v14  ;;  %v2149_v47 = vpack.c.bf16 %v2119_v23, %v2118_v18  ;;  %v5682_v49 = vadd.f32 %v5625_v43, %v2097_v62 }
 0x6db   : > { %2305 = vmatmul.mubr.bf16.vlgmr.msra.gmra.mrb[4].mxu0 %v2148_v15  ;;  %v5685_v38 = vadd.f32 %v5625_v43, %v2098_v60  ;;  %v5688_v19 = vadd.f32 %v5625_v43, %v2099_v13  ;;  %v5693_v12 = vadd.f32 %v5625_v43, %v2100_v31  ;;  %v5696_v41 = vadd.f32 %v5625_v43, %v2101_v8 }
 0x6dc   : > { %2314 = vmatprep.mubr.bf16.mxu0 %v4111_v2  ;;  %v2156_v57 = vpack.c.bf16 %v5676_v7, %v5669_v6  ;;  %v5699_v5 = vadd.f32 %v5625_v43, %v2102_v44  ;;  %v2157_v48 = vpack.c.bf16 %v5682_v49, %v5679_v40  ;;  %v5706_v42 = vadd.f32 %v5625_v43, %v2103_v50 }
 0x6dd   : > { %v2158_v34 = vpack.c.bf16 %v5688_v19, %v5685_v38  ;;  %v5709_v10 = vadd.f32 %v5625_v43, %v2104_v53  ;;  %v2159_v0 = vpack.c.bf16 %v5696_v41, %v5693_v12  ;;  %v5714_v39 = vadd.f32 %v5625_v43, %v2105_v26 }
 0x6de   : > { %v5717_v24 = vadd.f32 %v5625_v43, %v2106_v56  ;;  %v5720_v29 = vadd.f32 %v5625_v43, %v2107_v52  ;;  %v2160_v17 = vpack.c.bf16 %v5706_v42, %v5699_v5  ;;  %v5725_v22 = vadd.f32 %v5625_v43, %v2108_v3 }
 0x6df   : > { %v2147_v30 = vadd.f32 %v5625_v43, %v2109_v58  ;;  %v2082_v11 = vmul.f32 %v5622_v20, %v5429_v59  ;;  %v2083_v4 = vmul.f32 %v5622_v20, %v5440_v1  ;;  %v2161_v21 = vpack.c.bf16 %v5714_v39, %v5709_v10 }
 0x6e0   : > { %v2162_v36 = vpack.c.bf16 %v5720_v29, %v5717_v24  ;;  %v2084_v59 = vmul.f32 %v5622_v20, %v5443_v27  ;;  %v2085_v1 = vmul.f32 %v5622_v20, %v5454_v51  ;;  %v2086_v15 = vmul.f32 %v5622_v20, %v5457_v45 }
 0x6e1   : > { %v2163_v28 = vpack.c.bf16 %v2147_v30, %v5725_v22  ;;  %v2120_v25 = vadd.f32 %v5625_v43, %v2082_v11  ;;  %v2121_v63 = vadd.f32 %v5625_v43, %v2083_v4  ;;  %v2087_v13 = vmul.f32 %v5622_v20, %v5466_v37 }
 0x6e2   : > { %v2122_v14 = vadd.f32 %v5625_v43, %v2084_v59  ;;  %v2123_v62 = vadd.f32 %v5625_v43, %v2085_v1  ;;  %v2124_v27 = vadd.f32 %v5625_v43, %v2086_v15  ;;  %v2088_v18 = vmul.f32 %v5622_v20, %v5469_v35 }
 0x6e3   : > { %2315 = vmatmul.mubr.bf16.gmra.mrb[8].mxu0 %v2149_v47  ;;  %v2150_v54 = vpack.c.bf16 %v2121_v63, %v2120_v25  ;;  %v2125_v51 = vadd.f32 %v5625_v43, %v2087_v13  ;;  %v2089_v23 = vmul.f32 %v5622_v20, %v5478_v46  ;;  %v2090_v44 = vmul.f32 %v5622_v20, %v5481_v32 }
 0x6e4   : > { %2324 = vmatprep.mubr.bf16.mxu0 %v4111_v2  ;;  %v2151_v60 = vpack.c.bf16 %v2123_v62, %v2122_v14  ;;  %v2126_v45 = vadd.f32 %v5625_v43, %v2088_v18  ;;  %v2091_v50 = vmul.f32 %v5622_v20, %v5490_v16  ;;  %v2092_v26 = vmul.f32 %v5622_v20, %v5493_v9  ;;  %v2180_v9 = vld [vmem:[%s6093_s2] sm:$0x3]  ;;  %s4005_s2 = scalar_lea.vmem %s5896_s29, 4096 }
 0x6e5   : > { %v2152_v31 = vpack.c.bf16 %v2125_v51, %v2124_v27  ;;  %v2127_v37 = vadd.f32 %v5625_v43, %v2089_v23  ;;  %v2128_v35 = vadd.f32 %v5625_v43, %v2090_v44  ;;  %v2093_v56 = vmul.f32 %v5622_v20, %v5502_v61  ;;  %p4006_p3 = scmp.ne.s32.totalorder %s5896_s29, %s4005_s2  ;;  %p4013_p12 = scmp.lt.s32.totalorder %s4011_s11, %s4005_s2 }
 0x6e6   : > { %v2129_v46 = vadd.f32 %v5625_v43, %v2091_v50  ;;  %v2130_v32 = vadd.f32 %v5625_v43, %v2092_v26  ;;  %v2188_v61 = vsub.s32 1, %v4970_v55  ;;  %v5788_v20 = vrot.slane %v2180_v9, %v4979_v33 }
 0x6e7   : > { %v2153_v8 = vpack.c.bf16 %v2127_v37, %v2126_v45  ;;  %v2131_v16 = vadd.f32 %v5625_v43, %v2093_v56  ;;  %p4007_p8 = pnand %p4006_p3, %p6095_p2  ;;  %p4014_p0 = por %p4013_p12, %p4012_p11 }
 0x6e8   : > { %v2154_v53 = vpack.c.bf16 %v2129_v46, %v2128_v35  ;;  %v5790_v43 = vrot.slane %v2180_v9, %v2188_v61 }
 0x6e9   : > { %v2155_v52 = vpack.c.bf16 %v2131_v16, %v2130_v32  ;;  %p4008_p6 = pneg %p4007_p8 }
 0x6eb   : > { %2325 = vmatmul.mubr.bf16.gmra.mrb[12].mxu0 %v2150_v54  ;;  %p4015_p5 = pnand %p4014_p0, %p4008_p6 }
 0x6ec   : > { %2334 = vmatprep.mubr.bf16.mxu0 %v4111_v2 }
 0x6f3   : > { %2335 = vmatmul.mubr.bf16.gmra.mrb[16].mxu0 %v2151_v60 }
 0x6f4   : > { %2344 = vmatprep.mubr.bf16.mxu0 %v4111_v2 }
 0x6fb   : > { %2345 = vmatmul.mubr.bf16.gmra.mrb[20].mxu0 %v2152_v31 }
 0x6fc   : > { %2354 = vmatprep.mubr.bf16.mxu0 %v4111_v2 }
 0x703   : > { %2355 = vmatmul.mubr.bf16.gmra.mrb[24].mxu0 %v2153_v8 }
 0x704   : > { %2364 = vmatprep.mubr.bf16.mxu0 %v4111_v2 }
 0x70b   : > { %2365 = vmatmul.mubr.bf16.gmra.mrb[28].mxu0 %v2154_v53 }
 0x70c   : > { %2374 = vmatprep.mubr.bf16.mxu0 %v4111_v2 }
 0x713   : > { %2375 = vmatmul.mubr.bf16.gmra.mrb[32].mxu0 %v2155_v52 }
 0x714   : > { %2384 = vmatprep.mubr.bf16.mxu0 %v4111_v2 }
 0x71b   : > { %2385 = vmatmul.mubr.bf16.gmra.mrb[36].mxu0 %v2156_v57 }
 0x71c   : > { %2394 = vmatprep.mubr.bf16.mxu0 %v4111_v2 }
 0x723   : > { %2395 = vmatmul.mubr.bf16.gmra.mrb[40].mxu0 %v2157_v48 }
 0x724   : > { %2404 = vmatprep.mubr.bf16.mxu0 %v4111_v2 }
 0x72b   : > { %2405 = vmatmul.mubr.bf16.gmra.mrb[44].mxu0 %v2158_v34 }
 0x72c   : > { %2414 = vmatprep.mubr.bf16.mxu0 %v4111_v2 }
 0x733   : > { %2415 = vmatmul.mubr.bf16.gmra.mrb[48].mxu0 %v2159_v0 }
 0x734   : > { %2424 = vmatprep.mubr.bf16.mxu0 %v4111_v2 }
 0x73b   : > { %2425 = vmatmul.mubr.bf16.gmra.mrb[52].mxu0 %v2160_v17 }
 0x73c   : > { %2434 = vmatprep.mubr.bf16.mxu0 %v4111_v2 }
 0x743   : > { %2435 = vmatmul.mubr.bf16.gmra.mrb[56].mxu0 %v2161_v21 }
 0x744   : > { %2444 = vmatprep.mubr.bf16.mxu0 %v4111_v2 }
 0x74b   : > { %2445 = vmatmul.mubr.bf16.gmra.mrb[60].mxu0 %v2162_v36 }
 0x74c   : > { %2454 = vmatprep.mubr.bf16.mxu0 %v4111_v2 }
 0x753   : > { %2455 = vmatmul.mubr.bf16.gmra.mrb[64].mxu0 %v2163_v28 }
 0x7ae   : > { %v2306_v6 = vpop.f32.mrb[4].mxu0 }
 0x7af   : > { %v2307_v3 = vadd.f32 %v2306_v6, %v5788_v20  ;;  %v2308_v58 = vpop.f32.mrb[5].mxu0 }
 0x7b0   : > { %v2309_v7 = vadd.f32 %v2308_v58, %v5790_v43  ;;  %v2310_v2 = vpop.f32.mrb[6].mxu0 }
 0x7b1   : > { %v2465_v40 = vmax.f32 %v2307_v3, 0.0  ;;  %v2311_v47 = vadd.f32 %v2310_v2, %v5788_v20  ;;  %v2312_v49 = vpop.f32.mrb[7].mxu0 }
 0x7b2   : > { %v2466_v38 = vmax.f32 %v2309_v7, 0.0  ;;  %v2313_v55 = vadd.f32 %v2312_v49, %v5790_v43 }
 0x7b3   : > { %v2467_v19 = vmax.f32 %v2311_v47, 0.0 }
 0x7b4   : > { %v3041_v33 = vpack.c.bf16 %v2466_v38, %v2465_v40  ;;  %v2468_v57 = vmax.f32 %v2313_v55, 0.0 }
 0x7b6   : > { %2721 = vst [vmem:[%s5797_s16] sm:$0xff] %v3041_v33  ;;  %v3042_v12 = vpack.c.bf16 %v2468_v57, %v2467_v19  ;;  %v2316_v41 = vpop.f32.mrb[8].mxu0 }
 0x7b7   : > { %v2317_v5 = vadd.f32 %v2316_v41, %v5788_v20  ;;  %v2318_v48 = vpop.f32.mrb[9].mxu0 }
 0x7b8   : > { %2722 = vst [vmem:[%s5797_s16 + $0x8] sm:$0xff] %v3042_v12  ;;  %v2319_v34 = vadd.f32 %v2318_v48, %v5790_v43  ;;  %v2320_v42 = vpop.f32.mrb[10].mxu0 }
 0x7b9   : > { %v2469_v10 = vmax.f32 %v2317_v5, 0.0  ;;  %v2321_v0 = vadd.f32 %v2320_v42, %v5788_v20  ;;  %v2322_v39 = vpop.f32.mrb[11].mxu0 }
 0x7ba   : > { %v2470_v24 = vmax.f32 %v2319_v34, 0.0  ;;  %v2323_v29 = vadd.f32 %v2322_v39, %v5790_v43 }
 0x7bb   : > { %v2471_v17 = vmax.f32 %v2321_v0, 0.0 }
 0x7bc   : > { %v3043_v22 = vpack.c.bf16 %v2470_v24, %v2469_v10  ;;  %v2472_v30 = vmax.f32 %v2323_v29, 0.0 }
 0x7be   : > { %2723 = vst [vmem:[%s5797_s16 + $0x10] sm:$0xff] %v3043_v22  ;;  %v3044_v11 = vpack.c.bf16 %v2472_v30, %v2471_v17  ;;  %v2326_v4 = vpop.f32.mrb[12].mxu0 }
 0x7bf   : > { %v2327_v21 = vadd.f32 %v2326_v4, %v5788_v20  ;;  %v2328_v36 = vpop.f32.mrb[13].mxu0 }
 0x7c0   : > { %2724 = vst [vmem:[%s5797_s16 + $0x18] sm:$0xff] %v3044_v11  ;;  %v2329_v28 = vadd.f32 %v2328_v36, %v5790_v43  ;;  %v2330_v25 = vpop.f32.mrb[14].mxu0 }
 0x7c1   : > { %v2473_v63 = vmax.f32 %v2327_v21, 0.0  ;;  %v2331_v54 = vadd.f32 %v2330_v25, %v5788_v20  ;;  %v2332_v59 = vpop.f32.mrb[15].mxu0 }
 0x7c2   : > { %v2474_v1 = vmax.f32 %v2329_v28, 0.0  ;;  %v2333_v14 = vadd.f32 %v2332_v59, %v5790_v43 }
 0x7c3   : > { %v2475_v62 = vmax.f32 %v2331_v54, 0.0 }
 0x7c4   : > { %v3045_v60 = vpack.c.bf16 %v2474_v1, %v2473_v63  ;;  %v2476_v15 = vmax.f32 %v2333_v14, 0.0 }
 0x7c6   : > { %2725 = vst [vmem:[%s5797_s16 + $0x20] sm:$0xff] %v3045_v60  ;;  %v3046_v13 = vpack.c.bf16 %v2476_v15, %v2475_v62  ;;  %v2336_v27 = vpop.f32.mrb[16].mxu0 }
 0x7c7   : > { %v2337_v51 = vadd.f32 %v2336_v27, %v5788_v20  ;;  %v2338_v31 = vpop.f32.mrb[17].mxu0 }
 0x7c8   : > { %2726 = vst [vmem:[%s5797_s16 + $0x28] sm:$0xff] %v3046_v13  ;;  %v2339_v18 = vadd.f32 %v2338_v31, %v5790_v43  ;;  %v2340_v23 = vpop.f32.mrb[18].mxu0 }
 0x7c9   : > { %v2477_v45 = vmax.f32 %v2337_v51, 0.0  ;;  %v2341_v37 = vadd.f32 %v2340_v23, %v5788_v20  ;;  %v2342_v8 = vpop.f32.mrb[19].mxu0 }
 0x7ca   : > { %v2478_v44 = vmax.f32 %v2339_v18, 0.0  ;;  %v2343_v50 = vadd.f32 %v2342_v8, %v5790_v43 }
 0x7cb   : > { %v2479_v35 = vmax.f32 %v2341_v37, 0.0 }
 0x7cc   : > { %v3047_v46 = vpack.c.bf16 %v2478_v44, %v2477_v45  ;;  %v2480_v53 = vmax.f32 %v2343_v50, 0.0 }
 0x7ce   : > { %2727 = vst [vmem:[%s5797_s16 + $0x30] sm:$0xff] %v3047_v46  ;;  %v3048_v26 = vpack.c.bf16 %v2480_v53, %v2479_v35  ;;  %v2346_v56 = vpop.f32.mrb[20].mxu0 }
 0x7cf   : > { %v2347_v32 = vadd.f32 %v2346_v56, %v5788_v20  ;;  %v2348_v16 = vpop.f32.mrb[21].mxu0 }
 0x7d0   : > { %2728 = vst [vmem:[%s5797_s16 + $0x38] sm:$0xff] %v3048_v26  ;;  %v2349_v52 = vadd.f32 %v2348_v16, %v5790_v43  ;;  %v2350_v9 = vpop.f32.mrb[22].mxu0 }
 0x7d1   : > { %v2481_v61 = vmax.f32 %v2347_v32, 0.0  ;;  %v2351_v6 = vadd.f32 %v2350_v9, %v5788_v20  ;;  %v2352_v3 = vpop.f32.mrb[23].mxu0 }
 0x7d2   : > { %v2482_v58 = vmax.f32 %v2349_v52, 0.0  ;;  %v2353_v7 = vadd.f32 %v2352_v3, %v5790_v43 }
 0x7d3   : > { %v2483_v2 = vmax.f32 %v2351_v6, 0.0 }
 0x7d4   : > { %v3049_v40 = vpack.c.bf16 %v2482_v58, %v2481_v61  ;;  %v2484_v47 = vmax.f32 %v2353_v7, 0.0 }
 0x7d6   : > { %2729 = vst [vmem:[%s5797_s16 + $0x40] sm:$0xff] %v3049_v40  ;;  %v3050_v49 = vpack.c.bf16 %v2484_v47, %v2483_v2  ;;  %v2356_v38 = vpop.f32.mrb[24].mxu0 }
 0x7d7   : > { %v2357_v55 = vadd.f32 %v2356_v38, %v5788_v20  ;;  %v2358_v19 = vpop.f32.mrb[25].mxu0 }
 0x7d8   : > { %2730 = vst [vmem:[%s5797_s16 + $0x48] sm:$0xff] %v3050_v49  ;;  %v2359_v33 = vadd.f32 %v2358_v19, %v5790_v43  ;;  %v2360_v57 = vpop.f32.mrb[26].mxu0 }
 0x7d9   : > { %v2485_v12 = vmax.f32 %v2357_v55, 0.0  ;;  %v2361_v41 = vadd.f32 %v2360_v57, %v5788_v20  ;;  %v2362_v5 = vpop.f32.mrb[27].mxu0 }
 0x7da   : > { %v2486_v48 = vmax.f32 %v2359_v33, 0.0  ;;  %v2363_v34 = vadd.f32 %v2362_v5, %v5790_v43 }
 0x7db   : > { %v2487_v42 = vmax.f32 %v2361_v41, 0.0 }
 0x7dc   : > { %v3051_v10 = vpack.c.bf16 %v2486_v48, %v2485_v12  ;;  %v2488_v0 = vmax.f32 %v2363_v34, 0.0 }
 0x7de   : > { %2731 = vst [vmem:[%s5797_s16 + $0x50] sm:$0xff] %v3051_v10  ;;  %v3052_v39 = vpack.c.bf16 %v2488_v0, %v2487_v42  ;;  %v2366_v24 = vpop.f32.mrb[28].mxu0 }
 0x7df   : > { %v2367_v29 = vadd.f32 %v2366_v24, %v5788_v20  ;;  %v2368_v17 = vpop.f32.mrb[29].mxu0 }
 0x7e0   : > { %2732 = vst [vmem:[%s5797_s16 + $0x58] sm:$0xff] %v3052_v39  ;;  %v2369_v22 = vadd.f32 %v2368_v17, %v5790_v43  ;;  %v2370_v30 = vpop.f32.mrb[30].mxu0 }
 0x7e1   : > { %v2489_v11 = vmax.f32 %v2367_v29, 0.0  ;;  %v2371_v4 = vadd.f32 %v2370_v30, %v5788_v20  ;;  %v2372_v21 = vpop.f32.mrb[31].mxu0 }
 0x7e2   : > { %v2490_v36 = vmax.f32 %v2369_v22, 0.0  ;;  %v2373_v28 = vadd.f32 %v2372_v21, %v5790_v43 }
 0x7e3   : > { %v2491_v25 = vmax.f32 %v2371_v4, 0.0 }
 0x7e4   : > { %v3053_v63 = vpack.c.bf16 %v2490_v36, %v2489_v11  ;;  %v2492_v54 = vmax.f32 %v2373_v28, 0.0 }
 0x7e6   : > { %2733 = vst [vmem:[%s5797_s16 + $0x60] sm:$0xff] %v3053_v63  ;;  %v3054_v59 = vpack.c.bf16 %v2492_v54, %v2491_v25  ;;  %v2376_v1 = vpop.f32.mrb[32].mxu0 }
 0x7e7   : > { %v2377_v14 = vadd.f32 %v2376_v1, %v5788_v20  ;;  %v2378_v62 = vpop.f32.mrb[33].mxu0 }
 0x7e8   : > { %2734 = vst [vmem:[%s5797_s16 + $0x68] sm:$0xff] %v3054_v59  ;;  %v2379_v60 = vadd.f32 %v2378_v62, %v5790_v43  ;;  %v2380_v15 = vpop.f32.mrb[34].mxu0 }
 0x7e9   : > { %v2493_v13 = vmax.f32 %v2377_v14, 0.0  ;;  %v2381_v27 = vadd.f32 %v2380_v15, %v5788_v20  ;;  %v2382_v51 = vpop.f32.mrb[35].mxu0 }
 0x7ea   : > { %v2494_v31 = vmax.f32 %v2379_v60, 0.0  ;;  %v2383_v18 = vadd.f32 %v2382_v51, %v5790_v43 }
 0x7eb   : > { %v2495_v23 = vmax.f32 %v2381_v27, 0.0 }
 0x7ec   : > { %v3055_v45 = vpack.c.bf16 %v2494_v31, %v2493_v13  ;;  %v2496_v37 = vmax.f32 %v2383_v18, 0.0 }
 0x7ee   : > { %2735 = vst [vmem:[%s5797_s16 + $0x70] sm:$0xff] %v3055_v45  ;;  %v3056_v8 = vpack.c.bf16 %v2496_v37, %v2495_v23  ;;  %v2386_v44 = vpop.f32.mrb[36].mxu0 }
 0x7ef   : > { %v2387_v50 = vadd.f32 %v2386_v44, %v5788_v20  ;;  %v2388_v35 = vpop.f32.mrb[37].mxu0 }
 0x7f0   : > { %2736 = vst [vmem:[%s5797_s16 + $0x78] sm:$0xff] %v3056_v8  ;;  %v2389_v46 = vadd.f32 %v2388_v35, %v5790_v43  ;;  %v2390_v53 = vpop.f32.mrb[38].mxu0 }
 0x7f1   : > { %v2497_v26 = vmax.f32 %v2387_v50, 0.0  ;;  %v2391_v56 = vadd.f32 %v2390_v53, %v5788_v20  ;;  %v2392_v32 = vpop.f32.mrb[39].mxu0 }
 0x7f2   : > { %v2498_v16 = vmax.f32 %v2389_v46, 0.0  ;;  %v2393_v52 = vadd.f32 %v2392_v32, %v5790_v43 }
 0x7f3   : > { %v2499_v9 = vmax.f32 %v2391_v56, 0.0 }
 0x7f4   : > { %v3057_v61 = vpack.c.bf16 %v2498_v16, %v2497_v26  ;;  %v2500_v6 = vmax.f32 %v2393_v52, 0.0 }
 0x7f6   : > { %2737 = vst [vmem:[%s5797_s16 + $0x80] sm:$0xff] %v3057_v61  ;;  %v3058_v3 = vpack.c.bf16 %v2500_v6, %v2499_v9  ;;  %v2396_v58 = vpop.f32.mrb[40].mxu0 }
 0x7f7   : > { %v2397_v7 = vadd.f32 %v2396_v58, %v5788_v20  ;;  %v2398_v2 = vpop.f32.mrb[41].mxu0 }
 0x7f8   : > { %2738 = vst [vmem:[%s5797_s16 + $0x88] sm:$0xff] %v3058_v3  ;;  %v2399_v40 = vadd.f32 %v2398_v2, %v5790_v43  ;;  %v2400_v47 = vpop.f32.mrb[42].mxu0 }
 0x7f9   : > { %v2501_v49 = vmax.f32 %v2397_v7, 0.0  ;;  %v2401_v38 = vadd.f32 %v2400_v47, %v5788_v20  ;;  %v2402_v55 = vpop.f32.mrb[43].mxu0 }
 0x7fa   : > { %v2502_v19 = vmax.f32 %v2399_v40, 0.0  ;;  %v2403_v33 = vadd.f32 %v2402_v55, %v5790_v43 }
 0x7fb   : > { %v2503_v57 = vmax.f32 %v2401_v38, 0.0 }
 0x7fc   : > { %v3059_v12 = vpack.c.bf16 %v2502_v19, %v2501_v49  ;;  %v2504_v41 = vmax.f32 %v2403_v33, 0.0 }
 0x7fe   : > { %2739 = vst [vmem:[%s5797_s16 + $0x90] sm:$0xff] %v3059_v12  ;;  %v3060_v5 = vpack.c.bf16 %v2504_v41, %v2503_v57  ;;  %v2406_v48 = vpop.f32.mrb[44].mxu0 }
 0x7ff   : > { %v2407_v34 = vadd.f32 %v2406_v48, %v5788_v20  ;;  %v2408_v42 = vpop.f32.mrb[45].mxu0 }
 0x800   : > { %2740 = vst [vmem:[%s5797_s16 + $0x98] sm:$0xff] %v3060_v5  ;;  %v2409_v10 = vadd.f32 %v2408_v42, %v5790_v43  ;;  %v2410_v0 = vpop.f32.mrb[46].mxu0 }
 0x801   : > { %v2505_v39 = vmax.f32 %v2407_v34, 0.0  ;;  %v2411_v24 = vadd.f32 %v2410_v0, %v5788_v20  ;;  %v2412_v29 = vpop.f32.mrb[47].mxu0 }
 0x802   : > { %v2506_v17 = vmax.f32 %v2409_v10, 0.0  ;;  %v2413_v22 = vadd.f32 %v2412_v29, %v5790_v43 }
 0x803   : > { %v2507_v30 = vmax.f32 %v2411_v24, 0.0 }
 0x804   : > { %v3061_v11 = vpack.c.bf16 %v2506_v17, %v2505_v39  ;;  %v2508_v4 = vmax.f32 %v2413_v22, 0.0 }
 0x806   : > { %2741 = vst [vmem:[%s5797_s16 + $0xa0] sm:$0xff] %v3061_v11  ;;  %v3062_v21 = vpack.c.bf16 %v2508_v4, %v2507_v30  ;;  %v2416_v36 = vpop.f32.mrb[48].mxu0 }
 0x807   : > { %v2417_v28 = vadd.f32 %v2416_v36, %v5788_v20  ;;  %v2418_v25 = vpop.f32.mrb[49].mxu0 }
 0x808   : > { %2742 = vst [vmem:[%s5797_s16 + $0xa8] sm:$0xff] %v3062_v21  ;;  %v2419_v63 = vadd.f32 %v2418_v25, %v5790_v43  ;;  %v2420_v54 = vpop.f32.mrb[50].mxu0 }
 0x809   : > { %v2509_v59 = vmax.f32 %v2417_v28, 0.0  ;;  %v2421_v1 = vadd.f32 %v2420_v54, %v5788_v20  ;;  %v2422_v14 = vpop.f32.mrb[51].mxu0 }
 0x80a   : > { %v2510_v62 = vmax.f32 %v2419_v63, 0.0  ;;  %v2423_v60 = vadd.f32 %v2422_v14, %v5790_v43 }
 0x80b   : > { %v2511_v15 = vmax.f32 %v2421_v1, 0.0 }
 0x80c   : > { %v3063_v13 = vpack.c.bf16 %v2510_v62, %v2509_v59  ;;  %v2512_v27 = vmax.f32 %v2423_v60, 0.0 }
 0x80e   : > { %2743 = vst [vmem:[%s5797_s16 + $0xb0] sm:$0xff] %v3063_v13  ;;  %v3064_v51 = vpack.c.bf16 %v2512_v27, %v2511_v15  ;;  %v2426_v31 = vpop.f32.mrb[52].mxu0 }
 0x80f   : > { %v2427_v18 = vadd.f32 %v2426_v31, %v5788_v20  ;;  %v2428_v23 = vpop.f32.mrb[53].mxu0 }
 0x810   : > { %2744 = vst [vmem:[%s5797_s16 + $0xb8] sm:$0xff] %v3064_v51  ;;  %v2429_v45 = vadd.f32 %v2428_v23, %v5790_v43  ;;  %v2430_v37 = vpop.f32.mrb[54].mxu0 }
 0x811   : > { %v2513_v8 = vmax.f32 %v2427_v18, 0.0  ;;  %v2431_v44 = vadd.f32 %v2430_v37, %v5788_v20  ;;  %v2432_v50 = vpop.f32.mrb[55].mxu0 }
 0x812   : > { %v2514_v35 = vmax.f32 %v2429_v45, 0.0  ;;  %v2433_v46 = vadd.f32 %v2432_v50, %v5790_v43 }
 0x813   : > { %v2515_v53 = vmax.f32 %v2431_v44, 0.0 }
 0x814   : > { %v3065_v26 = vpack.c.bf16 %v2514_v35, %v2513_v8  ;;  %v2516_v56 = vmax.f32 %v2433_v46, 0.0 }
 0x816   : > { %2745 = vst [vmem:[%s5797_s16 + $0xc0] sm:$0xff] %v3065_v26  ;;  %v3066_v32 = vpack.c.bf16 %v2516_v56, %v2515_v53  ;;  %v2436_v16 = vpop.f32.mrb[56].mxu0 }
 0x817   : > { %v2437_v52 = vadd.f32 %v2436_v16, %v5788_v20  ;;  %v2438_v9 = vpop.f32.mrb[57].mxu0 }
 0x818   : > { %2746 = vst [vmem:[%s5797_s16 + $0xc8] sm:$0xff] %v3066_v32  ;;  %v2439_v61 = vadd.f32 %v2438_v9, %v5790_v43  ;;  %v2440_v6 = vpop.f32.mrb[58].mxu0 }
 0x819   : > { %v2517_v3 = vmax.f32 %v2437_v52, 0.0  ;;  %v2441_v58 = vadd.f32 %v2440_v6, %v5788_v20  ;;  %v2442_v7 = vpop.f32.mrb[59].mxu0 }
 0x81a   : > { %v2518_v2 = vmax.f32 %v2439_v61, 0.0  ;;  %v2443_v40 = vadd.f32 %v2442_v7, %v5790_v43 }
 0x81b   : > { %v2519_v47 = vmax.f32 %v2441_v58, 0.0 }
 0x81c   : > { %v3067_v49 = vpack.c.bf16 %v2518_v2, %v2517_v3  ;;  %v2520_v38 = vmax.f32 %v2443_v40, 0.0 }
 0x81e   : > { %2747 = vst [vmem:[%s5797_s16 + $0xd0] sm:$0xff] %v3067_v49  ;;  %v3068_v55 = vpack.c.bf16 %v2520_v38, %v2519_v47  ;;  %v2446_v19 = vpop.f32.mrb[60].mxu0 }
 0x81f   : > { %v2447_v33 = vadd.f32 %v2446_v19, %v5788_v20  ;;  %v2448_v57 = vpop.f32.mrb[61].mxu0 }
 0x820   : > { %2748 = vst [vmem:[%s5797_s16 + $0xd8] sm:$0xff] %v3068_v55  ;;  %v2449_v12 = vadd.f32 %v2448_v57, %v5790_v43  ;;  %v2450_v41 = vpop.f32.mrb[62].mxu0 }
 0x821   : > { %v2521_v5 = vmax.f32 %v2447_v33, 0.0  ;;  %v2451_v48 = vadd.f32 %v2450_v41, %v5788_v20  ;;  %v2452_v34 = vpop.f32.mrb[63].mxu0 }
 0x822   : > { %v2522_v42 = vmax.f32 %v2449_v12, 0.0  ;;  %v2453_v10 = vadd.f32 %v2452_v34, %v5790_v43 }
 0x823   : > { %v2523_v0 = vmax.f32 %v2451_v48, 0.0 }
 0x824   : > { %v3069_v39 = vpack.c.bf16 %v2522_v42, %v2521_v5  ;;  %v2524_v24 = vmax.f32 %v2453_v10, 0.0 }
 0x826   : > { %2749 = vst [vmem:[%s5797_s16 + $0xe0] sm:$0xff] %v3069_v39  ;;  %v3070_v29 = vpack.c.bf16 %v2524_v24, %v2523_v0  ;;  %v2456_v17 = vpop.f32.mrb[64].mxu0 }
 0x827   : > { %v2457_v22 = vadd.f32 %v2456_v17, %v5788_v20  ;;  %v2458_v30 = vpop.f32.mrb[65].mxu0 }
 0x828   : > { %2750 = vst [vmem:[%s5797_s16 + $0xe8] sm:$0xff] %v3070_v29  ;;  %v2459_v11 = vadd.f32 %v2458_v30, %v5790_v43  ;;  %v2460_v4 = vpop.f32.mrb[66].mxu0 }
 0x829   : > { %v2525_v21 = vmax.f32 %v2457_v22, 0.0  ;;  %v2461_v36 = vadd.f32 %v2460_v4, %v5788_v20  ;;  %v2462_v28 = vpop.f32.mrb[67].mxu0 }
 0x82a   : > { %v2526_v25 = vmax.f32 %v2459_v11, 0.0  ;;  %v2463_v63 = vadd.f32 %v2462_v28, %v5790_v43 }
 0x82b   : > { %v2527_v54 = vmax.f32 %v2461_v36, 0.0 }
 0x82c   : > { %v3071_v59 = vpack.c.bf16 %v2526_v25, %v2525_v21  ;;  %v2528_v1 = vmax.f32 %v2463_v63, 0.0 }
 0x82e   : > { %2751 = vst [vmem:[%s5797_s16 + $0xf0] sm:$0xff] %v3071_v59  ;;  %v3072_v20 = vpack.c.bf16 %v2528_v1, %v2527_v54 }
 0x830   : > { %2752 = vst [vmem:[%s5797_s16 + $0xf8] sm:$0xff] %v3072_v20 }
 0x831   : > { %4018 = shalt.err (!%p4015_p5)
}
 0x832   : > { %s4019_s16 = scalar_lea.hbm %s5894_s30, 4096  ;;  %s4023_s27 = scalar_lea.hbm %s6094_s1, 8192 }
 0x833   : > { %p4020_p9 = scmp.ne.s32.totalorder %s5894_s30, %s4019_s16  ;;  %p4024_p4 = scmp.lt.u32.totalorder %s5894_s30, %s6094_s1 }
 0x834   : > { %p4025_p13 = scmp.lt.u32.totalorder %s4023_s27, %s4019_s16  ;;  %p4027_p3 = scmp.lt.u32.totalorder %s4019_s16, %s5894_s30 }
 0x835   : > { %p4021_p7 = pnand %p4020_p9, %p6095_p2 }
 0x836   : > { %p4026_p1 = por %p4025_p13, %p4024_p4 }
 0x837   : > { %p4022_p10 = pneg %p4021_p7 }
 0x838   : > { %p4028_p8 = por %p4027_p3, %p4026_p1 }
 0x83a   : > { %p4029_p6 = pnand %p4028_p8, %p4022_p10 }
 0x83c   : > { %4032 = shalt.err (!%p4029_p6)
}
 0x83d   : > { %s4113_s2 = smov 128   ;;  %s4114_s11 = smov 8  }
 0x83e   : > { %s6096_s3 = scalar_lea.sflag [#allocation5], %s4511_s4 }
 0x83f   : > { %3569 = dma.vmem_to_hbm [thread:$0]  (%p6095_p2), %s5896_s29, 4096, %s5894_s30, %s6096_s3, %s4113_s2, %s4113_s2, %s4114_s11  }
 0x840 PF: > { %s2782_s14 = sand.u32 1, %s4079_s21   ;;  %p6097_p11 = scmp.ne.s32.totalorder %s6018_s26, 0 }
 0x841   : > { %p6098_p12 = scmp.ge.s32.totalorder %s4091_s24, 2  ;;  %s2783_s16 = scalar_lea.sflag [#allocation5], %s2782_s14 }
 0x843   : > { %p3604_p0 = pnand %p6098_p12, %p6097_p11 }
 0x845   : > { %4074 = dma.done.wait (!%p3604_p0), %s2783_s16, 4096  }
 0x846   : > { %4076 = vsyncadd (!%p3604_p0), %s2783_s16, 4294963200  ;;  %p34_p5 = scmp.ge.s32.totalorder %s4435_s15, 4   ;;  %s6099_s21 = smov %s4083_s22 }
 0x847   : > { %s6100_s22 = smov %s4087_s23  ;;  %s6101_s23 = smov %s4447_s0 }
 0x848   : > { %s6102_s24 = smov %s4435_s15  ;;  %36 = sbr.rel (!%p34_p5) target bundleno = 22 (0x16), region = 168 }
 0x84f   :  { %2788 = vsyncpa [#allocation4], 1 }
 0x850   :  { %2790 = vsyncpa [#allocation4 + $0x1], 1 }
 0x851   :  { %2791 = vsyncpa [#allocation7], 1 }
 0x852   :  { %2792 = vsyncpa [#allocation10], 1 }
 0x853   :  { %2793 = vsyncpa [#allocation13], 1 }
 0x854   :  { %2794 = vsyncpa [#allocation16], 1 }
 0x855   :  { %2795 = vsyncpa [#allocation19], 1 }
 0x856   :  { %2796 = vsyncpa [#allocation5], 1 }
 0x857   :  { %2798 = vsyncpa [#allocation5 + $0x1], 1 }

</bundles_post_ra>
